<compile_context>
chip_gen: v5e
topology: v5e:2x2
jax: 0.10.0
libtpu: 0.0.40
codegen_flags: <defaults>
</compile_context>

<pallas_src>
import jax
import jax.numpy as jnp
from jax.experimental import pallas as pl
from jax.experimental.pallas import tpu as pltpu


def _rank_kernel(xs_ref,
                 w1_ref, b1_ref,
                 w2_ref, b2_ref,
                 w3_ref, b3_ref,
                 w4_ref,
                 out_ref):
    """sigmoid(mlp(x1) - mlp(x2)) for one batch tile.

    xs_ref holds the stacked pair (2, TB, F); the shared 3-layer MLP runs once
    on the (2*TB, F) operand (MXU), then the last layer is fused with the
    pairwise difference and written lane-dense as (1, TB).
    """
    tb = xs_ref.shape[1]
    f = xs_ref.shape[2]

    # (2, TB, F) -> (2*TB, F); bf16 operands for the MXU, f32 accumulation.
    x = xs_ref[...].reshape(2 * tb, f).astype(jnp.bfloat16)

    def layer(h_bf16, w_ref, b_ref):
        y = jnp.dot(h_bf16, w_ref[...], preferred_element_type=jnp.float32)
        return jnp.maximum(y + b_ref[...], 0.0)   # dropout = identity (eval)

    h = layer(x, w1_ref, b1_ref)                          # (2TB, 512) f32
    h = layer(h.astype(jnp.bfloat16), w2_ref, b2_ref)     # (2TB, 256) f32
    h = layer(h.astype(jnp.bfloat16), w3_ref, b3_ref)     # (2TB, 128) f32

    # Fused last layer + pairwise difference (b4 cancels exactly):
    #   s1 - s2 = (h3_1 - h3_2) @ w4
    d = h[:tb, :] - h[tb:, :]                             # (TB, 128) f32
    # (1,128) contracted with (TB,128) on the 128-axis -> (1, TB): the batch
    # lands on the lane axis, so the store is lane-dense / unmasked.
    s = jax.lax.dot_general(w4_ref[...], d,
                            (((1,), (1,)), ((), ())),
                            preferred_element_type=jnp.float32)
    out_ref[...] = jax.nn.sigmoid(s)


def rank_model_forward(x1, x2, kernel_params, *, batch_tile=256):
    """Pallas wrapper: 1-D parallel grid over batch tiles, weights resident."""
    (w1, b1, w2, b2, w3, b3, w4) = kernel_params
    B, F = x1.shape
    assert x2.shape == (B, F)

    bt = min(batch_tile, B)
    if B % bt != 0:
        raise ValueError(f"batch {B} must be divisible by batch_tile {bt}")
    # Keep >= 2 grid steps when possible so both v7x TensorCores are used.
    if B // bt < 2 and bt % 2 == 0 and bt >= 16:
        bt //= 2
    grid = (B // bt,)

    xs = jnp.stack([x1, x2], axis=0)          # (2, B, F): one stacked operand

    def const_spec(arr):
        nd = arr.ndim
        return pl.BlockSpec(arr.shape, lambda i, _nd=nd: (0,) * _nd)

    out = pl.pallas_call(
        _rank_kernel,
        out_shape=jax.ShapeDtypeStruct((1, B), jnp.float32),   # lane-dense slab
        grid_spec=pltpu.PrefetchScalarGridSpec(
            num_scalar_prefetch=0,
            grid=grid,
            in_specs=[
                pl.BlockSpec((2, bt, F), lambda i: (0, i, 0)),
                const_spec(w1), const_spec(b1),
                const_spec(w2), const_spec(b2),
                const_spec(w3), const_spec(b3),
                const_spec(w4),
            ],
            out_specs=pl.BlockSpec((1, bt), lambda i: (0, i)),
        ),
        compiler_params=pltpu.CompilerParams(
            dimension_semantics=("parallel",),
            vmem_limit_bytes=32 * 1024 * 1024),
    )(xs, w1, b1, w2, b2, w3, b3, w4)

    return out.reshape(B, 1)


def init_params(key, num_features):
    """nn.Linear-style init (uniform +/- 1/sqrt(fan_in)), f32 master copy.

    Weights stored as (in_features, out_features); biases as (1, out_features).
    """
    dims = [num_features, 512, 256, 128, 1]
    params = []
    for i in range(4):
        fan_in, fan_out = dims[i], dims[i + 1]
        key, kw, kb = jax.random.split(key, 3)
        bound = 1.0 / jnp.sqrt(jnp.float32(fan_in))
        w = jax.random.uniform(kw, (fan_in, fan_out), jnp.float32,
                               minval=-bound, maxval=bound)
        b = jax.random.uniform(kb, (1, fan_out), jnp.float32,
                               minval=-bound, maxval=bound)
        params += [w, b]
    return tuple(params)


def prepare_kernel_params(params):
    """One-time wrapper-side prep: bf16 weights; w4 as a (1,128) row; b4 unused
    because it cancels in s1 - s2."""
    (w1, b1, w2, b2, w3, b3, w4, b4) = params
    del b4
    return (w1.astype(jnp.bfloat16), b1,
            w2.astype(jnp.bfloat16), b2,
            w3.astype(jnp.bfloat16), b3,
            w4.reshape(1, -1))                 # kept f32 for the tiny final product


def _reference(x1, x2, params):
    """Pure-JAX f32 reference for a sanity check."""
    (w1, b1, w2, b2, w3, b3, w4, b4) = params

    def mlp(x):
        h = jnp.maximum(x @ w1 + b1, 0.0)
        h = jnp.maximum(h @ w2 + b2, 0.0)
        h = jnp.maximum(h @ w3 + b3, 0.0)
        return h @ w4 + b4

    return jax.nn.sigmoid(mlp(x1) - mlp(x2))


if __name__ == "__main__":
    key = jax.random.PRNGKey(0)
    num_features = 32
    batch = 512            # 2 grid steps of 256 rows each

    kp, k1, k2 = jax.random.split(key, 3)
    params = init_params(kp, num_features)
    x1 = jax.random.normal(k1, (batch, num_features), jnp.float32)
    x2 = jax.random.normal(k2, (batch, num_features), jnp.float32)

    kparams = prepare_kernel_params(params)
    out = rank_model_forward(x1, x2, kparams, batch_tile=256)
    out = jax.block_until_ready(out)

    ref = _reference(x1, x2, params)
    assert out.shape == (batch, 1)
    # bf16 matmul operands -> loosened tolerance vs the f32 reference.
    max_err = float(jnp.max(jnp.abs(out - ref)))
    assert jnp.allclose(out, ref, atol=2e-2, rtol=0), max_err

    print("KERNEL_OK")
</pallas_src>

<mosaic_0001>
module attributes {stable_mosaic.version = 11 : i64} {
  func.func @_rank_kernel(%arg0: i32, %arg1: memref<2x256x32xf32, #tpu.memory_space<vmem>>, %arg2: memref<32x512xbf16, #tpu.memory_space<vmem>>, %arg3: memref<1x512xf32, #tpu.memory_space<vmem>>, %arg4: memref<512x256xbf16, #tpu.memory_space<vmem>>, %arg5: memref<1x256xf32, #tpu.memory_space<vmem>>, %arg6: memref<256x128xbf16, #tpu.memory_space<vmem>>, %arg7: memref<1x128xf32, #tpu.memory_space<vmem>>, %arg8: memref<1x128xf32, #tpu.memory_space<vmem>>, %arg9: memref<1x256xf32, #tpu.memory_space<vmem>>) attributes {dimension_semantics = [#tpu.dimension_semantics<parallel>], iteration_bounds = array<i64: 2>, scalar_prefetch = 0 : i64, scratch_operands = 0 : i64, tpu.core_type = #tpu.core_type<tc>, window_params = [{transform_indices = @transform_0, window_bounds = array<i64: 2, 256, 32>}, {pipeline_mode = #tpu.pipeline_mode<synchronous>, transform_indices = @transform_1, window_bounds = array<i64: 32, 512>}, {pipeline_mode = #tpu.pipeline_mode<synchronous>, transform_indices = @transform_2, window_bounds = array<i64: 1, 512>}, {pipeline_mode = #tpu.pipeline_mode<synchronous>, transform_indices = @transform_3, window_bounds = array<i64: 512, 256>}, {pipeline_mode = #tpu.pipeline_mode<synchronous>, transform_indices = @transform_4, window_bounds = array<i64: 1, 256>}, {pipeline_mode = #tpu.pipeline_mode<synchronous>, transform_indices = @transform_5, window_bounds = array<i64: 256, 128>}, {pipeline_mode = #tpu.pipeline_mode<synchronous>, transform_indices = @transform_6, window_bounds = array<i64: 1, 128>}, {pipeline_mode = #tpu.pipeline_mode<synchronous>, transform_indices = @transform_7, window_bounds = array<i64: 1, 128>}, {transform_indices = @transform_8, window_bounds = array<i64: 1, 256>}]} {
    %c0 = arith.constant 0 : index
    %c0_0 = arith.constant 0 : index
    %c0_1 = arith.constant 0 : index
    %0 = vector.load %arg1[%c0, %c0_0, %c0_1] : memref<2x256x32xf32, #tpu.memory_space<vmem>>, vector<2x256x32xf32>
    %1 = vector.shape_cast %0 : vector<2x256x32xf32> to vector<512x32xf32>
    %2 = arith.truncf %1 : vector<512x32xf32> to vector<512x32xbf16>
    %c0_2 = arith.constant 0 : index
    %c0_3 = arith.constant 0 : index
    %3 = vector.load %arg2[%c0_2, %c0_3] : memref<32x512xbf16, #tpu.memory_space<vmem>>, vector<32x512xbf16>
    %cst = arith.constant dense<0.000000e+00> : vector<512x512xf32>
    %4 = tpu.matmul %2, %3, %cst {dimension_numbers = #tpu.dot_dimension_numbers<[1], [0], [0], [1], [0, 0, 1, 1], [], []>} : vector<512x32xbf16>, vector<32x512xbf16>, vector<512x512xf32> -> vector<512x512xf32>
    %c0_4 = arith.constant 0 : index
    %c0_5 = arith.constant 0 : index
    %5 = vector.load %arg3[%c0_4, %c0_5] : memref<1x512xf32, #tpu.memory_space<vmem>>, vector<1x512xf32>
    %6 = vector.broadcast %5 : vector<1x512xf32> to vector<512x512xf32>
    %7 = arith.addf %4, %6 : vector<512x512xf32>
    %cst_6 = arith.constant 0.000000e+00 : f32
    %8 = vector.broadcast %cst_6 : f32 to vector<512x512xf32>
    %9 = arith.maximumf %7, %8 : vector<512x512xf32>
    %10 = arith.truncf %9 : vector<512x512xf32> to vector<512x512xbf16>
    %c0_7 = arith.constant 0 : index
    %c0_8 = arith.constant 0 : index
    %11 = vector.load %arg4[%c0_7, %c0_8] : memref<512x256xbf16, #tpu.memory_space<vmem>>, vector<512x256xbf16>
    %cst_9 = arith.constant dense<0.000000e+00> : vector<512x256xf32>
    %12 = tpu.matmul %10, %11, %cst_9 {dimension_numbers = #tpu.dot_dimension_numbers<[1], [0], [0], [1], [0, 0, 1, 1], [], []>} : vector<512x512xbf16>, vector<512x256xbf16>, vector<512x256xf32> -> vector<512x256xf32>
    %c0_10 = arith.constant 0 : index
    %c0_11 = arith.constant 0 : index
    %13 = vector.load %arg5[%c0_10, %c0_11] : memref<1x256xf32, #tpu.memory_space<vmem>>, vector<1x256xf32>
    %14 = vector.broadcast %13 : vector<1x256xf32> to vector<512x256xf32>
    %15 = arith.addf %12, %14 : vector<512x256xf32>
    %cst_12 = arith.constant 0.000000e+00 : f32
    %16 = vector.broadcast %cst_12 : f32 to vector<512x256xf32>
    %17 = arith.maximumf %15, %16 : vector<512x256xf32>
    %18 = arith.truncf %17 : vector<512x256xf32> to vector<512x256xbf16>
    %c0_13 = arith.constant 0 : index
    %c0_14 = arith.constant 0 : index
    %19 = vector.load %arg6[%c0_13, %c0_14] : memref<256x128xbf16, #tpu.memory_space<vmem>>, vector<256x128xbf16>
    %cst_15 = arith.constant dense<0.000000e+00> : vector<512x128xf32>
    %20 = tpu.matmul %18, %19, %cst_15 {dimension_numbers = #tpu.dot_dimension_numbers<[1], [0], [0], [1], [0, 0, 1, 1], [], []>} : vector<512x256xbf16>, vector<256x128xbf16>, vector<512x128xf32> -> vector<512x128xf32>
    %c0_16 = arith.constant 0 : index
    %c0_17 = arith.constant 0 : index
    %21 = vector.load %arg7[%c0_16, %c0_17] : memref<1x128xf32, #tpu.memory_space<vmem>>, vector<1x128xf32>
    %22 = vector.broadcast %21 : vector<1x128xf32> to vector<512x128xf32>
    %23 = arith.addf %20, %22 : vector<512x128xf32>
    %cst_18 = arith.constant 0.000000e+00 : f32
    %24 = vector.broadcast %cst_18 : f32 to vector<512x128xf32>
    %25 = arith.maximumf %23, %24 : vector<512x128xf32>
    %26 = vector.extract_strided_slice %25 {offsets = [0, 0], sizes = [256, 128], strides = [1, 1]} : vector<512x128xf32> to vector<256x128xf32>
    %27 = vector.extract_strided_slice %25 {offsets = [256, 0], sizes = [256, 128], strides = [1, 1]} : vector<512x128xf32> to vector<256x128xf32>
    %28 = arith.subf %26, %27 : vector<256x128xf32>
    %c0_19 = arith.constant 0 : index
    %c0_20 = arith.constant 0 : index
    %29 = vector.load %arg8[%c0_19, %c0_20] : memref<1x128xf32, #tpu.memory_space<vmem>>, vector<1x128xf32>
    %cst_21 = arith.constant dense<0.000000e+00> : vector<1x256xf32>
    %30 = tpu.matmul %29, %28, %cst_21 {dimension_numbers = #tpu.dot_dimension_numbers<[1], [1], [0], [0], [0, 0, 1, 0], [], []>} : vector<1x128xf32>, vector<256x128xf32>, vector<1x256xf32> -> vector<1x256xf32>
    %31 = arith.negf %30 : vector<1x256xf32>
    %32 = math.exp %31 : vector<1x256xf32>
    %cst_22 = arith.constant 1.000000e+00 : f32
    %33 = vector.broadcast %cst_22 : f32 to vector<1x256xf32>
    %34 = arith.addf %33, %32 : vector<1x256xf32>
    %35 = arith.divf %33, %34 : vector<1x256xf32>
    %c0_23 = arith.constant 0 : index
    %c0_24 = arith.constant 0 : index
    %36 = vector.load %arg9[%c0_23, %c0_24] : memref<1x256xf32, #tpu.memory_space<vmem>>, vector<1x256xf32>
    tpu.vector_store %arg9[%c0_23, %c0_24], %35 {strides = array<i32>} : memref<1x256xf32, #tpu.memory_space<vmem>>, vector<1x256xf32>,
    return
  }
  func.func @transform_0(%arg0: i32) -> (i32, i32, i32) {
    %c0_i32 = arith.constant 0 : i32
    %c0_i32_0 = arith.constant 0 : i32
    %c0_i32_1 = arith.constant 0 : i32
    return %c0_i32, %arg0, %c0_i32_0 : i32, i32, i32
  }
  func.func @transform_1(%arg0: i32) -> (i32, i32) {
    %c0_i32 = arith.constant 0 : i32
    %c0_i32_0 = arith.constant 0 : i32
    %c0_i32_1 = arith.constant 0 : i32
    return %c0_i32, %c0_i32_0 : i32, i32
  }
  func.func @transform_2(%arg0: i32) -> (i32, i32) {
    %c0_i32 = arith.constant 0 : i32
    %c0_i32_0 = arith.constant 0 : i32
    %c0_i32_1 = arith.constant 0 : i32
    return %c0_i32, %c0_i32_0 : i32, i32
  }
  func.func @transform_3(%arg0: i32) -> (i32, i32) {
    %c0_i32 = arith.constant 0 : i32
    %c0_i32_0 = arith.constant 0 : i32
    %c0_i32_1 = arith.constant 0 : i32
    return %c0_i32, %c0_i32_0 : i32, i32
  }
  func.func @transform_4(%arg0: i32) -> (i32, i32) {
    %c0_i32 = arith.constant 0 : i32
    %c0_i32_0 = arith.constant 0 : i32
    %c0_i32_1 = arith.constant 0 : i32
    return %c0_i32, %c0_i32_0 : i32, i32
  }
  func.func @transform_5(%arg0: i32) -> (i32, i32) {
    %c0_i32 = arith.constant 0 : i32
    %c0_i32_0 = arith.constant 0 : i32
    %c0_i32_1 = arith.constant 0 : i32
    return %c0_i32, %c0_i32_0 : i32, i32
  }
  func.func @transform_6(%arg0: i32) -> (i32, i32) {
    %c0_i32 = arith.constant 0 : i32
    %c0_i32_0 = arith.constant 0 : i32
    %c0_i32_1 = arith.constant 0 : i32
    return %c0_i32, %c0_i32_0 : i32, i32
  }
  func.func @transform_7(%arg0: i32) -> (i32, i32) {
    %c0_i32 = arith.constant 0 : i32
    %c0_i32_0 = arith.constant 0 : i32
    %c0_i32_1 = arith.constant 0 : i32
    return %c0_i32, %c0_i32_0 : i32, i32
  }
  func.func @transform_8(%arg0: i32) -> (i32, i32) {
    %c0_i32 = arith.constant 0 : i32
    %c0_i32_0 = arith.constant 0 : i32
    return %c0_i32, %arg0 : i32, i32
  }
}

</mosaic_0001>

<bundles_post_ra>
// kernel: tpu_custom_call.1
= control target key start
LH: loop header
LB: loop body
LE: loop exit
PB: predicated region body
PF: predicated region fallthrough
CT: control target
= control target key end

     0   :  { %13 = vsyncpa [#allocation4], 0  ;;  %s8420_s0 = inlined_call_operand.vmem [shape: f32[2,512,32], index: 0, kind: input, shape index: {}]   ;;  %s8421_s1 = inlined_call_operand.vmem [shape: bf16[32,512], index: 1, kind: input, shape index: {}]   ;;  %s8422_s2 = inlined_call_operand.vmem [shape: f32[1,512], index: 2, kind: input, shape index: {}]   ;;  %s8423_s3 = inlined_call_operand.vmem [shape: bf16[512,256], index: 3, kind: input, shape index: {}]   ;;  %s8424_s4 = inlined_call_operand.vmem [shape: f32[1,256], index: 4, kind: input, shape index: {}]   ;;  %s8425_s5 = inlined_call_operand.vmem [shape: bf16[256,128], index: 5, kind: input, shape index: {}]   ;;  %s8426_s6 = inlined_call_operand.vmem [shape: f32[1,128], index: 6, kind: input, shape index: {}]   ;;  %s8427_s7 = inlined_call_operand.vmem [shape: f32[1,128], index: 7, kind: input, shape index: {}]   ;;  %s8428_s8 = inlined_call_operand.hbm [shape: f32[1,512], index: 8, kind: output, shape index: {}]  }
   0x1   :  { %15 = vsyncpa [#allocation4 + $0x1], 0  ;;  %s5325_s27 = smov 0   ;;  %s5327_s28 = smov 0  }
   0x2   :  { %s5329_s29 = smov 0   ;;  %s5331_s30 = smov 0  }
   0x3 LB: > { %s4576_s9 = sadd.s32 4294967295, %s5278_s30   ;;  %s4577_s10 = sadd.s32 4294967294, %s5278_s30   ;;  %s5278_s30 = sphi %s5331_s30, %s9112_s30   ;;  %s5274_s29 = sphi %s5329_s29, %s9111_s29   ;;  %s5270_s28 = sphi %s5327_s28, %s9110_s28   ;;  %s5266_s27 = sphi %s5325_s27, %s9109_s27  }
   0x4   : > { %s5348_s11 = sadd.s32 1, %s5278_s30   ;;  %s28_s12 = sadd.s32 1, %s5274_s29 }
   0x5   : > { %s25_s13 = ssub.s32 %s5278_s30, %s5348_s11  ;;  %p35_p0 = scmp.ne.s32.totalorder %s5274_s29, %s5270_s28 }
   0x6   : > { %p26_p1 = scmp.eq.s32.totalorder %s25_s13, 0  ;;  %p36_p2 = scmp.eq.s32.totalorder %s5278_s30, 0 }
   0x7   : > { %p212_p3 = scmp.eq.s32.totalorder %s4576_s9, 1  ;;  %p217_p4 = scmp.ne.s32.totalorder %s5270_s28, %s5266_s27 }
   0x8   : > { %s5361_s14 = scalar_select %p26_p1, %s5274_s29, %s28_s12  }
   0x9   : > { %p37_p5 = por %p36_p2, %p35_p0  ;;  %p5363_p6 = por %p212_p3, %p35_p0 }
   0xa   : > { %p218_p7 = scmp.eq.s32.totalorder %s4577_s10, 1  ;;  %p4579_p9 = scmp.ge.s32.totalorder %s5278_s30, 2 }
   0xc   : > { %p5367_p8 = por %p218_p7, %p217_p4  ;;  %255 = sbr.rel (%p4579_p9) target bundleno = 85 (0x55), region = 44 }
  0x11   : > { %258 = sbr.rel (!%p37_p5) target bundleno = 85 (0x55), region = 48  ;;  %s260_s17 = sand.u32 (%p37_p5), 1, %s5274_s29  }
  0x12   : > { %s5072_s18 = sshll.u32 (%p37_p5), %s5278_s30, 8  ;;  %s4580_s19 = sshll.u32 (%p37_p5), %s260_s17, 9 }
  0x13   : > { %s5379_s22 = scalar_lea.vmem (%p37_p5), %s8420_s0, %s5072_s18  ;;  %s5384_s23 = scalar_lea.vmem (%p37_p5), [#allocation2], %s4580_s19 }
  0x14   : > { %v420_v0 = vld [vmem:[%s5379_s22] sm:$0xff] (%p37_p5)  ;;  %v422_v1 = vld [vmem:[%s5379_s22 + $0x8] sm:$0xff] (%p37_p5)  ;;  %v424_v2 = vld [vmem:[%s5379_s22 + $0x10] sm:$0xff] (%p37_p5) }
  0x15   : > { %421 = vst [vmem:[%s5384_s23] sm:$0xff] (%p37_p5), %v420_v0  ;;  %v426_v3 = vld [vmem:[%s5379_s22 + $0x18] sm:$0xff] (%p37_p5)  ;;  %v428_v4 = vld [vmem:[%s5379_s22 + $0x20] sm:$0xff] (%p37_p5)  ;;  %v430_v5 = vld [vmem:[%s5379_s22 + $0x28] sm:$0xff] (%p37_p5) }
  0x16   : > { %423 = vst [vmem:[%s5384_s23 + $0x8] sm:$0xff] %v422_v1  ;;  %v432_v6 = vld [vmem:[%s5379_s22 + $0x30] sm:$0xff]  ;;  %v434_v7 = vld [vmem:[%s5379_s22 + $0x38] sm:$0xff]  ;;  %v436_v8 = vld [vmem:[%s5379_s22 + $0x40] sm:$0xff] }
  0x17   : > { %425 = vst [vmem:[%s5384_s23 + $0x10] sm:$0xff] %v424_v2  ;;  %v438_v9 = vld [vmem:[%s5379_s22 + $0x48] sm:$0xff]  ;;  %v440_v10 = vld [vmem:[%s5379_s22 + $0x50] sm:$0xff]  ;;  %v442_v11 = vld [vmem:[%s5379_s22 + $0x58] sm:$0xff] }
  0x18   : > { %427 = vst [vmem:[%s5384_s23 + $0x18] sm:$0xff] %v426_v3  ;;  %v444_v12 = vld [vmem:[%s5379_s22 + $0x60] sm:$0xff]  ;;  %v446_v13 = vld [vmem:[%s5379_s22 + $0x68] sm:$0xff]  ;;  %v448_v14 = vld [vmem:[%s5379_s22 + $0x70] sm:$0xff] }
  0x19   : > { %429 = vst [vmem:[%s5384_s23 + $0x20] sm:$0xff] %v428_v4  ;;  %v450_v15 = vld [vmem:[%s5379_s22 + $0x78] sm:$0xff]  ;;  %v452_v16 = vld [vmem:[%s5379_s22 + $0x80] sm:$0xff]  ;;  %v454_v17 = vld [vmem:[%s5379_s22 + $0x88] sm:$0xff] }
  0x1a   : > { %431 = vst [vmem:[%s5384_s23 + $0x28] sm:$0xff] %v430_v5  ;;  %v456_v18 = vld [vmem:[%s5379_s22 + $0x90] sm:$0xff]  ;;  %v458_v19 = vld [vmem:[%s5379_s22 + $0x98] sm:$0xff]  ;;  %v460_v20 = vld [vmem:[%s5379_s22 + $0xa0] sm:$0xff] }
  0x1b   : > { %433 = vst [vmem:[%s5384_s23 + $0x30] sm:$0xff] %v432_v6  ;;  %v462_v21 = vld [vmem:[%s5379_s22 + $0xa8] sm:$0xff]  ;;  %v464_v22 = vld [vmem:[%s5379_s22 + $0xb0] sm:$0xff]  ;;  %v466_v23 = vld [vmem:[%s5379_s22 + $0xb8] sm:$0xff] }
  0x1c   : > { %435 = vst [vmem:[%s5384_s23 + $0x38] sm:$0xff] %v434_v7  ;;  %v468_v24 = vld [vmem:[%s5379_s22 + $0xc0] sm:$0xff]  ;;  %v470_v25 = vld [vmem:[%s5379_s22 + $0xc8] sm:$0xff]  ;;  %v472_v26 = vld [vmem:[%s5379_s22 + $0xd0] sm:$0xff] }
  0x1d   : > { %437 = vst [vmem:[%s5384_s23 + $0x40] sm:$0xff] %v436_v8  ;;  %v474_v27 = vld [vmem:[%s5379_s22 + $0xd8] sm:$0xff]  ;;  %v476_v28 = vld [vmem:[%s5379_s22 + $0xe0] sm:$0xff]  ;;  %v478_v29 = vld [vmem:[%s5379_s22 + $0xe8] sm:$0xff] }
  0x1e   : > { %439 = vst [vmem:[%s5384_s23 + $0x48] sm:$0xff] %v438_v9  ;;  %v480_v30 = vld [vmem:[%s5379_s22 + $0xf0] sm:$0xff]  ;;  %v482_v31 = vld [vmem:[%s5379_s22 + $0xf8] sm:$0xff]  ;;  %v484_v32 = vld [vmem:[%s5379_s22 + $0x200] sm:$0xff] }
  0x1f   : > { %441 = vst [vmem:[%s5384_s23 + $0x50] sm:$0xff] %v440_v10  ;;  %v486_v33 = vld [vmem:[%s5379_s22 + $0x208] sm:$0xff]  ;;  %v488_v34 = vld [vmem:[%s5379_s22 + $0x210] sm:$0xff]  ;;  %v490_v35 = vld [vmem:[%s5379_s22 + $0x218] sm:$0xff] }
  0x20   : > { %443 = vst [vmem:[%s5384_s23 + $0x58] sm:$0xff] %v442_v11  ;;  %v492_v36 = vld [vmem:[%s5379_s22 + $0x220] sm:$0xff]  ;;  %v494_v37 = vld [vmem:[%s5379_s22 + $0x228] sm:$0xff]  ;;  %v496_v38 = vld [vmem:[%s5379_s22 + $0x230] sm:$0xff] }
  0x21   : > { %445 = vst [vmem:[%s5384_s23 + $0x60] sm:$0xff] %v444_v12  ;;  %v498_v39 = vld [vmem:[%s5379_s22 + $0x238] sm:$0xff]  ;;  %v500_v40 = vld [vmem:[%s5379_s22 + $0x240] sm:$0xff]  ;;  %v502_v41 = vld [vmem:[%s5379_s22 + $0x248] sm:$0xff] }
  0x22   : > { %447 = vst [vmem:[%s5384_s23 + $0x68] sm:$0xff] %v446_v13  ;;  %v504_v42 = vld [vmem:[%s5379_s22 + $0x250] sm:$0xff]  ;;  %v506_v43 = vld [vmem:[%s5379_s22 + $0x258] sm:$0xff]  ;;  %v508_v44 = vld [vmem:[%s5379_s22 + $0x260] sm:$0xff] }
  0x23   : > { %449 = vst [vmem:[%s5384_s23 + $0x70] sm:$0xff] %v448_v14  ;;  %v510_v45 = vld [vmem:[%s5379_s22 + $0x268] sm:$0xff]  ;;  %v512_v46 = vld [vmem:[%s5379_s22 + $0x270] sm:$0xff]  ;;  %v514_v47 = vld [vmem:[%s5379_s22 + $0x278] sm:$0xff] }
  0x24   : > { %451 = vst [vmem:[%s5384_s23 + $0x78] sm:$0xff] %v450_v15  ;;  %v516_v48 = vld [vmem:[%s5379_s22 + $0x280] sm:$0xff]  ;;  %v518_v49 = vld [vmem:[%s5379_s22 + $0x288] sm:$0xff]  ;;  %v520_v50 = vld [vmem:[%s5379_s22 + $0x290] sm:$0xff] }
  0x25   : > { %453 = vst [vmem:[%s5384_s23 + $0x80] sm:$0xff] %v452_v16  ;;  %v522_v51 = vld [vmem:[%s5379_s22 + $0x298] sm:$0xff]  ;;  %v524_v52 = vld [vmem:[%s5379_s22 + $0x2a0] sm:$0xff]  ;;  %v526_v53 = vld [vmem:[%s5379_s22 + $0x2a8] sm:$0xff] }
  0x26   : > { %455 = vst [vmem:[%s5384_s23 + $0x88] sm:$0xff] %v454_v17  ;;  %v528_v54 = vld [vmem:[%s5379_s22 + $0x2b0] sm:$0xff]  ;;  %v530_v55 = vld [vmem:[%s5379_s22 + $0x2b8] sm:$0xff]  ;;  %v532_v56 = vld [vmem:[%s5379_s22 + $0x2c0] sm:$0xff] }
  0x27   : > { %457 = vst [vmem:[%s5384_s23 + $0x90] sm:$0xff] %v456_v18  ;;  %v534_v57 = vld [vmem:[%s5379_s22 + $0x2c8] sm:$0xff]  ;;  %v536_v58 = vld [vmem:[%s5379_s22 + $0x2d0] sm:$0xff]  ;;  %v538_v59 = vld [vmem:[%s5379_s22 + $0x2d8] sm:$0xff] }
  0x28   : > { %459 = vst [vmem:[%s5384_s23 + $0x98] sm:$0xff] %v458_v19  ;;  %v540_v60 = vld [vmem:[%s5379_s22 + $0x2e0] sm:$0xff]  ;;  %v542_v61 = vld [vmem:[%s5379_s22 + $0x2e8] sm:$0xff]  ;;  %v544_v62 = vld [vmem:[%s5379_s22 + $0x2f0] sm:$0xff] }
  0x29   : > { %461 = vst [vmem:[%s5384_s23 + $0xa0] sm:$0xff] %v460_v20  ;;  %v546_v63 = vld [vmem:[%s5379_s22 + $0x2f8] sm:$0xff] }
  0x2a   : > { %463 = vst [vmem:[%s5384_s23 + $0xa8] sm:$0xff] %v462_v21 }
  0x2b   : > { %465 = vst [vmem:[%s5384_s23 + $0xb0] sm:$0xff] %v464_v22 }
  0x2c   : > { %467 = vst [vmem:[%s5384_s23 + $0xb8] sm:$0xff] %v466_v23 }
  0x2d   : > { %469 = vst [vmem:[%s5384_s23 + $0xc0] sm:$0xff] %v468_v24 }
  0x2e   : > { %471 = vst [vmem:[%s5384_s23 + $0xc8] sm:$0xff] %v470_v25 }
  0x2f   : > { %473 = vst [vmem:[%s5384_s23 + $0xd0] sm:$0xff] %v472_v26 }
  0x30   : > { %475 = vst [vmem:[%s5384_s23 + $0xd8] sm:$0xff] %v474_v27 }
  0x31   : > { %477 = vst [vmem:[%s5384_s23 + $0xe0] sm:$0xff] %v476_v28 }
  0x32   : > { %479 = vst [vmem:[%s5384_s23 + $0xe8] sm:$0xff] %v478_v29 }
  0x33   : > { %481 = vst [vmem:[%s5384_s23 + $0xf0] sm:$0xff] %v480_v30 }
  0x34   : > { %483 = vst [vmem:[%s5384_s23 + $0xf8] sm:$0xff] %v482_v31 }
  0x35   : > { %485 = vst [vmem:[%s5384_s23 + $0x100] sm:$0xff] %v484_v32 }
  0x36   : > { %487 = vst [vmem:[%s5384_s23 + $0x108] sm:$0xff] %v486_v33 }
  0x37   : > { %489 = vst [vmem:[%s5384_s23 + $0x110] sm:$0xff] %v488_v34 }
  0x38   : > { %491 = vst [vmem:[%s5384_s23 + $0x118] sm:$0xff] %v490_v35 }
  0x39   : > { %493 = vst [vmem:[%s5384_s23 + $0x120] sm:$0xff] %v492_v36 }
  0x3a   : > { %495 = vst [vmem:[%s5384_s23 + $0x128] sm:$0xff] %v494_v37 }
  0x3b   : > { %497 = vst [vmem:[%s5384_s23 + $0x130] sm:$0xff] %v496_v38 }
  0x3c   : > { %499 = vst [vmem:[%s5384_s23 + $0x138] sm:$0xff] %v498_v39 }
  0x3d   : > { %501 = vst [vmem:[%s5384_s23 + $0x140] sm:$0xff] %v500_v40 }
  0x3e   : > { %503 = vst [vmem:[%s5384_s23 + $0x148] sm:$0xff] %v502_v41 }
  0x3f   : > { %505 = vst [vmem:[%s5384_s23 + $0x150] sm:$0xff] %v504_v42 }
  0x40   : > { %507 = vst [vmem:[%s5384_s23 + $0x158] sm:$0xff] %v506_v43 }
  0x41   : > { %509 = vst [vmem:[%s5384_s23 + $0x160] sm:$0xff] %v508_v44 }
  0x42   : > { %511 = vst [vmem:[%s5384_s23 + $0x168] sm:$0xff] %v510_v45 }
  0x43   : > { %513 = vst [vmem:[%s5384_s23 + $0x170] sm:$0xff] %v512_v46 }
  0x44   : > { %515 = vst [vmem:[%s5384_s23 + $0x178] sm:$0xff] %v514_v47 }
  0x45   : > { %517 = vst [vmem:[%s5384_s23 + $0x180] sm:$0xff] %v516_v48 }
  0x46   : > { %519 = vst [vmem:[%s5384_s23 + $0x188] sm:$0xff] %v518_v49 }
  0x47   : > { %521 = vst [vmem:[%s5384_s23 + $0x190] sm:$0xff] %v520_v50 }
  0x48   : > { %523 = vst [vmem:[%s5384_s23 + $0x198] sm:$0xff] %v522_v51 }
  0x49   : > { %525 = vst [vmem:[%s5384_s23 + $0x1a0] sm:$0xff] %v524_v52 }
  0x4a   : > { %527 = vst [vmem:[%s5384_s23 + $0x1a8] sm:$0xff] %v526_v53 }
  0x4b   : > { %529 = vst [vmem:[%s5384_s23 + $0x1b0] sm:$0xff] %v528_v54 }
  0x4c   : > { %531 = vst [vmem:[%s5384_s23 + $0x1b8] sm:$0xff] %v530_v55 }
  0x4d   : > { %533 = vst [vmem:[%s5384_s23 + $0x1c0] sm:$0xff] %v532_v56 }
  0x4e   : > { %535 = vst [vmem:[%s5384_s23 + $0x1c8] sm:$0xff] %v534_v57 }
  0x4f   : > { %537 = vst [vmem:[%s5384_s23 + $0x1d0] sm:$0xff] %v536_v58 }
  0x50   : > { %539 = vst [vmem:[%s5384_s23 + $0x1d8] sm:$0xff] %v538_v59 }
  0x51   : > { %541 = vst [vmem:[%s5384_s23 + $0x1e0] sm:$0xff] %v540_v60 }
  0x52   : > { %543 = vst [vmem:[%s5384_s23 + $0x1e8] sm:$0xff] %v542_v61 }
  0x53   : > { %545 = vst [vmem:[%s5384_s23 + $0x1f0] sm:$0xff] %v544_v62 }
  0x54   : > { %547 = vst [vmem:[%s5384_s23 + $0x1f8] sm:$0xff] %v546_v63 }
  0x55 PF: > { %p4583_p10 = scmp.ge.s32.totalorder %s5278_s30, 1  ;;  %p552_p11 = scmp.lt.s32.totalorder %s5278_s30, 3 }
  0x57   : > { %p553_p12 = pnand %p4583_p10, %p552_p11 }
  0x59   : > { %556 = sbr.rel (%p553_p12) target bundleno = 2381 (0x94d), region = 86 }
  0x5e   : > { %v4604_v0 = vld [vmem:[%s8421_s1 + $0x20] sm:$0xf]  ;;  %v5079_v1 = vld [vmem:[%s8421_s1 + $0x2c] sm:$0xf0]  ;;  %v5077_v2 = vld [vmem:[%s8421_s1 + $0x24] sm:$0xf] }
  0x5f   : > { %v4605_v3 = vor.u32 %v5079_v1, %v4604_v0  ;;  %v4606_v4 = vld [vmem:[%s8421_s1 + $0x30] sm:$0xf0]  ;;  %v4588_v5 = vld [vmem:[%s8421_s1] sm:$0xf]  ;;  %v5075_v6 = vld [vmem:[%s8421_s1 + $0xc] sm:$0xf0] }
  0x60   : > { %v4609_v7 = vor.u32 %v5077_v2, %v4606_v4  ;;  %v5073_v8 = vld [vmem:[%s8421_s1 + $0x4] sm:$0xf]  ;;  %v4590_v9 = vld [vmem:[%s8421_s1 + $0x10] sm:$0xf0]  ;;  %s5538_s10 = sand.u32 1, %s5270_s28   ;;  %v4589_v10 = vor.u32 %v5075_v6, %v4588_v5  ;;  %vm749_vm0 = vcmask 261120  }
  0x61   : > { %852 = vmatpush.bf16.msra.mxu0 %v4605_v3  ;;  %5161 = vmatpush.bf16.msra.mxu2 %v4605_v3  ;;  %s4584_s12 = sshll.u32 %s5538_s10, 9  ;;  %v4593_v11 = vor.u32 %v5073_v8, %v4590_v9  ;;  %v699_v2 = vld [vmem:[%s8422_s2] sm:$0xf]  ;;  %s4585_s18 = sshll.u32 %s5538_s10, 1  ;;  %vm4488_vm9 = vcmask 1040384  }
  0x62   : > { %1021 = vmatpush.bf16.msra.mxu1 %v4609_v7  ;;  %5163 = vmatpush.bf16.msra.mxu3 %v4609_v7  ;;  %s5541_s13 = scalar_lea.vmem [#allocation2], %s4584_s12  ;;  %v5682_v5 = vperm.slane %v699_v2, 0  ;;  %v5688_v6 = vperm.slane %v699_v2, 1  ;;  %s5069_s19 = sshll.u32 %s4576_s9, 1 }
  0x63   : > { %v595_v12 = vld [vmem:[%s5541_s13] sm:$0xff]  ;;  %v596_v13 = vld [vmem:[%s5541_s13 + $0x8] sm:$0xff]  ;;  %v629_v14 = vld [vmem:[%s5541_s13 + $0x110] sm:$0xff]  ;;  %s591_s9 = scalar_lea.vmem [#allocation3], %s4585_s18  ;;  %s4497_s24 = scalar_lea.sflag [#allocation4], %s5538_s10 }
  0x64   : > { %v5546_v15 = vpack.c.bf16 %v596_v13, %v595_v12  ;;  %v630_v16 = vld [vmem:[%s5541_s13 + $0x118] sm:$0xff]  ;;  %v597_v18 = vld [vmem:[%s5541_s13 + $0x10] sm:$0xff]  ;;  %v631_v20 = vld [vmem:[%s5541_s13 + $0x120] sm:$0xff]  ;;  %s4509_s22 = sshll.u32 %s591_s9, 4  ;;  %s5236_s18 = scalar_lea.hbm %s8428_s8, 4  ;;  %s4510_s22 = int_to_ptr.vmem [resolvable:$true] %s4509_s22 }
  0x65   : > { %853 = vmatpush.bf16.msra.mxu0 %v4589_v10  ;;  %5162 = vmatpush.bf16.msra.mxu2 %v4589_v10  ;;  %v5549_v17 = vpack.c.bf16 %v630_v16, %v629_v14  ;;  %v598_v19 = vld [vmem:[%s5541_s13 + $0x18] sm:$0xff]  ;;  %v632_v21 = vld [vmem:[%s5541_s13 + $0x128] sm:$0xff]  ;;  %v599_v24 = vld [vmem:[%s5541_s13 + $0x20] sm:$0xff] }
  0x66   : > { %1022 = vmatpush.bf16.msra.mxu1 %v4593_v11  ;;  %5164 = vmatpush.bf16.msra.mxu3 %v4593_v11  ;;  %v5563_v22 = vpack.c.bf16 %v598_v19, %v597_v18  ;;  %v5565_v23 = vpack.c.bf16 %v632_v21, %v631_v20  ;;  %v600_v25 = vld [vmem:[%s5541_s13 + $0x28] sm:$0xff]  ;;  %v633_v26 = vld [vmem:[%s5541_s13 + $0x130] sm:$0xff]  ;;  %v634_v27 = vld [vmem:[%s5541_s13 + $0x138] sm:$0xff] }
  0x67   : > { %v5579_v28 = vpack.c.bf16 %v600_v25, %v599_v24  ;;  %v5581_v29 = vpack.c.bf16 %v634_v27, %v633_v26  ;;  %v601_v30 = vld [vmem:[%s5541_s13 + $0x30] sm:$0xff]  ;;  %v602_v31 = vld [vmem:[%s5541_s13 + $0x38] sm:$0xff]  ;;  %v635_v32 = vld [vmem:[%s5541_s13 + $0x140] sm:$0xff] }
  0x68   : > { %4618 = vmatmul.msk.bf16.vlgmr.msra.gmra.mxu0 %vm749_vm0, %v5546_v15  ;;  %4635 = vmatmul.msk.bf16.vlgmr.msra.gmra.mxu2 %vm749_vm0, %v5549_v17  ;;  %v636_v33 = vld [vmem:[%s5541_s13 + $0x148] sm:$0xff]  ;;  %v5595_v34 = vpack.c.bf16 %v602_v31, %v601_v30  ;;  %v603_v36 = vld [vmem:[%s5541_s13 + $0x40] sm:$0xff]  ;;  %v637_v38 = vld [vmem:[%s5541_s13 + $0x150] sm:$0xff] }
  0x69   : > { %4650 = vmatmul.msk.bf16.vlgmr.msra.gmra.mxu1 %vm749_vm0, %v5546_v15  ;;  %4667 = vmatmul.msk.bf16.vlgmr.msra.gmra.mxu3 %vm749_vm0, %v5549_v17  ;;  %v5597_v35 = vpack.c.bf16 %v636_v33, %v635_v32  ;;  %v604_v37 = vld [vmem:[%s5541_s13 + $0x48] sm:$0xff]  ;;  %v638_v39 = vld [vmem:[%s5541_s13 + $0x158] sm:$0xff]  ;;  %v605_v42 = vld [vmem:[%s5541_s13 + $0x50] sm:$0xff] }
  0x6a   : > { %v5611_v40 = vpack.c.bf16 %v604_v37, %v603_v36  ;;  %v5613_v41 = vpack.c.bf16 %v638_v39, %v637_v38  ;;  %v606_v43 = vld [vmem:[%s5541_s13 + $0x58] sm:$0xff]  ;;  %v639_v44 = vld [vmem:[%s5541_s13 + $0x160] sm:$0xff]  ;;  %v640_v45 = vld [vmem:[%s5541_s13 + $0x168] sm:$0xff] }
  0x6b   : > { %8576 = vst [vmem:[#allocation6_spill] sm:$0xff] %v5597_v35  ;;  %v5627_v46 = vpack.c.bf16 %v606_v43, %v605_v42  ;;  %v5629_v47 = vpack.c.bf16 %v640_v45, %v639_v44  ;;  %v607_v48 = vld [vmem:[%s5541_s13 + $0x60] sm:$0xff]  ;;  %v608_v49 = vld [vmem:[%s5541_s13 + $0x68] sm:$0xff]  ;;  %v641_v50 = vld [vmem:[%s5541_s13 + $0x170] sm:$0xff] }
  0x6c   : > { %8577 = vst [vmem:[#allocation7_spill] sm:$0xff] %v5613_v41  ;;  %v642_v51 = vld [vmem:[%s5541_s13 + $0x178] sm:$0xff]  ;;  %v5643_v52 = vpack.c.bf16 %v608_v49, %v607_v48  ;;  %v609_v54 = vld [vmem:[%s5541_s13 + $0x70] sm:$0xff]  ;;  %v643_v56 = vld [vmem:[%s5541_s13 + $0x180] sm:$0xff] }
  0x6d   : > { %8578 = vst [vmem:[#allocation8_spill] sm:$0xff] %v5629_v47  ;;  %v5645_v53 = vpack.c.bf16 %v642_v51, %v641_v50  ;;  %v610_v55 = vld [vmem:[%s5541_s13 + $0x78] sm:$0xff]  ;;  %v644_v57 = vld [vmem:[%s5541_s13 + $0x188] sm:$0xff]  ;;  %v611_v60 = vld [vmem:[%s5541_s13 + $0x80] sm:$0xff] }
  0x6e   : > { %v5659_v58 = vpack.c.bf16 %v610_v55, %v609_v54  ;;  %v5661_v59 = vpack.c.bf16 %v644_v57, %v643_v56  ;;  %v612_v61 = vld [vmem:[%s5541_s13 + $0x88] sm:$0xff]  ;;  %v645_v62 = vld [vmem:[%s5541_s13 + $0x190] sm:$0xff]  ;;  %v646_v63 = vld [vmem:[%s5541_s13 + $0x198] sm:$0xff] }
  0x6f   : > { %8579 = vst [vmem:[#allocation9_spill] sm:$0xff] %v5645_v53  ;;  %v5675_v0 = vpack.c.bf16 %v612_v61, %v611_v60  ;;  %v5677_v1 = vpack.c.bf16 %v646_v63, %v645_v62  ;;  %v613_v20 = vld [vmem:[%s5541_s13 + $0x90] sm:$0xff]  ;;  %v614_v24 = vld [vmem:[%s5541_s13 + $0x98] sm:$0xff]  ;;  %v647_v25 = vld [vmem:[%s5541_s13 + $0x1a0] sm:$0xff] }
  0x70   : > { %8580 = vst [vmem:[#allocation10_spill] sm:$0xff] %v5661_v59  ;;  %v648_v26 = vld [vmem:[%s5541_s13 + $0x1a8] sm:$0xff]  ;;  %v5709_v38 = vpack.c.bf16 %v614_v24, %v613_v20  ;;  %v615_v61 = vld [vmem:[%s5541_s13 + $0xa0] sm:$0xff]  ;;  %v649_v63 = vld [vmem:[%s5541_s13 + $0x1b0] sm:$0xff] }
  0x71   : > { %8581 = vst [vmem:[#allocation11_spill] sm:$0xff] %v5677_v1  ;;  %v5711_v39 = vpack.c.bf16 %v648_v26, %v647_v25  ;;  %v616_v62 = vld [vmem:[%s5541_s13 + $0xa8] sm:$0xff]  ;;  %v650_v2 = vld [vmem:[%s5541_s13 + $0x1b8] sm:$0xff] }
  0x73   : > { %8584 = vst [vmem:[#allocation14_spill] sm:$0xff] %v5711_v39 }
  0x78   : > { %4619 = vmatmul.msk.bf16.gmra.mxu0 %vm749_vm0, %v5563_v22  ;;  %4636 = vmatmul.msk.bf16.gmra.mxu2 %vm749_vm0, %v5565_v23 }
  0x79   : > { %4651 = vmatmul.msk.bf16.gmra.mxu1 %vm749_vm0, %v5563_v22  ;;  %4668 = vmatmul.msk.bf16.gmra.mxu3 %vm749_vm0, %v5565_v23 }
  0x88   : > { %4620 = vmatmul.msk.bf16.gmra.mxu0 %vm749_vm0, %v5579_v28  ;;  %4637 = vmatmul.msk.bf16.gmra.mxu2 %vm749_vm0, %v5581_v29 }
  0x89   : > { %4652 = vmatmul.msk.bf16.gmra.mxu1 %vm749_vm0, %v5579_v28  ;;  %4669 = vmatmul.msk.bf16.gmra.mxu3 %vm749_vm0, %v5581_v29 }
  0x98   : > { %4621 = vmatmul.msk.bf16.gmra.mxu0 %vm749_vm0, %v5595_v34  ;;  %4638 = vmatmul.msk.bf16.gmra.mxu2 %vm749_vm0, %v5597_v35 }
  0x99   : > { %4653 = vmatmul.msk.bf16.gmra.mxu1 %vm749_vm0, %v5595_v34  ;;  %4670 = vmatmul.msk.bf16.gmra.mxu3 %vm749_vm0, %v5597_v35 }
  0xa8   : > { %4622 = vmatmul.msk.bf16.gmra.mxu0 %vm749_vm0, %v5611_v40  ;;  %4639 = vmatmul.msk.bf16.gmra.mxu2 %vm749_vm0, %v5613_v41 }
  0xa9   : > { %4654 = vmatmul.msk.bf16.gmra.mxu1 %vm749_vm0, %v5611_v40  ;;  %4671 = vmatmul.msk.bf16.gmra.mxu3 %vm749_vm0, %v5613_v41 }
  0xb8   : > { %4623 = vmatmul.msk.bf16.gmra.mxu0 %vm749_vm0, %v5627_v46  ;;  %4640 = vmatmul.msk.bf16.gmra.mxu2 %vm749_vm0, %v5629_v47 }
  0xb9   : > { %4655 = vmatmul.msk.bf16.gmra.mxu1 %vm749_vm0, %v5627_v46  ;;  %4672 = vmatmul.msk.bf16.gmra.mxu3 %vm749_vm0, %v5629_v47 }
  0xc8   : > { %4624 = vmatmul.msk.bf16.gmra.mxu0 %vm749_vm0, %v5643_v52  ;;  %4641 = vmatmul.msk.bf16.gmra.mxu2 %vm749_vm0, %v5645_v53 }
  0xc9   : > { %4656 = vmatmul.msk.bf16.gmra.mxu1 %vm749_vm0, %v5643_v52  ;;  %4673 = vmatmul.msk.bf16.gmra.mxu3 %vm749_vm0, %v5645_v53 }
  0xd8   : > { %4625 = vmatmul.msk.bf16.gmra.mxu0 %vm749_vm0, %v5659_v58  ;;  %4642 = vmatmul.msk.bf16.gmra.mxu2 %vm749_vm0, %v5661_v59 }
  0xd9   : > { %4657 = vmatmul.msk.bf16.gmra.mxu1 %vm749_vm0, %v5659_v58  ;;  %4674 = vmatmul.msk.bf16.gmra.mxu3 %vm749_vm0, %v5661_v59  ;;  %v5074_v59 = vld [vmem:[%s8421_s1 + $0xc] sm:$0xf] }
  0xe5   : > { %v855_v3 = vpop.f32.mrf.mxu0 }
  0xe6   : > { %v1024_v4 = vpop.f32.mrf.mxu1  ;;  %v856_v7 = vadd.f32 %v855_v3, %v5682_v5 }
  0xe7   : > { %v1025_v8 = vadd.f32 %v1024_v4, %v5688_v6 }
  0xe8   : > { %4626 = vmatmul.msk.bf16.gmra.mxu0 %vm749_vm0, %v5675_v0  ;;  %4643 = vmatmul.msk.bf16.gmra.mxu2 %vm749_vm0, %v5677_v1  ;;  %v1522_v12 = vmax.f32 %v856_v7, 0.0 }
  0xe9   : > { %4658 = vmatmul.msk.bf16.gmra.mxu1 %vm749_vm0, %v5675_v0  ;;  %4675 = vmatmul.msk.bf16.gmra.mxu3 %vm749_vm0, %v5677_v1  ;;  %v1523_v16 = vmax.f32 %v1025_v8, 0.0 }
  0xeb   : > { %v940_v9 = vpop.f32.mrf.mxu2 }
  0xec   : > { %v1109_v10 = vpop.f32.mrf.mxu3  ;;  %v941_v27 = vadd.f32 %v940_v9, %v5682_v5 }
  0xed   : > { %v857_v11 = vpop.f32.mrf.mxu0  ;;  %v1110_v31 = vadd.f32 %v1109_v10, %v5688_v6  ;;  %v5741_v10 = vpack.c.bf16 %v616_v62, %v615_v61 }
  0xee   : > { %v858_v13 = vadd.f32 %v857_v11, %v5682_v5  ;;  %v1026_v14 = vpop.f32.mrf.mxu1  ;;  %v1658_v44 = vmax.f32 %v941_v27, 0.0  ;;  %v5743_v11 = vpack.c.bf16 %v650_v2, %v649_v63 }
  0xef   : > { %v1027_v18 = vadd.f32 %v1026_v14, %v5688_v6  ;;  %v1659_v49 = vmax.f32 %v1110_v31, 0.0 }
  0xf0   : > { %v1526_v19 = vmax.f32 %v858_v13, 0.0  ;;  %8587 = vst [vmem:[#allocation17_spill] sm:$0xff] %v5743_v11 }
  0xf1   : > { %v1527_v21 = vmax.f32 %v1027_v18, 0.0 }
  0xf2   : > { %v5703_v30 = vpack.c.bf16 %v1526_v19, %v1522_v12 }
  0xf3   : > { %v5706_v32 = vpack.c.bf16 %v1527_v21, %v1523_v16  ;;  %v942_v33 = vpop.f32.mrf.mxu2 }
  0xf4   : > { %8582 = vst [vmem:[#allocation12_spill] sm:$0xff] %v5703_v30  ;;  %v943_v36 = vadd.f32 %v942_v33, %v5682_v5  ;;  %v1111_v37 = vpop.f32.mrf.mxu3  ;;  %v617_v33 = vld [vmem:[%s5541_s13 + $0xb0] sm:$0xff] }
  0xf5   : > { %8583 = vst [vmem:[#allocation13_spill] sm:$0xff] %v5706_v32  ;;  %v1112_v42 = vadd.f32 %v1111_v37, %v5688_v6  ;;  %v5714_v43 = vpop.f32.mrf.mxu0  ;;  %v651_v37 = vld [vmem:[%s5541_s13 + $0x1c0] sm:$0xff] }
  0xf6   : > { %v1662_v45 = vmax.f32 %v943_v36, 0.0  ;;  %v5716_v48 = vpop.f32.mrf.mxu1  ;;  %v618_v36 = vld [vmem:[%s5541_s13 + $0xb8] sm:$0xff] }
  0xf7   : > { %v1663_v50 = vmax.f32 %v1112_v42, 0.0  ;;  %v652_v42 = vld [vmem:[%s5541_s13 + $0x1c8] sm:$0xff] }
  0xf8   : > { %4627 = vmatmul.msk.bf16.gmra.mxu0 %vm749_vm0, %v5709_v38  ;;  %4644 = vmatmul.msk.bf16.gmra.mxu2 %vm749_vm0, %v5711_v39  ;;  %v5722_v51 = vpack.c.bf16 %v1662_v45, %v1658_v44  ;;  %v5775_v61 = vpack.c.bf16 %v652_v42, %v651_v37 }
  0xf9   : > { %4659 = vmatmul.msk.bf16.gmra.mxu1 %vm749_vm0, %v5709_v38  ;;  %4676 = vmatmul.msk.bf16.gmra.mxu3 %vm749_vm0, %v5711_v39  ;;  %v5728_v54 = vpack.c.bf16 %v1663_v50, %v1659_v49 }
  0xfa   : > { %8585 = vst [vmem:[#allocation15_spill] sm:$0xff] %v5722_v51 }
  0xfb   : > { %8586 = vst [vmem:[#allocation16_spill] sm:$0xff] %v5728_v54  ;;  %v945_v55 = vpop.f32.mrf.mxu2 }
  0xfc   : > { %v1114_v56 = vpop.f32.mrf.mxu3  ;;  %v946_v3 = vadd.f32 %v945_v55, %v5682_v5  ;;  %8590 = vst [vmem:[#allocation20_spill] sm:$0xff] %v5775_v61 }
  0xfd   : > { %v5730_v57 = vpop.f32.mrf.mxu0  ;;  %v1115_v4 = vadd.f32 %v1114_v56, %v5688_v6  ;;  %v5773_v56 = vpack.c.bf16 %v618_v36, %v617_v33  ;;  %v653_v33 = vld [vmem:[%s5541_s13 + $0x1d0] sm:$0xff]  ;;  %v654_v36 = vld [vmem:[%s5541_s13 + $0x1d8] sm:$0xff] }
  0xfe   : > { %v5732_v60 = vpop.f32.mrf.mxu1  ;;  %v1666_v14 = vmax.f32 %v946_v3, 0.0  ;;  %v863_v41 = vadd.f32 %v5730_v57, %v5682_v5  ;;  %v4772_v57 = vld [vmem:[%s8423_s3 + $0x30] sm:$0xf] }
  0xff   : > { %v1667_v19 = vmax.f32 %v1115_v4, 0.0 }
 0x103   : > { %v947_v7 = vpop.f32.mrf.mxu2 }
 0x104   : > { %v948_v8 = vadd.f32 %v947_v7, %v5682_v5  ;;  %v1116_v9 = vpop.f32.mrf.mxu3 }
 0x105   : > { %v1117_v12 = vadd.f32 %v1116_v9, %v5688_v6  ;;  %v5746_v13 = vpop.f32.mrf.mxu0 }
 0x106   : > { %v1670_v16 = vmax.f32 %v948_v8, 0.0  ;;  %v5748_v18 = vpop.f32.mrf.mxu1 }
 0x107   : > { %v1671_v20 = vmax.f32 %v1117_v12, 0.0 }
 0x108   : > { %4628 = vmatmul.msk.bf16.gmra.mxu0 %vm749_vm0, %v5741_v10  ;;  %4645 = vmatmul.msk.bf16.gmra.mxu2 %vm749_vm0, %v5743_v11  ;;  %v5754_v21 = vpack.c.bf16 %v1670_v16, %v1666_v14 }
 0x109   : > { %4660 = vmatmul.msk.bf16.gmra.mxu1 %vm749_vm0, %v5741_v10  ;;  %4677 = vmatmul.msk.bf16.gmra.mxu3 %vm749_vm0, %v5743_v11  ;;  %v5760_v24 = vpack.c.bf16 %v1671_v20, %v1667_v19 }
 0x10a   : > { %8588 = vst [vmem:[#allocation18_spill] sm:$0xff] %v5754_v21 }
 0x10b   : > { %8589 = vst [vmem:[#allocation19_spill] sm:$0xff] %v5760_v24  ;;  %v950_v25 = vpop.f32.mrf.mxu2 }
 0x10c   : > { %v1119_v26 = vpop.f32.mrf.mxu3  ;;  %v951_v44 = vadd.f32 %v950_v25, %v5682_v5  ;;  %v619_v25 = vld [vmem:[%s5541_s13 + $0xc0] sm:$0xff] }
 0x10d   : > { %v5762_v27 = vpop.f32.mrf.mxu0  ;;  %v1120_v45 = vadd.f32 %v1119_v26, %v5688_v6  ;;  %v620_v26 = vld [vmem:[%s5541_s13 + $0xc8] sm:$0xff] }
 0x10e   : > { %v5764_v31 = vpop.f32.mrf.mxu1  ;;  %v1674_v2 = vmax.f32 %v951_v44, 0.0 }
 0x10f   : > { %v1675_v7 = vmax.f32 %v1120_v45, 0.0 }
 0x113   : > { %v952_v49 = vpop.f32.mrf.mxu2 }
 0x114   : > { %v953_v50 = vadd.f32 %v952_v49, %v5682_v5  ;;  %v1121_v55 = vpop.f32.mrf.mxu3 }
 0x115   : > { %v1122_v62 = vadd.f32 %v1121_v55, %v5688_v6  ;;  %v5778_v63 = vpop.f32.mrf.mxu0  ;;  %v5807_v55 = vpack.c.bf16 %v654_v36, %v653_v33 }
 0x116   : > { %v1678_v3 = vmax.f32 %v953_v50, 0.0  ;;  %v5780_v4 = vpop.f32.mrf.mxu1  ;;  %v5805_v50 = vpack.c.bf16 %v620_v26, %v619_v25 }
 0x117   : > { %v1679_v8 = vmax.f32 %v1122_v62, 0.0  ;;  %8593 = vst [vmem:[#allocation23_spill] sm:$0xff] %v5807_v55 }
 0x118   : > { %4629 = vmatmul.msk.bf16.gmra.mxu0 %vm749_vm0, %v5773_v56  ;;  %4646 = vmatmul.msk.bf16.gmra.mxu2 %vm749_vm0, %v5775_v61  ;;  %v5786_v9 = vpack.c.bf16 %v1678_v3, %v1674_v2 }
 0x119   : > { %4661 = vmatmul.msk.bf16.gmra.mxu1 %vm749_vm0, %v5773_v56  ;;  %4678 = vmatmul.msk.bf16.gmra.mxu3 %vm749_vm0, %v5775_v61  ;;  %v5792_v12 = vpack.c.bf16 %v1679_v8, %v1675_v7 }
 0x11a   : > { %8591 = vst [vmem:[#allocation21_spill] sm:$0xff] %v5786_v9 }
 0x11b   : > { %8592 = vst [vmem:[#allocation22_spill] sm:$0xff] %v5792_v12  ;;  %v955_v14 = vpop.f32.mrf.mxu2 }
 0x11c   : > { %v1124_v16 = vpop.f32.mrf.mxu3  ;;  %v956_v37 = vadd.f32 %v955_v14, %v5682_v5 }
 0x11d   : > { %v5794_v19 = vpop.f32.mrf.mxu0  ;;  %v1125_v42 = vadd.f32 %v1124_v16, %v5688_v6 }
 0x11e   : > { %v5796_v20 = vpop.f32.mrf.mxu1  ;;  %v1682_v3 = vmax.f32 %v956_v37, 0.0 }
 0x11f   : > { %v1683_v14 = vmax.f32 %v1125_v42, 0.0  ;;  %v4612_v42 = vld [vmem:[%s8421_s1 + $0x28] sm:$0xf] }
 0x123   : > { %v957_v44 = vpop.f32.mrf.mxu2 }
 0x124   : > { %v958_v45 = vadd.f32 %v957_v44, %v5682_v5  ;;  %v1126_v49 = vpop.f32.mrf.mxu3  ;;  %v5080_v44 = vld [vmem:[%s8421_s1 + $0x34] sm:$0xf0] }
 0x125   : > { %v1127_v62 = vadd.f32 %v1126_v49, %v5688_v6  ;;  %v5810_v2 = vpop.f32.mrf.mxu0  ;;  %v4613_v49 = vor.u32 %v5080_v44, %v4612_v42  ;;  %v4596_v42 = vld [vmem:[%s8421_s1 + $0x8] sm:$0xf]  ;;  %v5076_v44 = vld [vmem:[%s8421_s1 + $0x14] sm:$0xf0] }
 0x126   : > { %v1686_v7 = vmax.f32 %v958_v45, 0.0  ;;  %v5812_v8 = vpop.f32.mrf.mxu1  ;;  %v621_v45 = vld [vmem:[%s5541_s13 + $0xd0] sm:$0xff] }
 0x127   : > { %v1687_v61 = vmax.f32 %v1127_v62, 0.0  ;;  %v4614_v62 = vld [vmem:[%s8421_s1 + $0x38] sm:$0xf0]  ;;  %1190 = vmatpush.bf16.msrb.mxu2 %v4613_v49 }
 0x128   : > { %4630 = vmatmul.msk.bf16.gmra.mxu0 %vm749_vm0, %v5805_v50  ;;  %4647 = vmatmul.msk.bf16.gmra.mxu2 %vm749_vm0, %v5807_v55  ;;  %v5818_v16 = vpack.c.bf16 %v1686_v7, %v1682_v3  ;;  %v622_v3 = vld [vmem:[%s5541_s13 + $0xd8] sm:$0xff]  ;;  %v655_v7 = vld [vmem:[%s5541_s13 + $0x1e0] sm:$0xff] }
 0x129   : > { %4662 = vmatmul.msk.bf16.gmra.mxu1 %vm749_vm0, %v5805_v50  ;;  %4679 = vmatmul.msk.bf16.gmra.mxu3 %vm749_vm0, %v5807_v55  ;;  %v5824_v25 = vpack.c.bf16 %v1687_v61, %v1683_v14  ;;  %v5078_v61 = vld [vmem:[%s8421_s1 + $0x2c] sm:$0xf]  ;;  %v5858_v49 = vpack.c.bf16 %v622_v3, %v621_v45  ;;  %v4804_v3 = vld [vmem:[%s8423_s3 + $0x70] sm:$0xf] }
 0x12a   : > { %8594 = vst [vmem:[#allocation24_spill] sm:$0xff] %v5818_v16  ;;  %v656_v14 = vld [vmem:[%s5541_s13 + $0x1e8] sm:$0xff]  ;;  %v4617_v55 = vor.u32 %v5078_v61, %v4614_v62  ;;  %v4598_v62 = vld [vmem:[%s8421_s1 + $0x18] sm:$0xf0] }
 0x12b   : > { %8595 = vst [vmem:[#allocation25_spill] sm:$0xff] %v5824_v25  ;;  %v960_v26 = vpop.f32.mrf.mxu2  ;;  %v4601_v16 = vor.u32 %v5074_v59, %v4598_v62 }
 0x12c   : > { %v1129_v33 = vpop.f32.mrf.mxu3  ;;  %v961_v11 = vadd.f32 %v960_v26, %v5682_v5  ;;  %1359 = vmatpush.bf16.msrb.mxu3 %v4617_v55  ;;  %v4597_v55 = vor.u32 %v5076_v44, %v4596_v42  ;;  %v4796_v44 = vld [vmem:[%s8423_s3 + $0x60] sm:$0xf] }
 0x12d   : > { %v5826_v36 = vpop.f32.mrf.mxu0  ;;  %v1130_v39 = vadd.f32 %v1129_v33, %v5688_v6  ;;  %v5860_v33 = vpack.c.bf16 %v656_v14, %v655_v7  ;;  %v5096_v7 = vld [vmem:[%s8423_s3 + $0x74] sm:$0xf0] }
 0x12e   : > { %v5828_v37 = vpop.f32.mrf.mxu1  ;;  %v1690_v47 = vmax.f32 %v961_v11, 0.0  ;;  %1191 = vmatpush.bf16.msrb.mxu2 %v4597_v55  ;;  %v4805_v59 = vor.u32 %v5096_v7, %v4804_v3  ;;  %v5110_v55 = vld [vmem:[%s8423_s3 + $0xe4] sm:$0xf0]  ;;  %v4788_v3 = vld [vmem:[%s8423_s3 + $0x50] sm:$0xf] }
 0x12f   : > { %8596 = vst [vmem:[#allocation26_spill] sm:$0xff] %v5860_v33  ;;  %v5092_v7 = vld [vmem:[%s8423_s3 + $0x54] sm:$0xf0] }
 0x130   : > { %1360 = vmatpush.bf16.msrb.mxu3 %v4601_v16  ;;  %2296 = vmatpush.bf16.msrb.mxu0 %v4805_v59  ;;  %v623_v59 = vld [vmem:[%s5541_s13 + $0xe0] sm:$0xff] }
 0x133   : > { %v962_v1 = vpop.f32.mrf.mxu2 }
 0x134   : > { %v963_v61 = vadd.f32 %v962_v1, %v5682_v5  ;;  %v1131_v26 = vpop.f32.mrf.mxu3  ;;  %v1691_v1 = vmax.f32 %v1130_v39, 0.0  ;;  %v5112_v39 = vld [vmem:[%s8423_s3 + $0xf4] sm:$0xf0] }
 0x135   : > { %v1132_v53 = vadd.f32 %v1131_v26, %v5688_v6  ;;  %v5866_v25 = vpop.f32.mrf.mxu0 }
 0x136   : > { %v1694_v12 = vmax.f32 %v963_v61, 0.0  ;;  %v5868_v9 = vpop.f32.mrf.mxu1 }
 0x137   : > { %v1695_v45 = vmax.f32 %v1132_v53, 0.0  ;;  %v4868_v53 = vld [vmem:[%s8423_s3 + $0xf0] sm:$0xf] }
 0x138   : > { %4631 = vmatmul.msk.bf16.gmra.mxu0 %vm749_vm0, %v5858_v49  ;;  %4648 = vmatmul.msk.bf16.gmra.mxu2 %vm749_vm0, %v5860_v33  ;;  %v5886_v11 = vpack.c.bf16 %v1694_v12, %v1690_v47  ;;  %v4869_v16 = vor.u32 %v5112_v39, %v4868_v53  ;;  %v5094_v47 = vld [vmem:[%s8423_s3 + $0x64] sm:$0xf0]  ;;  %v4860_v12 = vld [vmem:[%s8423_s3 + $0xe0] sm:$0xf]  ;;  %v4789_v53 = vor.u32 %v5092_v7, %v4788_v3  ;;  %v4852_v39 = vld [vmem:[%s8423_s3 + $0xd0] sm:$0xf] }
 0x139   : > { %4663 = vmatmul.msk.bf16.gmra.mxu1 %vm749_vm0, %v5858_v49  ;;  %4680 = vmatmul.msk.bf16.gmra.mxu3 %vm749_vm0, %v5860_v33  ;;  %v5892_v14 = vpack.c.bf16 %v1695_v45, %v1691_v1  ;;  %v4797_v26 = vor.u32 %v5094_v47, %v4796_v44  ;;  %v4861_v1 = vor.u32 %v5110_v55, %v4860_v12  ;;  %v624_v44 = vld [vmem:[%s5541_s13 + $0xe8] sm:$0xff]  ;;  %v657_v47 = vld [vmem:[%s5541_s13 + $0x1f0] sm:$0xff]  ;;  %v658_v12 = vld [vmem:[%s5541_s13 + $0x1f8] sm:$0xff] }
 0x13a   : > { %8597 = vst [vmem:[#allocation27_spill] sm:$0xff] %v5886_v11  ;;  %2465 = vmatpush.bf16.msrb.mxu1 %v4869_v16  ;;  %v5108_v16 = vld [vmem:[%s8423_s3 + $0xd4] sm:$0xf0]  ;;  %v4780_v3 = vld [vmem:[%s8423_s3 + $0x40] sm:$0xf]  ;;  %v861_v11 = vadd.f32 %v5714_v43, %v5682_v5 }
 0x13b   : > { %8598 = vst [vmem:[#allocation28_spill] sm:$0xff] %v5892_v14  ;;  %v965_v42 = vpop.f32.mrf.mxu2  ;;  %2297 = vmatpush.bf16.msrb.mxu0 %v4797_v26  ;;  %v4853_v26 = vor.u32 %v5108_v16, %v4852_v39  ;;  %v5090_v7 = vld [vmem:[%s8423_s3 + $0x44] sm:$0xf0]  ;;  %v4844_v14 = vld [vmem:[%s8423_s3 + $0xc0] sm:$0xf] }
 0x13c   : > { %v1134_v61 = vpop.f32.mrf.mxu3  ;;  %v966_v55 = vadd.f32 %v965_v42, %v5682_v5  ;;  %v4781_v16 = vor.u32 %v5090_v7, %v4780_v3 }
 0x13d   : > { %v5906_v62 = vpop.f32.mrf.mxu0 }
 0x13e   : > { %v5908_v45 = vpop.f32.mrf.mxu1  ;;  %2466 = vmatpush.bf16.msrb.mxu1 %v4861_v1  ;;  %v1135_v1 = vadd.f32 %v1134_v61, %v5688_v6  ;;  %v5940_v61 = vpack.c.bf16 %v658_v12, %v657_v47  ;;  %v1698_v47 = vmax.f32 %v966_v55, 0.0 }
 0x13f   : > { %2298 = vmatpush.bf16.msrb.mxu0 %v4789_v53  ;;  %v5938_v53 = vpack.c.bf16 %v624_v44, %v623_v59  ;;  %v1030_v59 = vadd.f32 %v5716_v48, %v5688_v6  ;;  %v1032_v44 = vadd.f32 %v5732_v60, %v5688_v6  ;;  %v4836_v60 = vld [vmem:[%s8423_s3 + $0xb0] sm:$0xf] }
 0x140   : > { %8599 = vst [vmem:[#allocation29_spill] sm:$0xff] %v5940_v61  ;;  %v1699_v43 = vmax.f32 %v1135_v1, 0.0  ;;  %v1530_v1 = vmax.f32 %v861_v11, 0.0  ;;  %v4828_v11 = vld [vmem:[%s8423_s3 + $0xa0] sm:$0xf] }
 0x142   : > { %2467 = vmatpush.bf16.msrb.mxu1 %v4853_v26  ;;  %v5106_v26 = vld [vmem:[%s8423_s3 + $0xc4] sm:$0xf0] }
 0x143   : > { %v967_v33 = vpop.f32.mrf.mxu2  ;;  %2299 = vmatpush.bf16.msrb.mxu0 %v4781_v16 }
 0x144   : > { %v968_v39 = vadd.f32 %v967_v33, %v5682_v5  ;;  %v1136_v42 = vpop.f32.mrf.mxu3  ;;  %v4845_v33 = vor.u32 %v5106_v26, %v4844_v14  ;;  %v5088_v14 = vld [vmem:[%s8423_s3 + $0x34] sm:$0xf0]  ;;  %v1531_v26 = vmax.f32 %v1030_v59, 0.0 }
 0x145   : > { %v1137_v24 = vadd.f32 %v1136_v42, %v5688_v6  ;;  %v5950_v21 = vpop.f32.mrf.mxu0  ;;  %v4773_v48 = vor.u32 %v5088_v14, %v4772_v57 }
 0x146   : > { %v1702_v12 = vmax.f32 %v968_v39, 0.0  ;;  %v5956_v3 = vpop.f32.mrf.mxu1  ;;  %2468 = vmatpush.bf16.msrb.mxu1 %v4845_v33  ;;  %v1534_v39 = vmax.f32 %v863_v41, 0.0  ;;  %v1535_v33 = vmax.f32 %v1032_v44, 0.0  ;;  %v5086_v41 = vld [vmem:[%s8423_s3 + $0x24] sm:$0xf0] }
 0x147   : > { %v1703_v7 = vmax.f32 %v1137_v24, 0.0  ;;  %v5104_v24 = vld [vmem:[%s8423_s3 + $0xb4] sm:$0xf0]  ;;  %2300 = vmatpush.bf16.msrb.mxu0 %v4773_v48  ;;  %v5102_v44 = vld [vmem:[%s8423_s3 + $0xa4] sm:$0xf0] }
 0x148   : > { %4632 = vmatmul.msk.bf16.gmra.mxu0 %vm749_vm0, %v5938_v53  ;;  %4649 = vmatmul.msk.bf16.gmra.mxu2 %vm749_vm0, %v5940_v61  ;;  %v5974_v55 = vpack.c.bf16 %v1702_v12, %v1698_v47  ;;  %v4837_v42 = vor.u32 %v5104_v24, %v4836_v60  ;;  %v4764_v47 = vld [vmem:[%s8423_s3 + $0x20] sm:$0xf]  ;;  %v5996_v14 = vpack.c.bf16 %v1534_v39, %v1530_v1  ;;  %v4756_v60 = vld [vmem:[%s8423_s3 + $0x10] sm:$0xf]  ;;  %v5084_v24 = vld [vmem:[%s8423_s3 + $0x14] sm:$0xf0] }
 0x149   : > { %4664 = vmatmul.msk.bf16.gmra.mxu1 %vm749_vm0, %v5938_v53  ;;  %4681 = vmatmul.msk.bf16.gmra.mxu3 %vm749_vm0, %v5940_v61  ;;  %v5980_v16 = vpack.c.bf16 %v1703_v7, %v1699_v43  ;;  %v4765_v59 = vor.u32 %v5086_v41, %v4764_v47  ;;  %v4829_v7 = vor.u32 %v5102_v44, %v4828_v11  ;;  %v4820_v1 = vld [vmem:[%s8423_s3 + $0x90] sm:$0xf]  ;;  %v5100_v39 = vld [vmem:[%s8423_s3 + $0x94] sm:$0xf0] }
 0x14a   : > { %8600 = vst [vmem:[#allocation30_spill] sm:$0xff] %v5974_v55  ;;  %2469 = vmatpush.bf16.msrb.mxu1 %v4837_v42  ;;  %v6006_v42 = vpack.c.bf16 %v1535_v33, %v1531_v26  ;;  %v4757_v47 = vor.u32 %v5084_v24, %v4756_v60  ;;  %v625_v41 = vld [vmem:[%s5541_s13 + $0xf0] sm:$0xff]  ;;  %v626_v11 = vld [vmem:[%s5541_s13 + $0xf8] sm:$0xff]  ;;  %v4748_v26 = vld [vmem:[%s8423_s3] sm:$0xf] }
 0x14b   : > { %8601 = vst [vmem:[#allocation31_spill] sm:$0xff] %v5980_v16  ;;  %v970_v57 = vpop.f32.mrf.mxu2  ;;  %2301 = vmatpush.bf16.msrb.mxu0 %v4765_v59  ;;  %v4821_v59 = vor.u32 %v5100_v39, %v4820_v1  ;;  %v5082_v33 = vld [vmem:[%s8423_s3 + $0x4] sm:$0xf0]  ;;  %v4812_v60 = vld [vmem:[%s8423_s3 + $0x80] sm:$0xf]  ;;  %v866_v39 = vadd.f32 %v5746_v13, %v5682_v5 }
 0x14c   : > { %v1139_v12 = vpop.f32.mrf.mxu3  ;;  %8602 = vst [vmem:[#allocation32_spill] sm:$0xff] %v5996_v14  ;;  %v971_v44 = vadd.f32 %v970_v57, %v5682_v5  ;;  %v5098_v1 = vld [vmem:[%s8423_s3 + $0x84] sm:$0xf0] }
 0x14d   : > { %v5994_v43 = vpop.f32.mrf.mxu0  ;;  %8603 = vst [vmem:[#allocation33_spill] sm:$0xff] %v6006_v42  ;;  %v4813_v35 = vor.u32 %v5098_v1, %v4812_v60  ;;  %v627_v1 = vld [vmem:[%s5541_s13 + $0x100] sm:$0xff] }
 0x14e   : > { %v5998_v48 = vpop.f32.mrf.mxu1  ;;  %2470 = vmatpush.bf16.msrb.mxu1 %v4829_v7  ;;  %v1140_v7 = vadd.f32 %v1139_v12, %v5688_v6  ;;  %v4749_v12 = vor.u32 %v5082_v33, %v4748_v26  ;;  %v1037_v26 = vadd.f32 %v5764_v31, %v5688_v6 }
 0x14f   : > { %2302 = vmatpush.bf16.msrb.mxu0 %v4757_v47  ;;  %v6028_v47 = vpack.c.bf16 %v626_v11, %v625_v41  ;;  %v1035_v11 = vadd.f32 %v5748_v18, %v5688_v6 }
 0x150   : > { %v1707_v13 = vmax.f32 %v1140_v7, 0.0  ;;  %v1543_v31 = vmax.f32 %v1037_v26, 0.0 }
 0x152   : > { %2471 = vmatpush.bf16.msrb.mxu1 %v4821_v59  ;;  %v868_v59 = vadd.f32 %v5762_v27, %v5682_v5 }
 0x153   : > { %v972_v61 = vpop.f32.mrf.mxu2  ;;  %2303 = vmatpush.bf16.msrb.mxu0 %v4749_v12 }
 0x154   : > { %v973_v24 = vadd.f32 %v972_v61, %v5682_v5  ;;  %v1141_v57 = vpop.f32.mrf.mxu3  ;;  %v1706_v61 = vmax.f32 %v971_v44, 0.0  ;;  %v1538_v44 = vmax.f32 %v866_v39, 0.0  ;;  %v1542_v60 = vmax.f32 %v868_v59, 0.0  ;;  %v628_v39 = vld [vmem:[%s5541_s13 + $0x108] sm:$0xff]  ;;  %s4507_s13 = scalar_lea.hbm %s8428_s8, %s5069_s19 }
 0x155   : > { %v1142_v16 = vadd.f32 %v1141_v57, %v5688_v6  ;;  %v6038_v55 = vpop.f32.mrf.mxu0  ;;  %s4511_s23 = sshll.u32 %s4507_s13, 4  ;;  %s4512_s23 = int_to_ptr.hbm [resolvable:$true] %s4511_s23 }
 0x156   : > { %v1710_v54 = vmax.f32 %v973_v24, 0.0  ;;  %v6040_v41 = vpop.f32.mrf.mxu1  ;;  %2472 = vmatpush.bf16.msrb.mxu1 %v4813_v35  ;;  %v1539_v35 = vmax.f32 %v1035_v11, 0.0  ;;  %v6060_v57 = vpack.c.bf16 %v1542_v60, %v1538_v44  ;;  %v873_v44 = vadd.f32 %v5794_v19, %v5682_v5  ;;  %s5230_s25 = sshra.s32 %s4512_s23, 4  ;;  %s5231_s25 = int_to_ptr.hbm [resolvable:$true] %s5230_s25 }
 0x157   : > { %v1711_v33 = vmax.f32 %v1142_v16, 0.0  ;;  %s5232_s26 = scalar_lea.hbm %s5231_s25, 2  ;;  %p5237_p2 = scmp.lt.s32.totalorder %s5231_s25, %s8428_s8 }
 0x158   : > { %4633 = vmatmul.msk.bf16.gmra.mxu0 %vm749_vm0, %v6028_v47  ;;  %4682 = vmatmul.msk.bf16.vlgmr.msrb.gmra.mxu2 %vm749_vm0, %v5546_v15  ;;  %v6050_v27 = vpack.c.bf16 %v1710_v54, %v1706_v61  ;;  %8606 = vst [vmem:[#allocation36_spill] sm:$0xff] %v6060_v57  ;;  %v6064_v12 = vpack.c.bf16 %v1543_v31, %v1539_v35  ;;  %p5233_p13 = scmp.ne.s32.totalorder %s5231_s25, %s5232_s26  ;;  %p5238_p3 = scmp.lt.s32.totalorder %s5236_s18, %s5232_s26 }
 0x159   : > { %4665 = vmatmul.msk.bf16.gmra.mxu1 %vm749_vm0, %v6028_v47  ;;  %4714 = vmatmul.msk.bf16.vlgmr.msrb.gmra.mxu3 %vm749_vm0, %v5546_v15  ;;  %v6056_v18 = vpack.c.bf16 %v1711_v33, %v1707_v13  ;;  %v6071_v13 = vpack.c.bf16 %v628_v39, %v627_v1  ;;  %v871_v33 = vadd.f32 %v5778_v63, %v5682_v5 }
 0x15a   : > { %8604 = vst [vmem:[#allocation34_spill] sm:$0xff] %v6050_v27  ;;  %v1042_v1 = vadd.f32 %v5796_v20, %v5688_v6  ;;  %p5234_p0 = pnand %p5233_p13, %p5363_p6  ;;  %p5239_p4 = por %p5238_p3, %p5237_p2 }
 0x15b   : > { %8605 = vst [vmem:[#allocation35_spill] sm:$0xff] %v6056_v18  ;;  %v975_v16 = vpop.f32.mrf.mxu2  ;;  %v1546_v19 = vmax.f32 %v871_v33, 0.0 }
 0x15c   : > { %v1144_v7 = vpop.f32.mrf.mxu3  ;;  %8607 = vst [vmem:[#allocation37_spill] sm:$0xff] %v6064_v12  ;;  %v976_v59 = vadd.f32 %v975_v16, %v5682_v5  ;;  %p5235_p1 = pneg %p5234_p0 }
 0x15d   : > { %v6058_v24 = vpop.f32.mrf.mxu0  ;;  %v1145_v15 = vadd.f32 %v1144_v7, %v5688_v6  ;;  %v1040_v7 = vadd.f32 %v5780_v4, %v5688_v6 }
 0x15e   : > { %v6062_v54 = vpop.f32.mrf.mxu1  ;;  %v1714_v31 = vmax.f32 %v976_v59, 0.0  ;;  %v1550_v59 = vmax.f32 %v873_v44, 0.0  ;;  %p5240_p5 = pnand %p5239_p4, %p5235_p1 }
 0x15f   : > { %v1715_v39 = vmax.f32 %v1145_v15, 0.0  ;;  %v1547_v20 = vmax.f32 %v1040_v7, 0.0  ;;  %v1551_v15 = vmax.f32 %v1042_v1, 0.0  ;;  %v876_v7 = vadd.f32 %v5810_v2, %v5682_v5 }
 0x160   : > { %v6100_v27 = vpack.c.bf16 %v1550_v59, %v1546_v19  ;;  %v878_v1 = vadd.f32 %v5826_v36, %v5682_v5 }
 0x161   : > { %v6104_v33 = vpack.c.bf16 %v1551_v15, %v1547_v20  ;;  %v1554_v36 = vmax.f32 %v876_v7, 0.0 }
 0x162   : > { %8610 = vst [vmem:[#allocation40_spill] sm:$0xff] %v6100_v27 }
 0x163   : > { %v977_v61 = vpop.f32.mrf.mxu2  ;;  %8611 = vst [vmem:[#allocation41_spill] sm:$0xff] %v6104_v33 }
 0x164   : > { %v978_v11 = vadd.f32 %v977_v61, %v5682_v5  ;;  %v1146_v26 = vpop.f32.mrf.mxu3 }
 0x165   : > { %v1147_v60 = vadd.f32 %v1146_v26, %v5688_v6  ;;  %v6078_v35 = vpop.f32.mrf.mxu0 }
 0x166   : > { %v1718_v16 = vmax.f32 %v978_v11, 0.0  ;;  %v6080_v18 = vpop.f32.mrf.mxu1 }
 0x167   : > { %v1719_v61 = vmax.f32 %v1147_v60, 0.0 }
 0x168   : > { %4634 = vmatmul.msk.bf16.gmra.mxu0 %vm749_vm0, %v6071_v13  ;;  %4683 = vmatmul.msk.bf16.gmra.mxu2 %vm749_vm0, %v5563_v22  ;;  %v6090_v63 = vpack.c.bf16 %v1718_v16, %v1714_v31 }
 0x169   : > { %4666 = vmatmul.msk.bf16.gmra.mxu1 %vm749_vm0, %v6071_v13  ;;  %4715 = vmatmul.msk.bf16.gmra.mxu3 %vm749_vm0, %v5563_v22  ;;  %v6096_v4 = vpack.c.bf16 %v1719_v61, %v1715_v39 }
 0x16a   : > { %8608 = vst [vmem:[#allocation38_spill] sm:$0xff] %v6090_v63 }
 0x16b   : > { %8609 = vst [vmem:[#allocation39_spill] sm:$0xff] %v6096_v4  ;;  %v980_v11 = vpop.f32.mrf.mxu2 }
 0x16c   : > { %v1149_v26 = vpop.f32.mrf.mxu3  ;;  %v981_v44 = vadd.f32 %v980_v11, %v5682_v5  ;;  %v1045_v11 = vadd.f32 %v5812_v8, %v5688_v6 }
 0x16d   : > { %v6098_v60 = vpop.f32.mrf.mxu0  ;;  %v1150_v16 = vadd.f32 %v1149_v26, %v5688_v6 }
 0x16e   : > { %v6102_v31 = vpop.f32.mrf.mxu1  ;;  %v1722_v59 = vmax.f32 %v981_v44, 0.0  ;;  %v1558_v44 = vmax.f32 %v878_v1, 0.0 }
 0x16f   : > { %v1723_v26 = vmax.f32 %v1150_v16, 0.0 }
 0x170   : > { %v6134_v51 = vpack.c.bf16 %v1558_v44, %v1554_v36 }
 0x172   : > { %8614 = vst [vmem:[#allocation44_spill] sm:$0xff] %v6134_v51 }
 0x173   : > { %v982_v63 = vpop.f32.mrf.mxu2 }
 0x174   : > { %v983_v22 = vadd.f32 %v982_v63, %v5682_v5  ;;  %v1151_v39 = vpop.f32.mrf.mxu3  ;;  %v1047_v63 = vadd.f32 %v5828_v37, %v5688_v6 }
 0x175   : > { %v1152_v61 = vadd.f32 %v1151_v39, %v5688_v6  ;;  %v6114_v19 = vpop.f32.mrf.mxu0 }
 0x176   : > { %v1726_v20 = vmax.f32 %v983_v22, 0.0  ;;  %v6116_v15 = vpop.f32.mrf.mxu1  ;;  %v1555_v22 = vmax.f32 %v1045_v11, 0.0  ;;  %v1559_v37 = vmax.f32 %v1047_v63, 0.0  ;;  %v881_v11 = vadd.f32 %v5866_v25, %v5682_v5 }
 0x177   : > { %v1727_v4 = vmax.f32 %v1152_v61, 0.0  ;;  %v883_v63 = vadd.f32 %v5906_v62, %v5682_v5 }
 0x178   : > { %4684 = vmatmul.msk.bf16.gmra.mxu2 %vm749_vm0, %v5579_v28  ;;  %2304 = vmatmul.bf16.vlgmr.msrb.gmra.mxu0 %v5703_v30  ;;  %v6125_v2 = vpack.c.bf16 %v1726_v20, %v1722_v59  ;;  %v6138_v59 = vpack.c.bf16 %v1559_v37, %v1555_v22  ;;  %v1562_v62 = vmax.f32 %v881_v11, 0.0 }
 0x179   : > { %4716 = vmatmul.msk.bf16.gmra.mxu3 %vm749_vm0, %v5579_v28  ;;  %2473 = vmatmul.bf16.vlgmr.msrb.gmra.mxu1 %v5706_v32  ;;  %v6130_v8 = vpack.c.bf16 %v1727_v4, %v1723_v26 }
 0x17a   : > { %8612 = vst [vmem:[#allocation42_spill] sm:$0xff] %v6125_v2 }
 0x17b   : > { %8613 = vst [vmem:[#allocation43_spill] sm:$0xff] %v6130_v8  ;;  %v985_v16 = vpop.f32.mrf.mxu2 }
 0x17c   : > { %v1154_v39 = vpop.f32.mrf.mxu3  ;;  %8615 = vst [vmem:[#allocation45_spill] sm:$0xff] %v6138_v59  ;;  %v986_v7 = vadd.f32 %v985_v16, %v5682_v5  ;;  %v1050_v16 = vadd.f32 %v5868_v9, %v5688_v6 }
 0x17d   : > { %v6132_v61 = vpop.f32.mrf.mxu0  ;;  %v1155_v28 = vadd.f32 %v1154_v39, %v5688_v6  ;;  %v1052_v39 = vadd.f32 %v5908_v45, %v5688_v6 }
 0x17e   : > { %v6136_v30 = vpop.f32.mrf.mxu1  ;;  %v1730_v44 = vmax.f32 %v986_v7, 0.0  ;;  %v1566_v7 = vmax.f32 %v883_v63, 0.0 }
 0x17f   : > { %v1567_v45 = vmax.f32 %v1052_v39, 0.0  ;;  %v888_v39 = vadd.f32 %v5994_v43, %v5682_v5 }
 0x180   : > { %v6168_v8 = vpack.c.bf16 %v1566_v7, %v1562_v62 }
 0x182   : > { %8618 = vst [vmem:[#allocation48_spill] sm:$0xff] %v6168_v8 }
 0x183   : > { %v987_v1 = vpop.f32.mrf.mxu2 }
 0x184   : > { %v988_v4 = vadd.f32 %v987_v1, %v5682_v5  ;;  %v1156_v20 = vpop.f32.mrf.mxu3  ;;  %v1731_v1 = vmax.f32 %v1155_v28, 0.0 }
 0x185   : > { %v1157_v26 = vadd.f32 %v1156_v20, %v5688_v6  ;;  %v6148_v36 = vpop.f32.mrf.mxu0 }
 0x186   : > { %v1734_v22 = vmax.f32 %v988_v4, 0.0  ;;  %v6150_v37 = vpop.f32.mrf.mxu1  ;;  %v1563_v4 = vmax.f32 %v1050_v16, 0.0  ;;  %v886_v16 = vadd.f32 %v5950_v21, %v5682_v5 }
 0x187   : > { %v1735_v32 = vmax.f32 %v1157_v26, 0.0 }
 0x188   : > { %4685 = vmatmul.msk.bf16.gmra.mxu2 %vm749_vm0, %v5595_v34  ;;  %2309 = vmatmul.bf16.gmra.mxu0 %v5996_v14  ;;  %v6159_v25 = vpack.c.bf16 %v1734_v22, %v1730_v44  ;;  %v6172_v44 = vpack.c.bf16 %v1567_v45, %v1563_v4  ;;  %v1570_v43 = vmax.f32 %v886_v16, 0.0 }
 0x189   : > { %4717 = vmatmul.msk.bf16.gmra.mxu3 %vm749_vm0, %v5595_v34  ;;  %2478 = vmatmul.bf16.gmra.mxu1 %v6006_v42  ;;  %v6164_v9 = vpack.c.bf16 %v1735_v32, %v1731_v1 }
 0x18a   : > { %8616 = vst [vmem:[#allocation46_spill] sm:$0xff] %v6159_v25 }
 0x18b   : > { %8617 = vst [vmem:[#allocation47_spill] sm:$0xff] %v6164_v9  ;;  %v990_v28 = vpop.f32.mrf.mxu2 }
 0x18c   : > { %v1159_v20 = vpop.f32.mrf.mxu3  ;;  %8619 = vst [vmem:[#allocation49_spill] sm:$0xff] %v6172_v44  ;;  %v991_v11 = vadd.f32 %v990_v28, %v5682_v5  ;;  %v1055_v28 = vadd.f32 %v5956_v3, %v5688_v6 }
 0x18d   : > { %v6166_v26 = vpop.f32.mrf.mxu0  ;;  %v1160_v34 = vadd.f32 %v1159_v20, %v5688_v6  ;;  %v1057_v20 = vadd.f32 %v5998_v48, %v5688_v6 }
 0x18e   : > { %v6170_v14 = vpop.f32.mrf.mxu1  ;;  %v1738_v7 = vmax.f32 %v991_v11, 0.0  ;;  %v1574_v11 = vmax.f32 %v888_v39, 0.0 }
 0x18f   : > { %v1575_v48 = vmax.f32 %v1057_v20, 0.0  ;;  %v893_v20 = vadd.f32 %v6058_v24, %v5682_v5 }
 0x190   : > { %v6202_v9 = vpack.c.bf16 %v1574_v11, %v1570_v43 }
 0x192   : > { %8622 = vst [vmem:[#allocation52_spill] sm:$0xff] %v6202_v9 }
 0x193   : > { %v992_v63 = vpop.f32.mrf.mxu2 }
 0x194   : > { %v993_v32 = vadd.f32 %v992_v63, %v5682_v5  ;;  %v1161_v22 = vpop.f32.mrf.mxu3  ;;  %v1739_v63 = vmax.f32 %v1160_v34, 0.0 }
 0x195   : > { %v1162_v1 = vadd.f32 %v1161_v22, %v5688_v6  ;;  %v6182_v62 = vpop.f32.mrf.mxu0 }
 0x196   : > { %v1742_v4 = vmax.f32 %v993_v32, 0.0  ;;  %v6184_v45 = vpop.f32.mrf.mxu1  ;;  %v1571_v32 = vmax.f32 %v1055_v28, 0.0  ;;  %v891_v28 = vadd.f32 %v6038_v55, %v5682_v5 }
 0x197   : > { %v1743_v42 = vmax.f32 %v1162_v1, 0.0 }
 0x198   : > { %4686 = vmatmul.msk.bf16.gmra.mxu2 %vm749_vm0, %v5611_v40  ;;  %2314 = vmatmul.bf16.gmra.mxu0 %v6060_v57  ;;  %v6193_v21 = vpack.c.bf16 %v1742_v4, %v1738_v7  ;;  %v6206_v7 = vpack.c.bf16 %v1575_v48, %v1571_v32  ;;  %v1578_v24 = vmax.f32 %v891_v28, 0.0 }
 0x199   : > { %4718 = vmatmul.msk.bf16.gmra.mxu3 %vm749_vm0, %v5611_v40  ;;  %2483 = vmatmul.bf16.gmra.mxu1 %v6064_v12  ;;  %v6198_v3 = vpack.c.bf16 %v1743_v42, %v1739_v63 }
 0x19a   : > { %8620 = vst [vmem:[#allocation50_spill] sm:$0xff] %v6193_v21 }
 0x19b   : > { %8621 = vst [vmem:[#allocation51_spill] sm:$0xff] %v6198_v3  ;;  %v995_v34 = vpop.f32.mrf.mxu2 }
 0x19c   : > { %v1164_v22 = vpop.f32.mrf.mxu3  ;;  %8623 = vst [vmem:[#allocation53_spill] sm:$0xff] %v6206_v7  ;;  %v996_v16 = vadd.f32 %v995_v34, %v5682_v5  ;;  %v1060_v34 = vadd.f32 %v6040_v41, %v5688_v6 }
 0x19d   : > { %v6200_v1 = vpop.f32.mrf.mxu0  ;;  %v1165_v40 = vadd.f32 %v1164_v22, %v5688_v6  ;;  %v1062_v22 = vadd.f32 %v6062_v54, %v5688_v6 }
 0x19e   : > { %v6204_v57 = vpop.f32.mrf.mxu1  ;;  %v1746_v11 = vmax.f32 %v996_v16, 0.0  ;;  %v1582_v16 = vmax.f32 %v893_v20, 0.0 }
 0x19f   : > { %v1583_v54 = vmax.f32 %v1062_v22, 0.0  ;;  %v898_v22 = vadd.f32 %v6098_v60, %v5682_v5 }
 0x1a0   : > { %v6236_v3 = vpack.c.bf16 %v1582_v16, %v1578_v24 }
 0x1a2   : > { %8626 = vst [vmem:[#allocation56_spill] sm:$0xff] %v6236_v3 }
 0x1a3   : > { %v997_v39 = vpop.f32.mrf.mxu2 }
 0x1a4   : > { %v998_v42 = vadd.f32 %v997_v39, %v5682_v5  ;;  %v1166_v4 = vpop.f32.mrf.mxu3  ;;  %v1747_v39 = vmax.f32 %v1165_v40, 0.0 }
 0x1a5   : > { %v1167_v63 = vadd.f32 %v1166_v4, %v5688_v6  ;;  %v6216_v43 = vpop.f32.mrf.mxu0 }
 0x1a6   : > { %v1750_v32 = vmax.f32 %v998_v42, 0.0  ;;  %v6218_v48 = vpop.f32.mrf.mxu1  ;;  %v1579_v42 = vmax.f32 %v1060_v34, 0.0  ;;  %v896_v34 = vadd.f32 %v6078_v35, %v5682_v5 }
 0x1a7   : > { %v1751_v12 = vmax.f32 %v1167_v63, 0.0 }
 0x1a8   : > { %4687 = vmatmul.msk.bf16.gmra.mxu2 %vm749_vm0, %v5627_v46  ;;  %2319 = vmatmul.bf16.gmra.mxu0 %v6100_v27  ;;  %v6227_v55 = vpack.c.bf16 %v1750_v32, %v1746_v11  ;;  %v6240_v11 = vpack.c.bf16 %v1583_v54, %v1579_v42  ;;  %v1586_v60 = vmax.f32 %v896_v34, 0.0 }
 0x1a9   : > { %4719 = vmatmul.msk.bf16.gmra.mxu3 %vm749_vm0, %v5627_v46  ;;  %2488 = vmatmul.bf16.gmra.mxu1 %v6104_v33  ;;  %v6232_v41 = vpack.c.bf16 %v1751_v12, %v1747_v39 }
 0x1aa   : > { %8624 = vst [vmem:[#allocation54_spill] sm:$0xff] %v6227_v55 }
 0x1ab   : > { %8625 = vst [vmem:[#allocation55_spill] sm:$0xff] %v6232_v41  ;;  %v1000_v40 = vpop.f32.mrf.mxu2 }
 0x1ac   : > { %v1169_v4 = vpop.f32.mrf.mxu3  ;;  %8627 = vst [vmem:[#allocation57_spill] sm:$0xff] %v6240_v11  ;;  %v1001_v28 = vadd.f32 %v1000_v40, %v5682_v5  ;;  %v1065_v40 = vadd.f32 %v6080_v18, %v5688_v6 }
 0x1ad   : > { %v6234_v63 = vpop.f32.mrf.mxu0  ;;  %v1170_v46 = vadd.f32 %v1169_v4, %v5688_v6  ;;  %v1067_v4 = vadd.f32 %v6102_v31, %v5688_v6 }
 0x1ae   : > { %v6238_v27 = vpop.f32.mrf.mxu1  ;;  %v1754_v16 = vmax.f32 %v1001_v28, 0.0  ;;  %v1590_v28 = vmax.f32 %v898_v22, 0.0 }
 0x1af   : > { %v1591_v31 = vmax.f32 %v1067_v4, 0.0  ;;  %v903_v4 = vadd.f32 %v6132_v61, %v5682_v5 }
 0x1b0   : > { %v6270_v41 = vpack.c.bf16 %v1590_v28, %v1586_v60 }
 0x1b3   : > { %v1002_v20 = vpop.f32.mrf.mxu2 }
 0x1b4   : > { %v1003_v12 = vadd.f32 %v1002_v20, %v5682_v5  ;;  %v1171_v32 = vpop.f32.mrf.mxu3  ;;  %v1755_v20 = vmax.f32 %v1170_v46, 0.0 }
 0x1b5   : > { %v1172_v39 = vadd.f32 %v1171_v32, %v5688_v6  ;;  %v6250_v24 = vpop.f32.mrf.mxu0 }
 0x1b6   : > { %v1758_v42 = vmax.f32 %v1003_v12, 0.0  ;;  %v6252_v54 = vpop.f32.mrf.mxu1  ;;  %v1587_v12 = vmax.f32 %v1065_v40, 0.0  ;;  %v901_v40 = vadd.f32 %v6114_v19, %v5682_v5 }
 0x1b7   : > { %v1759_v33 = vmax.f32 %v1172_v39, 0.0 }
 0x1b8   : > { %4688 = vmatmul.msk.bf16.gmra.mxu2 %vm749_vm0, %v5643_v52  ;;  %2324 = vmatmul.bf16.gmra.mxu0 %v6134_v51  ;;  %v6261_v35 = vpack.c.bf16 %v1758_v42, %v1754_v16  ;;  %v6274_v16 = vpack.c.bf16 %v1591_v31, %v1587_v12  ;;  %v1594_v61 = vmax.f32 %v901_v40, 0.0 }
 0x1b9   : > { %4720 = vmatmul.msk.bf16.gmra.mxu3 %vm749_vm0, %v5643_v52  ;;  %2493 = vmatmul.bf16.gmra.mxu1 %v6138_v59  ;;  %v6266_v18 = vpack.c.bf16 %v1759_v33, %v1755_v20 }
 0x1ba   : > { %8628 = vst [vmem:[#allocation58_spill] sm:$0xff] %v6261_v35 }
 0x1bb   : > { %8629 = vst [vmem:[#allocation59_spill] sm:$0xff] %v6266_v18  ;;  %v1005_v46 = vpop.f32.mrf.mxu2 }
 0x1bc   : > { %v1174_v32 = vpop.f32.mrf.mxu3  ;;  %8630 = vst [vmem:[#allocation60_spill] sm:$0xff] %v6274_v16  ;;  %v1006_v34 = vadd.f32 %v1005_v46, %v5682_v5  ;;  %v1070_v46 = vadd.f32 %v6116_v15, %v5688_v6 }
 0x1bd   : > { %v6268_v39 = vpop.f32.mrf.mxu0  ;;  %v1175_v52 = vadd.f32 %v1174_v32, %v5688_v6  ;;  %v1072_v32 = vadd.f32 %v6136_v30, %v5688_v6 }
 0x1be   : > { %v6272_v51 = vpop.f32.mrf.mxu1  ;;  %v1762_v28 = vmax.f32 %v1006_v34, 0.0  ;;  %v1598_v34 = vmax.f32 %v903_v4, 0.0 }
 0x1bf   : > { %v1599_v30 = vmax.f32 %v1072_v32, 0.0  ;;  %v908_v32 = vadd.f32 %v6166_v26, %v5682_v5 }
 0x1c0   : > { %v6304_v18 = vpack.c.bf16 %v1598_v34, %v1594_v61 }
 0x1c3   : > { %v1007_v22 = vpop.f32.mrf.mxu2 }
 0x1c4   : > { %v1008_v33 = vadd.f32 %v1007_v22, %v5682_v5  ;;  %v1176_v42 = vpop.f32.mrf.mxu3  ;;  %v1763_v22 = vmax.f32 %v1175_v52, 0.0 }
 0x1c5   : > { %v1177_v20 = vadd.f32 %v1176_v42, %v5688_v6  ;;  %v6284_v60 = vpop.f32.mrf.mxu0 }
 0x1c6   : > { %v1766_v12 = vmax.f32 %v1008_v33, 0.0  ;;  %v6286_v31 = vpop.f32.mrf.mxu1  ;;  %v1595_v33 = vmax.f32 %v1070_v46, 0.0  ;;  %v906_v46 = vadd.f32 %v6148_v36, %v5682_v5 }
 0x1c7   : > { %v1767_v59 = vmax.f32 %v1177_v20, 0.0 }
 0x1c8   : > { %4689 = vmatmul.msk.bf16.gmra.mxu2 %vm749_vm0, %v5659_v58  ;;  %2329 = vmatmul.bf16.gmra.mxu0 %v6168_v8  ;;  %v6295_v19 = vpack.c.bf16 %v1766_v12, %v1762_v28  ;;  %v6308_v28 = vpack.c.bf16 %v1599_v30, %v1595_v33  ;;  %v1602_v26 = vmax.f32 %v906_v46, 0.0  ;;  %v5213_v46 = vld [vmem:[%s8422_s2] sm:$0xf] }
 0x1c9   : > { %4721 = vmatmul.msk.bf16.gmra.mxu3 %vm749_vm0, %v5659_v58  ;;  %2498 = vmatmul.bf16.gmra.mxu1 %v6172_v44  ;;  %v6300_v15 = vpack.c.bf16 %v1767_v59, %v1763_v22 }
 0x1ca   : > { %8631 = vst [vmem:[#allocation61_spill] sm:$0xff] %v6295_v19 }
 0x1cb   : > { %8632 = vst [vmem:[#allocation62_spill] sm:$0xff] %v6300_v15  ;;  %v1010_v52 = vpop.f32.mrf.mxu2 }
 0x1cc   : > { %v1179_v42 = vpop.f32.mrf.mxu3  ;;  %8633 = vst [vmem:[#allocation63_spill] sm:$0xff] %v6308_v28  ;;  %v1011_v40 = vadd.f32 %v1010_v52, %v5682_v5  ;;  %v1075_v52 = vadd.f32 %v6150_v37, %v5688_v6 }
 0x1cd   : > { %v6302_v20 = vpop.f32.mrf.mxu0  ;;  %v1180_v58 = vadd.f32 %v1179_v42, %v5688_v6  ;;  %v1077_v42 = vadd.f32 %v6170_v14, %v5688_v6 }
 0x1ce   : > { %v6306_v8 = vpop.f32.mrf.mxu1  ;;  %v1770_v34 = vmax.f32 %v1011_v40, 0.0  ;;  %v1606_v40 = vmax.f32 %v908_v32, 0.0  ;;  %v6343_v32 = vperm.slane %v5213_v46, 2 }
 0x1cf   : > { %v1607_v14 = vmax.f32 %v1077_v42, 0.0 }
 0x1d0   : > { %v6338_v15 = vpack.c.bf16 %v1606_v40, %v1602_v26  ;;  %v911_v40 = vadd.f32 %v6182_v62, %v5682_v5 }
 0x1d3   : > { %v1012_v4 = vpop.f32.mrf.mxu2 }
 0x1d4   : > { %v1013_v59 = vadd.f32 %v1012_v4, %v5682_v5  ;;  %v1181_v12 = vpop.f32.mrf.mxu3  ;;  %v1771_v4 = vmax.f32 %v1180_v58, 0.0 }
 0x1d5   : > { %v1182_v22 = vadd.f32 %v1181_v12, %v5688_v6  ;;  %v6318_v61 = vpop.f32.mrf.mxu0 }
 0x1d6   : > { %v1774_v33 = vmax.f32 %v1013_v59, 0.0  ;;  %v6320_v30 = vpop.f32.mrf.mxu1  ;;  %v1603_v59 = vmax.f32 %v1075_v52, 0.0 }
 0x1d7   : > { %v1775_v44 = vmax.f32 %v1182_v22, 0.0 }
 0x1d8   : > { %4690 = vmatmul.msk.bf16.gmra.mxu2 %vm749_vm0, %v5675_v0  ;;  %2334 = vmatmul.bf16.gmra.mxu0 %v6202_v9  ;;  %v6329_v36 = vpack.c.bf16 %v1774_v33, %v1770_v34 }
 0x1d9   : > { %4722 = vmatmul.msk.bf16.gmra.mxu3 %vm749_vm0, %v5675_v0  ;;  %2503 = vmatmul.bf16.gmra.mxu1 %v6206_v7  ;;  %v6334_v37 = vpack.c.bf16 %v1775_v44, %v1771_v4  ;;  %v6347_v0 = vperm.slane %v5213_v46, 3  ;;  %v6349_v44 = vpack.c.bf16 %v1607_v14, %v1603_v59  ;;  %v913_v7 = vadd.f32 %v6200_v1, %v5682_v5 }
 0x1da   : > { %8634 = vst [vmem:[#allocation64_spill] sm:$0xff] %v6329_v36  ;;  %v1610_v1 = vmax.f32 %v911_v40, 0.0 }
 0x1db   : > { %8635 = vst [vmem:[#allocation65_spill] sm:$0xff] %v6334_v37  ;;  %v1193_v58 = vpop.f32.mrf.mxu2 }
 0x1dc   : > { %v1362_v12 = vpop.f32.mrf.mxu3  ;;  %8636 = vst [vmem:[#allocation66_spill] sm:$0xff] %v6349_v44  ;;  %v1194_v33 = vadd.f32 %v1193_v58, %v6343_v32  ;;  %v1080_v58 = vadd.f32 %v6184_v45, %v5688_v6 }
 0x1dd   : > { %v6336_v22 = vpop.f32.mrf.mxu0  ;;  %v1363_v52 = vadd.f32 %v1362_v12, %v6347_v0  ;;  %v1082_v12 = vadd.f32 %v6204_v57, %v5688_v6 }
 0x1de   : > { %v6345_v34 = vpop.f32.mrf.mxu1  ;;  %v1524_v59 = vmax.f32 %v1194_v33, 0.0  ;;  %v1614_v33 = vmax.f32 %v913_v7, 0.0  ;;  %v1611_v45 = vmax.f32 %v1080_v58, 0.0  ;;  %v1970_v7 = vld [vmem:[%s8424_s4] sm:$0x3] }
 0x1df   : > { %v1615_v57 = vmax.f32 %v1082_v12, 0.0  ;;  %v6389_v40 = vperm.slane %v1970_v7, 0 }
 0x1e3   : > { %v1195_v42 = vpop.f32.mrf.mxu2 }
 0x1e4   : > { %v1196_v4 = vadd.f32 %v1195_v42, %v6343_v32  ;;  %v1364_v26 = vpop.f32.mrf.mxu3  ;;  %v1525_v42 = vmax.f32 %v1363_v52, 0.0 }
 0x1e5   : > { %v1365_v9 = vadd.f32 %v1364_v26, %v6347_v0  ;;  %v6359_v46 = vpop.f32.mrf.mxu0 }
 0x1e6   : > { %v1528_v14 = vmax.f32 %v1196_v4, 0.0  ;;  %v6361_v37 = vpop.f32.mrf.mxu1 }
 0x1e7   : > { %v1529_v36 = vmax.f32 %v1365_v9, 0.0 }
 0x1e8   : > { %v6367_v62 = vpack.c.bf16 %v1528_v14, %v1524_v59  ;;  %4691 = vmatmul.msk.bf16.gmra.mxu2 %vm749_vm0, %v5709_v38  ;;  %2339 = vmatmul.bf16.gmra.mxu0 %v6236_v3  ;;  %v6379_v59 = vpack.c.bf16 %v1614_v33, %v1610_v1  ;;  %v916_v1 = vadd.f32 %v6216_v43, %v5682_v5 }
 0x1e9   : > { %v6372_v4 = vpack.c.bf16 %v1529_v36, %v1525_v42  ;;  %4723 = vmatmul.msk.bf16.gmra.mxu3 %vm749_vm0, %v5709_v38  ;;  %2508 = vmatmul.bf16.gmra.mxu1 %v6240_v11  ;;  %v6386_v36 = vpack.c.bf16 %v1615_v57, %v1611_v45  ;;  %v918_v33 = vadd.f32 %v6234_v63, %v5682_v5 }
 0x1ea   : > { %8637 = vst [vmem:[#allocation67_spill] sm:$0xff] %v6367_v62 }
 0x1eb   : > { %8638 = vst [vmem:[#allocation68_spill] sm:$0xff] %v6372_v4  ;;  %v1198_v52 = vpop.f32.mrf.mxu2 }
 0x1ec   : > { %v1367_v9 = vpop.f32.mrf.mxu3  ;;  %8639 = vst [vmem:[#allocation69_spill] sm:$0xff] %v6379_v59  ;;  %v1199_v38 = vadd.f32 %v1198_v52, %v6343_v32 }
 0x1ed   : > { %v6377_v26 = vpop.f32.mrf.mxu0  ;;  %8640 = vst [vmem:[#allocation70_spill] sm:$0xff] %v6386_v36  ;;  %v1368_v58 = vadd.f32 %v1367_v9, %v6347_v0  ;;  %v1085_v9 = vadd.f32 %v6218_v48, %v5688_v6 }
 0x1ee   : > { %v6381_v14 = vpop.f32.mrf.mxu1  ;;  %v1532_v57 = vmax.f32 %v1199_v38, 0.0  ;;  %v1622_v38 = vmax.f32 %v918_v33, 0.0 }
 0x1ef   : > { %v1533_v62 = vmax.f32 %v1368_v58, 0.0 }
 0x1f3   : > { %v1200_v12 = vpop.f32.mrf.mxu2 }
 0x1f4   : > { %v1201_v42 = vadd.f32 %v1200_v12, %v6343_v32  ;;  %v1369_v11 = vpop.f32.mrf.mxu3  ;;  %v1087_v12 = vadd.f32 %v6238_v27, %v5688_v6  ;;  %v1619_v27 = vmax.f32 %v1085_v9, 0.0 }
 0x1f5   : > { %v1370_v3 = vadd.f32 %v1369_v11, %v6347_v0  ;;  %v2305_v45 = vpop.f32.mrf.mxu0  ;;  %v1618_v11 = vmax.f32 %v916_v1, 0.0 }
 0x1f6   : > { %v1536_v4 = vmax.f32 %v1201_v42, 0.0  ;;  %v2306_v52 = vadd.f32 %v2305_v45, %v6389_v40  ;;  %v2474_v7 = vpop.f32.mrf.mxu1 }
 0x1f7   : > { %v1537_v19 = vmax.f32 %v1370_v3, 0.0  ;;  %v1623_v3 = vmax.f32 %v1087_v12, 0.0  ;;  %v921_v12 = vadd.f32 %v6250_v24, %v5682_v5 }
 0x1f8   : > { %v6403_v43 = vadd.f32 %v2474_v7, %v2306_v52  ;;  %4692 = vmatmul.msk.bf16.gmra.mxu2 %vm749_vm0, %v5741_v10  ;;  %2344 = vmatmul.bf16.gmra.mxu0 %v6270_v41  ;;  %v6408_v63 = vpack.c.bf16 %v1536_v4, %v1532_v57  ;;  %v6415_v52 = vpack.c.bf16 %v1622_v38, %v1618_v11 }
 0x1f9   : > { %4724 = vmatmul.msk.bf16.gmra.mxu3 %vm749_vm0, %v5741_v10  ;;  %2513 = vmatmul.bf16.gmra.mxu1 %v6274_v16  ;;  %v6413_v48 = vpack.c.bf16 %v1537_v19, %v1533_v62  ;;  %v6418_v57 = vpack.c.bf16 %v1623_v3, %v1619_v27  ;;  %v923_v11 = vadd.f32 %v6268_v39, %v5682_v5 }
 0x1fa   : > { %8641 = vst [vmem:[#allocation71_spill] sm:$0xff] %v6408_v63 }
 0x1fb   : > { %8642 = vst [vmem:[#allocation72_spill] sm:$0xff] %v6413_v48  ;;  %v1203_v58 = vpop.f32.mrf.mxu2 }
 0x1fc   : > { %v1372_v42 = vpop.f32.mrf.mxu3  ;;  %8643 = vst [vmem:[#allocation73_spill] sm:$0xff] %v6415_v52  ;;  %v1204_v10 = vadd.f32 %v1203_v58, %v6343_v32 }
 0x1fd   : > { %v2307_v45 = vpop.f32.mrf.mxu0  ;;  %8644 = vst [vmem:[#allocation74_spill] sm:$0xff] %v6418_v57  ;;  %v1373_v33 = vadd.f32 %v1372_v42, %v6347_v0  ;;  %v1090_v42 = vadd.f32 %v6252_v54, %v5688_v6 }
 0x1fe   : > { %v2308_v7 = vadd.f32 %v2307_v45, %v6389_v40  ;;  %v2476_v4 = vpop.f32.mrf.mxu1  ;;  %v1540_v3 = vmax.f32 %v1204_v10, 0.0  ;;  %v1626_v10 = vmax.f32 %v921_v12, 0.0 }
 0x200   : > { %v6420_v1 = vadd.f32 %v2476_v4, %v2308_v7  ;;  %v1092_v4 = vadd.f32 %v6272_v51, %v5688_v6  ;;  %v1627_v51 = vmax.f32 %v1090_v42, 0.0 }
 0x203   : > { %v1205_v19 = vpop.f32.mrf.mxu2 }
 0x204   : > { %v1206_v62 = vadd.f32 %v1205_v19, %v6343_v32  ;;  %v1374_v9 = vpop.f32.mrf.mxu3  ;;  %v1541_v19 = vmax.f32 %v1373_v33, 0.0  ;;  %v1631_v33 = vmax.f32 %v1092_v4, 0.0 }
 0x205   : > { %v1375_v38 = vadd.f32 %v1374_v9, %v6347_v0  ;;  %v2310_v27 = vpop.f32.mrf.mxu0 }
 0x206   : > { %v1544_v45 = vmax.f32 %v1206_v62, 0.0  ;;  %v2311_v7 = vadd.f32 %v2310_v27, %v6389_v40  ;;  %v2479_v58 = vpop.f32.mrf.mxu1  ;;  %v1630_v62 = vmax.f32 %v923_v11, 0.0 }
 0x207   : > { %v1545_v16 = vmax.f32 %v1375_v38, 0.0 }
 0x208   : > { %v6435_v24 = vadd.f32 %v2479_v58, %v2311_v7  ;;  %4693 = vmatmul.msk.bf16.gmra.mxu2 %vm749_vm0, %v5773_v56  ;;  %2349 = vmatmul.bf16.gmra.mxu0 %v6304_v18  ;;  %v6440_v39 = vpack.c.bf16 %v1544_v45, %v1540_v3  ;;  %v6447_v7 = vpack.c.bf16 %v1630_v62, %v1626_v10 }
 0x209   : > { %4725 = vmatmul.msk.bf16.gmra.mxu3 %vm749_vm0, %v5773_v56  ;;  %2518 = vmatmul.bf16.gmra.mxu1 %v6308_v28  ;;  %v6445_v54 = vpack.c.bf16 %v1545_v16, %v1541_v19  ;;  %v6450_v45 = vpack.c.bf16 %v1631_v33, %v1627_v51  ;;  %v926_v19 = vadd.f32 %v6284_v60, %v5682_v5 }
 0x20a   : > { %8645 = vst [vmem:[#allocation75_spill] sm:$0xff] %v6440_v39  ;;  %v928_v10 = vadd.f32 %v6302_v20, %v5682_v5 }
 0x20b   : > { %8646 = vst [vmem:[#allocation76_spill] sm:$0xff] %v6445_v54  ;;  %v1208_v9 = vpop.f32.mrf.mxu2 }
 0x20c   : > { %v1377_v38 = vpop.f32.mrf.mxu3  ;;  %8647 = vst [vmem:[#allocation77_spill] sm:$0xff] %v6447_v7  ;;  %v1209_v56 = vadd.f32 %v1208_v9, %v6343_v32 }
 0x20d   : > { %v2312_v27 = vpop.f32.mrf.mxu0  ;;  %8648 = vst [vmem:[#allocation78_spill] sm:$0xff] %v6450_v45  ;;  %v1378_v11 = vadd.f32 %v1377_v38, %v6347_v0  ;;  %v1095_v38 = vadd.f32 %v6286_v31, %v5688_v6 }
 0x20e   : > { %v2313_v58 = vadd.f32 %v2312_v27, %v6389_v40  ;;  %v2481_v3 = vpop.f32.mrf.mxu1  ;;  %v1548_v33 = vmax.f32 %v1209_v56, 0.0  ;;  %v1634_v56 = vmax.f32 %v926_v19, 0.0 }
 0x210   : > { %v6452_v12 = vadd.f32 %v2481_v3, %v2313_v58  ;;  %v1097_v3 = vadd.f32 %v6306_v8, %v5688_v6  ;;  %v1635_v8 = vmax.f32 %v1095_v38, 0.0 }
 0x213   : > { %v1210_v16 = vpop.f32.mrf.mxu2 }
 0x214   : > { %v1211_v42 = vadd.f32 %v1210_v16, %v6343_v32  ;;  %v1379_v4 = vpop.f32.mrf.mxu3  ;;  %v1549_v16 = vmax.f32 %v1378_v11, 0.0  ;;  %v1639_v11 = vmax.f32 %v1097_v3, 0.0 }
 0x215   : > { %v1380_v62 = vadd.f32 %v1379_v4, %v6347_v0  ;;  %v2315_v51 = vpop.f32.mrf.mxu0 }
 0x216   : > { %v1552_v27 = vmax.f32 %v1211_v42, 0.0  ;;  %v2316_v58 = vadd.f32 %v2315_v51, %v6389_v40  ;;  %v2484_v9 = vpop.f32.mrf.mxu1  ;;  %v1638_v42 = vmax.f32 %v928_v10, 0.0 }
 0x217   : > { %v1553_v28 = vmax.f32 %v1380_v62, 0.0 }
 0x218   : > { %v6467_v60 = vadd.f32 %v2484_v9, %v2316_v58  ;;  %4694 = vmatmul.msk.bf16.gmra.mxu2 %vm749_vm0, %v5805_v50  ;;  %2354 = vmatmul.bf16.gmra.mxu0 %v6338_v15  ;;  %v6472_v20 = vpack.c.bf16 %v1552_v27, %v1548_v33  ;;  %v6479_v58 = vpack.c.bf16 %v1638_v42, %v1634_v56 }
 0x219   : > { %4726 = vmatmul.msk.bf16.gmra.mxu3 %vm749_vm0, %v5805_v50  ;;  %2523 = vmatmul.bf16.gmra.mxu1 %v6349_v44  ;;  %v6477_v31 = vpack.c.bf16 %v1553_v28, %v1549_v16  ;;  %v6482_v27 = vpack.c.bf16 %v1639_v11, %v1635_v8  ;;  %v931_v16 = vadd.f32 %v6318_v61, %v5682_v5 }
 0x21a   : > { %8649 = vst [vmem:[#allocation79_spill] sm:$0xff] %v6472_v20  ;;  %v933_v56 = vadd.f32 %v6336_v22, %v5682_v5 }
 0x21b   : > { %8650 = vst [vmem:[#allocation80_spill] sm:$0xff] %v6477_v31  ;;  %v1213_v4 = vpop.f32.mrf.mxu2 }
 0x21c   : > { %v1382_v62 = vpop.f32.mrf.mxu3  ;;  %8651 = vst [vmem:[#allocation81_spill] sm:$0xff] %v6479_v58  ;;  %v1214_v50 = vadd.f32 %v1213_v4, %v6343_v32 }
 0x21d   : > { %v2317_v51 = vpop.f32.mrf.mxu0  ;;  %8652 = vst [vmem:[#allocation82_spill] sm:$0xff] %v6482_v27  ;;  %v1383_v10 = vadd.f32 %v1382_v62, %v6347_v0  ;;  %v1100_v62 = vadd.f32 %v6320_v30, %v5688_v6 }
 0x21e   : > { %v2318_v9 = vadd.f32 %v2317_v51, %v6389_v40  ;;  %v2486_v33 = vpop.f32.mrf.mxu1  ;;  %v1556_v11 = vmax.f32 %v1214_v50, 0.0  ;;  %v1642_v50 = vmax.f32 %v931_v16, 0.0 }
 0x220   : > { %v6484_v19 = vadd.f32 %v2486_v33, %v2318_v9  ;;  %v1102_v33 = vadd.f32 %v6345_v34, %v5688_v6  ;;  %v1643_v34 = vmax.f32 %v1100_v62, 0.0 }
 0x223   : > { %v1215_v28 = vpop.f32.mrf.mxu2 }
 0x224   : > { %v1216_v38 = vadd.f32 %v1215_v28, %v6343_v32  ;;  %v1384_v3 = vpop.f32.mrf.mxu3  ;;  %v1557_v28 = vmax.f32 %v1383_v10, 0.0  ;;  %v1647_v10 = vmax.f32 %v1102_v33, 0.0 }
 0x225   : > { %v1385_v42 = vadd.f32 %v1384_v3, %v6347_v0  ;;  %v2320_v8 = vpop.f32.mrf.mxu0 }
 0x226   : > { %v1560_v51 = vmax.f32 %v1216_v38, 0.0  ;;  %v2321_v9 = vadd.f32 %v2320_v8, %v6389_v40  ;;  %v2489_v4 = vpop.f32.mrf.mxu1  ;;  %v1646_v38 = vmax.f32 %v933_v56, 0.0 }
 0x227   : > { %v1561_v44 = vmax.f32 %v1385_v42, 0.0 }
 0x228   : > { %v6499_v61 = vadd.f32 %v2489_v4, %v2321_v9  ;;  %4695 = vmatmul.msk.bf16.gmra.mxu2 %vm749_vm0, %v5858_v49  ;;  %2359 = vmatmul.bf16.gmra.mxu0 %v6379_v59  ;;  %v6504_v22 = vpack.c.bf16 %v1560_v51, %v1556_v11  ;;  %v6511_v9 = vpack.c.bf16 %v1646_v38, %v1642_v50 }
 0x229   : > { %4727 = vmatmul.msk.bf16.gmra.mxu3 %vm749_vm0, %v5858_v49  ;;  %2528 = vmatmul.bf16.gmra.mxu1 %v6386_v36  ;;  %v6509_v30 = vpack.c.bf16 %v1561_v44, %v1557_v28  ;;  %v6514_v51 = vpack.c.bf16 %v1647_v10, %v1643_v34  ;;  %v936_v28 = vadd.f32 %v6359_v46, %v5682_v5 }
 0x22a   : > { %8653 = vst [vmem:[#allocation83_spill] sm:$0xff] %v6504_v22  ;;  %v938_v50 = vadd.f32 %v6377_v26, %v5682_v5 }
 0x22b   : > { %8654 = vst [vmem:[#allocation84_spill] sm:$0xff] %v6509_v30  ;;  %v1218_v3 = vpop.f32.mrf.mxu2  ;;  %v1650_v26 = vmax.f32 %v936_v28, 0.0 }
 0x22c   : > { %v1387_v42 = vpop.f32.mrf.mxu3  ;;  %8655 = vst [vmem:[#allocation85_spill] sm:$0xff] %v6511_v9  ;;  %v1219_v49 = vadd.f32 %v1218_v3, %v6343_v32 }
 0x22d   : > { %v2322_v8 = vpop.f32.mrf.mxu0  ;;  %8656 = vst [vmem:[#allocation86_spill] sm:$0xff] %v6514_v51  ;;  %v1388_v56 = vadd.f32 %v1387_v42, %v6347_v0  ;;  %v1105_v42 = vadd.f32 %v6361_v37, %v5688_v6 }
 0x22e   : > { %v2323_v4 = vadd.f32 %v2322_v8, %v6389_v40  ;;  %v2491_v11 = vpop.f32.mrf.mxu1  ;;  %v1564_v10 = vmax.f32 %v1219_v49, 0.0  ;;  %v1654_v49 = vmax.f32 %v938_v50, 0.0 }
 0x230   : > { %v6516_v16 = vadd.f32 %v2491_v11, %v2323_v4  ;;  %v1107_v11 = vadd.f32 %v6381_v14, %v5688_v6  ;;  %v1651_v6 = vmax.f32 %v1105_v42, 0.0 }
 0x232   : > { %v1655_v14 = vmax.f32 %v1107_v11, 0.0 }
 0x233   : > { %v1220_v44 = vpop.f32.mrf.mxu2 }
 0x234   : > { %v1221_v62 = vadd.f32 %v1220_v44, %v6343_v32  ;;  %v1389_v33 = vpop.f32.mrf.mxu3  ;;  %v1565_v44 = vmax.f32 %v1388_v56, 0.0 }
 0x235   : > { %v1390_v38 = vadd.f32 %v1389_v33, %v6347_v0  ;;  %v2325_v34 = vpop.f32.mrf.mxu0 }
 0x236   : > { %v1568_v8 = vmax.f32 %v1221_v62, 0.0  ;;  %v2326_v4 = vadd.f32 %v2325_v34, %v6389_v40  ;;  %v2494_v3 = vpop.f32.mrf.mxu1 }
 0x237   : > { %v1569_v36 = vmax.f32 %v1390_v38, 0.0  ;;  %v6543_v38 = vpack.c.bf16 %v1654_v49, %v1650_v26 }
 0x238   : > { %v6531_v46 = vadd.f32 %v2494_v3, %v2326_v4  ;;  %4696 = vmatmul.msk.bf16.gmra.mxu2 %vm749_vm0, %v5938_v53  ;;  %2364 = vmatmul.bf16.gmra.mxu0 %v6415_v52  ;;  %v6536_v5 = vpack.c.bf16 %v1568_v8, %v1564_v10  ;;  %v6546_v8 = vpack.c.bf16 %v1655_v14, %v1651_v6 }
 0x239   : > { %4728 = vmatmul.msk.bf16.gmra.mxu3 %vm749_vm0, %v5938_v53  ;;  %2533 = vmatmul.bf16.gmra.mxu1 %v6418_v57  ;;  %v6541_v37 = vpack.c.bf16 %v1569_v36, %v1565_v44  ;;  %8659 = vst [vmem:[#allocation89_spill] sm:$0xff] %v6543_v38 }
 0x23a   : > { %8657 = vst [vmem:[#allocation87_spill] sm:$0xff] %v6536_v5 }
 0x23b   : > { %8658 = vst [vmem:[#allocation88_spill] sm:$0xff] %v6541_v37  ;;  %v1223_v56 = vpop.f32.mrf.mxu2 }
 0x23c   : > { %v1392_v62 = vpop.f32.mrf.mxu3  ;;  %8660 = vst [vmem:[#allocation90_spill] sm:$0xff] %v6546_v8  ;;  %v1224_v53 = vadd.f32 %v1223_v56, %v6343_v32 }
 0x23d   : > { %v2327_v33 = vpop.f32.mrf.mxu0  ;;  %v1393_v50 = vadd.f32 %v1392_v62, %v6347_v0 }
 0x23e   : > { %v2328_v34 = vadd.f32 %v2327_v33, %v6389_v40  ;;  %v2496_v10 = vpop.f32.mrf.mxu1  ;;  %v1572_v44 = vmax.f32 %v1224_v53, 0.0 }
 0x23f   : > { %v1573_v6 = vmax.f32 %v1393_v50, 0.0 }
 0x240   : > { %v6548_v28 = vadd.f32 %v2496_v10, %v2328_v34 }
 0x243   : > { %v1225_v36 = vpop.f32.mrf.mxu2 }
 0x244   : > { %v1226_v4 = vadd.f32 %v1225_v36, %v6343_v32  ;;  %v1394_v3 = vpop.f32.mrf.mxu3 }
 0x245   : > { %v1395_v42 = vadd.f32 %v1394_v3, %v6347_v0  ;;  %v2330_v11 = vpop.f32.mrf.mxu0 }
 0x246   : > { %v1576_v26 = vmax.f32 %v1226_v4, 0.0  ;;  %v2331_v49 = vadd.f32 %v2330_v11, %v6389_v40  ;;  %v2499_v33 = vpop.f32.mrf.mxu1 }
 0x247   : > { %v1577_v14 = vmax.f32 %v1395_v42, 0.0 }
 0x248   : > { %v6555_v34 = vadd.f32 %v2499_v33, %v2331_v49  ;;  %4697 = vmatmul.msk.bf16.gmra.mxu2 %vm749_vm0, %v6028_v47  ;;  %2369 = vmatmul.bf16.gmra.mxu0 %v6447_v7  ;;  %v6560_v56 = vpack.c.bf16 %v1576_v26, %v1572_v44 }
 0x249   : > { %4729 = vmatmul.msk.bf16.gmra.mxu3 %vm749_vm0, %v6028_v47  ;;  %2538 = vmatmul.bf16.gmra.mxu1 %v6450_v45  ;;  %v6565_v62 = vpack.c.bf16 %v1577_v14, %v1573_v6 }
 0x24a   : > { %8661 = vst [vmem:[#allocation91_spill] sm:$0xff] %v6555_v34 }
 0x24b   : > { %8662 = vst [vmem:[#allocation92_spill] sm:$0xff] %v6560_v56  ;;  %v1228_v10 = vpop.f32.mrf.mxu2 }
 0x24c   : > { %8663 = vst [vmem:[#allocation93_spill] sm:$0xff] %v6565_v62  ;;  %v1397_v53 = vpop.f32.mrf.mxu3  ;;  %v1229_v42 = vadd.f32 %v1228_v10, %v6343_v32 }
 0x24d   : > { %v2332_v50 = vpop.f32.mrf.mxu0  ;;  %v1398_v11 = vadd.f32 %v1397_v53, %v6347_v0 }
 0x24e   : > { %v2333_v36 = vadd.f32 %v2332_v50, %v6389_v40  ;;  %v2501_v4 = vpop.f32.mrf.mxu1  ;;  %v1580_v6 = vmax.f32 %v1229_v42, 0.0 }
 0x24f   : > { %v1581_v50 = vmax.f32 %v1398_v11, 0.0 }
 0x250   : > { %v6568_v3 = vadd.f32 %v2501_v4, %v2333_v36 }
 0x252   : > { %8664 = vst [vmem:[#allocation94_spill] sm:$0xff] %v6568_v3 }
 0x253   : > { %v1230_v44 = vpop.f32.mrf.mxu2 }
 0x254   : > { %v1231_v26 = vadd.f32 %v1230_v44, %v6343_v32  ;;  %v1399_v47 = vpop.f32.mrf.mxu3 }
 0x255   : > { %v1400_v49 = vadd.f32 %v1399_v47, %v6347_v0  ;;  %v2335_v33 = vpop.f32.mrf.mxu0 }
 0x256   : > { %v1584_v14 = vmax.f32 %v1231_v26, 0.0  ;;  %v2336_v45 = vadd.f32 %v2335_v33, %v6389_v40  ;;  %v2504_v7 = vpop.f32.mrf.mxu1 }
 0x257   : > { %v1585_v57 = vmax.f32 %v1400_v49, 0.0 }
 0x258   : > { %v6575_v36 = vadd.f32 %v2504_v7, %v2336_v45  ;;  %4698 = vmatmul.msk.bf16.gmra.mxu2 %vm749_vm0, %v6071_v13  ;;  %2374 = vmatmul.bf16.gmra.mxu0 %v6479_v58  ;;  %v6580_v10 = vpack.c.bf16 %v1584_v14, %v1580_v6 }
 0x259   : > { %4730 = vmatmul.msk.bf16.gmra.mxu3 %vm749_vm0, %v6071_v13  ;;  %2543 = vmatmul.bf16.gmra.mxu1 %v6482_v27  ;;  %v6585_v53 = vpack.c.bf16 %v1585_v57, %v1581_v50 }
 0x25a   : > { %8665 = vst [vmem:[#allocation95_spill] sm:$0xff] %v6575_v36 }
 0x25b   : > { %8666 = vst [vmem:[#allocation96_spill] sm:$0xff] %v6580_v10  ;;  %v1233_v4 = vpop.f32.mrf.mxu2 }
 0x25c   : > { %8667 = vst [vmem:[#allocation97_spill] sm:$0xff] %v6585_v53  ;;  %v1402_v42 = vpop.f32.mrf.mxu3  ;;  %v1234_v26 = vadd.f32 %v1233_v4, %v6343_v32 }
 0x25d   : > { %v2337_v11 = vpop.f32.mrf.mxu0  ;;  %v1403_v47 = vadd.f32 %v1402_v42, %v6347_v0 }
 0x25e   : > { %v2338_v7 = vadd.f32 %v2337_v11, %v6389_v40  ;;  %v2506_v45 = vpop.f32.mrf.mxu1  ;;  %v1588_v14 = vmax.f32 %v1234_v26, 0.0 }
 0x25f   : > { %v1589_v11 = vmax.f32 %v1403_v47, 0.0 }
 0x260   : > { %v6588_v44 = vadd.f32 %v2506_v45, %v2338_v7 }
 0x262   : > { %8668 = vst [vmem:[#allocation98_spill] sm:$0xff] %v6588_v44 }
 0x263   : > { %v1235_v49 = vpop.f32.mrf.mxu2 }
 0x264   : > { %v1236_v33 = vadd.f32 %v1235_v49, %v6343_v32  ;;  %v1404_v13 = vpop.f32.mrf.mxu3 }
 0x265   : > { %v1405_v6 = vadd.f32 %v1404_v13, %v6347_v0  ;;  %v2340_v57 = vpop.f32.mrf.mxu0 }
 0x266   : > { %v1592_v50 = vmax.f32 %v1236_v33, 0.0  ;;  %v2341_v27 = vadd.f32 %v2340_v57, %v6389_v40  ;;  %v2509_v58 = vpop.f32.mrf.mxu1 }
 0x267   : > { %v1593_v36 = vmax.f32 %v1405_v6, 0.0 }
 0x268   : > { %v6595_v7 = vadd.f32 %v2509_v58, %v2341_v27  ;;  %4699 = vmatmul.msk.bf16.gmra.mxu2 %vm749_vm0, %v5549_v17  ;;  %2379 = vmatmul.bf16.gmra.mxu0 %v6511_v9  ;;  %v6600_v4 = vpack.c.bf16 %v1592_v50, %v1588_v14 }
 0x269   : > { %4731 = vmatmul.msk.bf16.gmra.mxu3 %vm749_vm0, %v5549_v17  ;;  %2548 = vmatmul.bf16.gmra.mxu1 %v6514_v51  ;;  %v6605_v42 = vpack.c.bf16 %v1593_v36, %v1589_v11 }
 0x26a   : > { %8669 = vst [vmem:[#allocation99_spill] sm:$0xff] %v6595_v7 }
 0x26b   : > { %8670 = vst [vmem:[#allocation100_spill] sm:$0xff] %v6605_v42  ;;  %v1238_v45 = vpop.f32.mrf.mxu2 }
 0x26c   : > { %v1407_v26 = vpop.f32.mrf.mxu3  ;;  %v1239_v33 = vadd.f32 %v1238_v45, %v6343_v32 }
 0x26d   : > { %v2342_v47 = vpop.f32.mrf.mxu0  ;;  %v1408_v13 = vadd.f32 %v1407_v26, %v6347_v0 }
 0x26e   : > { %v2343_v58 = vadd.f32 %v2342_v47, %v6389_v40  ;;  %v2511_v27 = vpop.f32.mrf.mxu1  ;;  %v1596_v50 = vmax.f32 %v1239_v33, 0.0 }
 0x26f   : > { %v1597_v47 = vmax.f32 %v1408_v13, 0.0 }
 0x270   : > { %v6608_v49 = vadd.f32 %v2511_v27, %v2343_v58 }
 0x272   : > { %8671 = vst [vmem:[#allocation101_spill] sm:$0xff] %v6608_v49 }
 0x273   : > { %v1240_v6 = vpop.f32.mrf.mxu2 }
 0x274   : > { %v1241_v57 = vadd.f32 %v1240_v6, %v6343_v32  ;;  %v1409_v17 = vpop.f32.mrf.mxu3 }
 0x275   : > { %v1410_v14 = vadd.f32 %v1409_v17, %v6347_v0  ;;  %v2345_v36 = vpop.f32.mrf.mxu0 }
 0x276   : > { %v1600_v11 = vmax.f32 %v1241_v57, 0.0  ;;  %v2346_v51 = vadd.f32 %v2345_v36, %v6389_v40  ;;  %v2514_v9 = vpop.f32.mrf.mxu1 }
 0x277   : > { %v1601_v7 = vmax.f32 %v1410_v14, 0.0 }
 0x278   : > { %v6615_v58 = vadd.f32 %v2514_v9, %v2346_v51  ;;  %4700 = vmatmul.msk.bf16.gmra.mxu2 %vm749_vm0, %v5565_v23  ;;  %2384 = vmatmul.bf16.gmra.mxu0 %v6543_v38  ;;  %v6620_v45 = vpack.c.bf16 %v1600_v11, %v1596_v50 }
 0x279   : > { %4732 = vmatmul.msk.bf16.gmra.mxu3 %vm749_vm0, %v5565_v23  ;;  %2553 = vmatmul.bf16.gmra.mxu1 %v6546_v8  ;;  %v6625_v26 = vpack.c.bf16 %v1601_v7, %v1597_v47 }
 0x27a   : > { %8672 = vst [vmem:[#allocation102_spill] sm:$0xff] %v6615_v58 }
 0x27b   : > { %v1243_v27 = vpop.f32.mrf.mxu2 }
 0x27c   : > { %v1412_v33 = vpop.f32.mrf.mxu3  ;;  %v1244_v57 = vadd.f32 %v1243_v27, %v6343_v32  ;;  %v8675_v27 = vld [vmem:[#allocation15_spill] sm:$0xff] }
 0x27d   : > { %v2347_v13 = vpop.f32.mrf.mxu0  ;;  %v1413_v17 = vadd.f32 %v1412_v33, %v6347_v0 }
 0x27e   : > { %v2348_v9 = vadd.f32 %v2347_v13, %v6389_v40  ;;  %v2516_v51 = vpop.f32.mrf.mxu1  ;;  %v1604_v11 = vmax.f32 %v1244_v57, 0.0 }
 0x27f   : > { %v1605_v13 = vmax.f32 %v1413_v17, 0.0 }
 0x280   : > { %v6628_v6 = vadd.f32 %v2516_v51, %v2348_v9  ;;  %v8676_v51 = vld [vmem:[#allocation16_spill] sm:$0xff] }
 0x282   : > { %8673 = vst [vmem:[#allocation103_spill] sm:$0xff] %v6628_v6 }
 0x283   : > { %v1245_v14 = vpop.f32.mrf.mxu2 }
 0x284   : > { %v1246_v36 = vadd.f32 %v1245_v14, %v6343_v32  ;;  %v1414_v23 = vpop.f32.mrf.mxu3 }
 0x285   : > { %v1415_v50 = vadd.f32 %v1414_v23, %v6347_v0  ;;  %v2350_v7 = vpop.f32.mrf.mxu0 }
 0x286   : > { %v1608_v47 = vmax.f32 %v1246_v36, 0.0  ;;  %v2351_v8 = vadd.f32 %v2350_v7, %v6389_v40  ;;  %v2519_v38 = vpop.f32.mrf.mxu1 }
 0x287   : > { %v1609_v58 = vmax.f32 %v1415_v50, 0.0 }
 0x288   : > { %v6635_v9 = vadd.f32 %v2519_v38, %v2351_v8  ;;  %4701 = vmatmul.msk.bf16.gmra.mxu2 %vm749_vm0, %v5581_v29  ;;  %2389 = vmatmul.bf16.gmra.mxu0 %v8675_v27  ;;  %v6640_v33 = vpack.c.bf16 %v1608_v47, %v1604_v11 }
 0x289   : > { %4733 = vmatmul.msk.bf16.gmra.mxu3 %vm749_vm0, %v5581_v29  ;;  %2558 = vmatmul.bf16.gmra.mxu1 %v8676_v51  ;;  %v6645_v57 = vpack.c.bf16 %v1609_v58, %v1605_v13 }
 0x28a   : > { %8674 = vst [vmem:[#allocation104_spill] sm:$0xff] %v6635_v9 }
 0x28b   : > { %8677 = vst [vmem:[#allocation105_spill] sm:$0xff] %v6645_v57  ;;  %v1248_v14 = vpop.f32.mrf.mxu2 }
 0x28c   : > { %v1417_v36 = vpop.f32.mrf.mxu3  ;;  %v1249_v50 = vadd.f32 %v1248_v14, %v6343_v32  ;;  %v8681_v14 = vld [vmem:[#allocation18_spill] sm:$0xff] }
 0x28d   : > { %v2352_v17 = vpop.f32.mrf.mxu0  ;;  %v1418_v7 = vadd.f32 %v1417_v36, %v6347_v0 }
 0x28e   : > { %v2353_v38 = vadd.f32 %v2352_v17, %v6389_v40  ;;  %v2521_v8 = vpop.f32.mrf.mxu1  ;;  %v1612_v13 = vmax.f32 %v1249_v50, 0.0 }
 0x28f   : > { %v1613_v17 = vmax.f32 %v1418_v7, 0.0 }
 0x290   : > { %v6648_v23 = vadd.f32 %v2521_v8, %v2353_v38  ;;  %v8680_v8 = vld [vmem:[#allocation6_spill] sm:$0xff] }
 0x292   : > { %8678 = vst [vmem:[#allocation106_spill] sm:$0xff] %v6648_v23 }
 0x293   : > { %v1250_v11 = vpop.f32.mrf.mxu2 }
 0x294   : > { %v1251_v47 = vadd.f32 %v1250_v11, %v6343_v32  ;;  %v1419_v29 = vpop.f32.mrf.mxu3  ;;  %v8683_v11 = vld [vmem:[#allocation19_spill] sm:$0xff] }
 0x295   : > { %v1420_v51 = vadd.f32 %v1419_v29, %v6347_v0  ;;  %v2355_v58 = vpop.f32.mrf.mxu0 }
 0x296   : > { %v1616_v27 = vmax.f32 %v1251_v47, 0.0  ;;  %v2356_v9 = vadd.f32 %v2355_v58, %v6389_v40  ;;  %v2524_v6 = vpop.f32.mrf.mxu1 }
 0x297   : > { %v1617_v49 = vmax.f32 %v1420_v51, 0.0 }
 0x298   : > { %v6655_v38 = vadd.f32 %v2524_v6, %v2356_v9  ;;  %4702 = vmatmul.msk.bf16.gmra.mxu2 %vm749_vm0, %v8680_v8  ;;  %2394 = vmatmul.bf16.gmra.mxu0 %v8681_v14  ;;  %v6660_v36 = vpack.c.bf16 %v1616_v27, %v1612_v13 }
 0x299   : > { %4734 = vmatmul.msk.bf16.gmra.mxu3 %vm749_vm0, %v8680_v8  ;;  %2563 = vmatmul.bf16.gmra.mxu1 %v8683_v11  ;;  %v6665_v50 = vpack.c.bf16 %v1617_v49, %v1613_v17 }
 0x29a   : > { %8679 = vst [vmem:[#allocation107_spill] sm:$0xff] %v6655_v38 }
 0x29b   : > { %8682 = vst [vmem:[#allocation6_spill] sm:$0xff] %v6660_v36  ;;  %v1253_v47 = vpop.f32.mrf.mxu2 }
 0x29c   : > { %8684 = vst [vmem:[#allocation108_spill] sm:$0xff] %v6665_v50  ;;  %v1422_v29 = vpop.f32.mrf.mxu3  ;;  %v1254_v58 = vadd.f32 %v1253_v47, %v6343_v32  ;;  %v8688_v47 = vld [vmem:[#allocation21_spill] sm:$0xff] }
 0x29d   : > { %v2357_v7 = vpop.f32.mrf.mxu0  ;;  %v1423_v27 = vadd.f32 %v1422_v29, %v6347_v0 }
 0x29e   : > { %v2358_v6 = vadd.f32 %v2357_v7, %v6389_v40  ;;  %v2526_v9 = vpop.f32.mrf.mxu1  ;;  %v1620_v17 = vmax.f32 %v1254_v58, 0.0 }
 0x29f   : > { %v1621_v7 = vmax.f32 %v1423_v27, 0.0 }
 0x2a0   : > { %v6668_v51 = vadd.f32 %v2526_v9, %v2358_v6  ;;  %v8687_v9 = vld [vmem:[#allocation7_spill] sm:$0xff] }
 0x2a2   : > { %8685 = vst [vmem:[#allocation109_spill] sm:$0xff] %v6668_v51 }
 0x2a3   : > { %v1255_v13 = vpop.f32.mrf.mxu2 }
 0x2a4   : > { %v1256_v14 = vadd.f32 %v1255_v13, %v6343_v32  ;;  %v1424_v8 = vpop.f32.mrf.mxu3  ;;  %v8690_v13 = vld [vmem:[#allocation22_spill] sm:$0xff] }
 0x2a5   : > { %v1425_v11 = vadd.f32 %v1424_v8, %v6347_v0  ;;  %v2360_v49 = vpop.f32.mrf.mxu0 }
 0x2a6   : > { %v1624_v38 = vmax.f32 %v1256_v14, 0.0  ;;  %v2361_v23 = vadd.f32 %v2360_v49, %v6389_v40  ;;  %v2529_v44 = vpop.f32.mrf.mxu1 }
 0x2a7   : > { %v1625_v52 = vmax.f32 %v1425_v11, 0.0 }
 0x2a8   : > { %v6675_v6 = vadd.f32 %v2529_v44, %v2361_v23  ;;  %4703 = vmatmul.msk.bf16.gmra.mxu2 %vm749_vm0, %v8687_v9  ;;  %2399 = vmatmul.bf16.gmra.mxu0 %v8688_v47  ;;  %v6680_v29 = vpack.c.bf16 %v1624_v38, %v1620_v17 }
 0x2a9   : > { %4735 = vmatmul.msk.bf16.gmra.mxu3 %vm749_vm0, %v8687_v9  ;;  %2568 = vmatmul.bf16.gmra.mxu1 %v8690_v13  ;;  %v6685_v14 = vpack.c.bf16 %v1625_v52, %v1621_v7 }
 0x2aa   : > { %8686 = vst [vmem:[#allocation110_spill] sm:$0xff] %v6675_v6 }
 0x2ab   : > { %8689 = vst [vmem:[#allocation7_spill] sm:$0xff] %v6680_v29  ;;  %v1258_v58 = vpop.f32.mrf.mxu2 }
 0x2ac   : > { %8691 = vst [vmem:[#allocation111_spill] sm:$0xff] %v6685_v14  ;;  %v1427_v8 = vpop.f32.mrf.mxu3  ;;  %v1259_v49 = vadd.f32 %v1258_v58, %v6343_v32  ;;  %v8695_v58 = vld [vmem:[#allocation24_spill] sm:$0xff] }
 0x2ad   : > { %v2362_v27 = vpop.f32.mrf.mxu0  ;;  %v1428_v38 = vadd.f32 %v1427_v8, %v6347_v0 }
 0x2ae   : > { %v2363_v44 = vadd.f32 %v2362_v27, %v6389_v40  ;;  %v2531_v23 = vpop.f32.mrf.mxu1  ;;  %v1628_v7 = vmax.f32 %v1259_v49, 0.0 }
 0x2af   : > { %v1629_v27 = vmax.f32 %v1428_v38, 0.0 }
 0x2b0   : > { %v6688_v11 = vadd.f32 %v2531_v23, %v2363_v44  ;;  %v8694_v23 = vld [vmem:[#allocation8_spill] sm:$0xff] }
 0x2b2   : > { %8692 = vst [vmem:[#allocation112_spill] sm:$0xff] %v6688_v11 }
 0x2b3   : > { %v1260_v17 = vpop.f32.mrf.mxu2 }
 0x2b4   : > { %v1261_v47 = vadd.f32 %v1260_v17, %v6343_v32  ;;  %v1429_v9 = vpop.f32.mrf.mxu3  ;;  %v8697_v17 = vld [vmem:[#allocation25_spill] sm:$0xff] }
 0x2b5   : > { %v1430_v13 = vadd.f32 %v1429_v9, %v6347_v0  ;;  %v2365_v52 = vpop.f32.mrf.mxu0 }
 0x2b6   : > { %v1632_v6 = vmax.f32 %v1261_v47, 0.0  ;;  %v2366_v51 = vadd.f32 %v2365_v52, %v6389_v40  ;;  %v2534_v3 = vpop.f32.mrf.mxu1 }
 0x2b7   : > { %v1633_v34 = vmax.f32 %v1430_v13, 0.0 }
 0x2b8   : > { %v6695_v44 = vadd.f32 %v2534_v3, %v2366_v51  ;;  %4704 = vmatmul.msk.bf16.gmra.mxu2 %vm749_vm0, %v8694_v23  ;;  %2404 = vmatmul.bf16.gmra.mxu0 %v8695_v58  ;;  %v6700_v8 = vpack.c.bf16 %v1632_v6, %v1628_v7 }
 0x2b9   : > { %4736 = vmatmul.msk.bf16.gmra.mxu3 %vm749_vm0, %v8694_v23  ;;  %2573 = vmatmul.bf16.gmra.mxu1 %v8697_v17  ;;  %v6705_v47 = vpack.c.bf16 %v1633_v34, %v1629_v27 }
 0x2ba   : > { %8693 = vst [vmem:[#allocation113_spill] sm:$0xff] %v6695_v44 }
 0x2bb   : > { %8696 = vst [vmem:[#allocation8_spill] sm:$0xff] %v6700_v8  ;;  %v1263_v49 = vpop.f32.mrf.mxu2 }
 0x2bc   : > { %8698 = vst [vmem:[#allocation114_spill] sm:$0xff] %v6705_v47  ;;  %v1432_v9 = vpop.f32.mrf.mxu3  ;;  %v1264_v52 = vadd.f32 %v1263_v49, %v6343_v32  ;;  %v8702_v49 = vld [vmem:[#allocation27_spill] sm:$0xff] }
 0x2bd   : > { %v2367_v38 = vpop.f32.mrf.mxu0  ;;  %v1433_v6 = vadd.f32 %v1432_v9, %v6347_v0 }
 0x2be   : > { %v2368_v3 = vadd.f32 %v2367_v38, %v6389_v40  ;;  %v2536_v51 = vpop.f32.mrf.mxu1  ;;  %v1636_v27 = vmax.f32 %v1264_v52, 0.0 }
 0x2bf   : > { %v1637_v38 = vmax.f32 %v1433_v6, 0.0 }
 0x2c0   : > { %v6708_v13 = vadd.f32 %v2536_v51, %v2368_v3  ;;  %v8701_v51 = vld [vmem:[#allocation9_spill] sm:$0xff] }
 0x2c2   : > { %8699 = vst [vmem:[#allocation115_spill] sm:$0xff] %v6708_v13 }
 0x2c3   : > { %v1265_v7 = vpop.f32.mrf.mxu2 }
 0x2c4   : > { %v1266_v58 = vadd.f32 %v1265_v7, %v6343_v32  ;;  %v1434_v23 = vpop.f32.mrf.mxu3  ;;  %v8704_v7 = vld [vmem:[#allocation28_spill] sm:$0xff] }
 0x2c5   : > { %v1435_v17 = vadd.f32 %v1434_v23, %v6347_v0  ;;  %v2370_v34 = vpop.f32.mrf.mxu0 }
 0x2c6   : > { %v1640_v44 = vmax.f32 %v1266_v58, 0.0  ;;  %v2371_v11 = vadd.f32 %v2370_v34, %v6389_v40  ;;  %v2539_v47 = vpop.f32.mrf.mxu1 }
 0x2c7   : > { %v1641_v59 = vmax.f32 %v1435_v17, 0.0 }
 0x2c8   : > { %v6715_v3 = vadd.f32 %v2539_v47, %v2371_v11  ;;  %4705 = vmatmul.msk.bf16.gmra.mxu2 %vm749_vm0, %v8701_v51  ;;  %2409 = vmatmul.bf16.gmra.mxu0 %v8702_v49  ;;  %v6720_v9 = vpack.c.bf16 %v1640_v44, %v1636_v27 }
 0x2c9   : > { %4737 = vmatmul.msk.bf16.gmra.mxu3 %vm749_vm0, %v8701_v51  ;;  %2578 = vmatmul.bf16.gmra.mxu1 %v8704_v7  ;;  %v6725_v58 = vpack.c.bf16 %v1641_v59, %v1637_v38 }
 0x2ca   : > { %8700 = vst [vmem:[#allocation116_spill] sm:$0xff] %v6715_v3 }
 0x2cb   : > { %8703 = vst [vmem:[#allocation9_spill] sm:$0xff] %v6720_v9  ;;  %v1268_v52 = vpop.f32.mrf.mxu2 }
 0x2cc   : > { %8705 = vst [vmem:[#allocation117_spill] sm:$0xff] %v6725_v58  ;;  %v1437_v23 = vpop.f32.mrf.mxu3  ;;  %v1269_v34 = vadd.f32 %v1268_v52, %v6343_v32  ;;  %v8709_v52 = vld [vmem:[#allocation30_spill] sm:$0xff] }
 0x2cd   : > { %v2372_v6 = vpop.f32.mrf.mxu0  ;;  %v1438_v44 = vadd.f32 %v1437_v23, %v6347_v0 }
 0x2ce   : > { %v2373_v11 = vadd.f32 %v2372_v6, %v6389_v40  ;;  %v2541_v17 = vpop.f32.mrf.mxu1  ;;  %v1644_v38 = vmax.f32 %v1269_v34, 0.0 }
 0x2cf   : > { %v1645_v6 = vmax.f32 %v1438_v44, 0.0 }
 0x2d0   : > { %v6728_v47 = vadd.f32 %v2541_v17, %v2373_v11  ;;  %v8708_v17 = vld [vmem:[#allocation10_spill] sm:$0xff] }
 0x2d2   : > { %8706 = vst [vmem:[#allocation118_spill] sm:$0xff] %v6728_v47 }
 0x2d3   : > { %v1270_v27 = vpop.f32.mrf.mxu2 }
 0x2d4   : > { %v1271_v49 = vadd.f32 %v1270_v27, %v6343_v32  ;;  %v1439_v51 = vpop.f32.mrf.mxu3  ;;  %v8711_v27 = vld [vmem:[#allocation31_spill] sm:$0xff] }
 0x2d5   : > { %v1440_v7 = vadd.f32 %v1439_v51, %v6347_v0  ;;  %v2375_v59 = vpop.f32.mrf.mxu0 }
 0x2d6   : > { %v1648_v3 = vmax.f32 %v1271_v49, 0.0  ;;  %v2376_v13 = vadd.f32 %v2375_v59, %v6389_v40  ;;  %v2544_v58 = vpop.f32.mrf.mxu1 }
 0x2d7   : > { %v1649_v9 = vmax.f32 %v1440_v7, 0.0 }
 0x2d8   : > { %v6735_v11 = vadd.f32 %v2544_v58, %v2376_v13  ;;  %4706 = vmatmul.msk.bf16.gmra.mxu2 %vm749_vm0, %v8708_v17  ;;  %2414 = vmatmul.bf16.gmra.mxu0 %v8709_v52  ;;  %v6740_v23 = vpack.c.bf16 %v1648_v3, %v1644_v38 }
 0x2d9   : > { %4738 = vmatmul.msk.bf16.gmra.mxu3 %vm749_vm0, %v8708_v17  ;;  %2583 = vmatmul.bf16.gmra.mxu1 %v8711_v27  ;;  %v6745_v49 = vpack.c.bf16 %v1649_v9, %v1645_v6 }
 0x2da   : > { %8707 = vst [vmem:[#allocation119_spill] sm:$0xff] %v6735_v11 }
 0x2db   : > { %8710 = vst [vmem:[#allocation10_spill] sm:$0xff] %v6740_v23  ;;  %v1273_v34 = vpop.f32.mrf.mxu2 }
 0x2dc   : > { %8712 = vst [vmem:[#allocation120_spill] sm:$0xff] %v6745_v49  ;;  %v1442_v51 = vpop.f32.mrf.mxu3  ;;  %v1274_v59 = vadd.f32 %v1273_v34, %v6343_v32  ;;  %v8716_v34 = vld [vmem:[#allocation34_spill] sm:$0xff] }
 0x2dd   : > { %v2377_v44 = vpop.f32.mrf.mxu0  ;;  %v1443_v3 = vadd.f32 %v1442_v51, %v6347_v0 }
 0x2de   : > { %v2378_v13 = vadd.f32 %v2377_v44, %v6389_v40  ;;  %v2546_v7 = vpop.f32.mrf.mxu1  ;;  %v1652_v6 = vmax.f32 %v1274_v59, 0.0 }
 0x2df   : > { %v1653_v44 = vmax.f32 %v1443_v3, 0.0 }
 0x2e0   : > { %v6748_v58 = vadd.f32 %v2546_v7, %v2378_v13  ;;  %v8715_v7 = vld [vmem:[#allocation11_spill] sm:$0xff] }
 0x2e2   : > { %8713 = vst [vmem:[#allocation121_spill] sm:$0xff] %v6748_v58 }
 0x2e3   : > { %v1275_v38 = vpop.f32.mrf.mxu2 }
 0x2e4   : > { %v1276_v52 = vadd.f32 %v1275_v38, %v6343_v32  ;;  %v1444_v17 = vpop.f32.mrf.mxu3  ;;  %v8718_v38 = vld [vmem:[#allocation35_spill] sm:$0xff] }
 0x2e5   : > { %v1445_v27 = vadd.f32 %v1444_v17, %v6347_v0  ;;  %v2380_v9 = vpop.f32.mrf.mxu0 }
 0x2e6   : > { %v1656_v11 = vmax.f32 %v1276_v52, 0.0  ;;  %v2381_v47 = vadd.f32 %v2380_v9, %v6389_v40  ;;  %v2549_v49 = vpop.f32.mrf.mxu1 }
 0x2e7   : > { %v1657_v23 = vmax.f32 %v1445_v27, 0.0 }
 0x2e8   : > { %v6755_v13 = vadd.f32 %v2549_v49, %v2381_v47  ;;  %4707 = vmatmul.msk.bf16.gmra.mxu2 %vm749_vm0, %v8715_v7  ;;  %2419 = vmatmul.bf16.gmra.mxu0 %v8716_v34  ;;  %v6760_v51 = vpack.c.bf16 %v1656_v11, %v1652_v6 }
 0x2e9   : > { %4739 = vmatmul.msk.bf16.gmra.mxu3 %vm749_vm0, %v8715_v7  ;;  %2588 = vmatmul.bf16.gmra.mxu1 %v8718_v38  ;;  %v6765_v52 = vpack.c.bf16 %v1657_v23, %v1653_v44 }
 0x2ea   : > { %8714 = vst [vmem:[#allocation122_spill] sm:$0xff] %v6755_v13 }
 0x2eb   : > { %8717 = vst [vmem:[#allocation11_spill] sm:$0xff] %v6760_v51  ;;  %v1278_v59 = vpop.f32.mrf.mxu2 }
 0x2ec   : > { %8719 = vst [vmem:[#allocation123_spill] sm:$0xff] %v6765_v52  ;;  %v1447_v17 = vpop.f32.mrf.mxu3  ;;  %v1279_v9 = vadd.f32 %v1278_v59, %v6343_v32  ;;  %v8723_v59 = vld [vmem:[#allocation38_spill] sm:$0xff] }
 0x2ed   : > { %v2382_v3 = vpop.f32.mrf.mxu0  ;;  %v1448_v11 = vadd.f32 %v1447_v17, %v6347_v0 }
 0x2ee   : > { %v2383_v47 = vadd.f32 %v2382_v3, %v6389_v40  ;;  %v2551_v27 = vpop.f32.mrf.mxu1  ;;  %v1660_v44 = vmax.f32 %v1279_v9, 0.0 }
 0x2ef   : > { %v1661_v3 = vmax.f32 %v1448_v11, 0.0 }
 0x2f0   : > { %v6768_v49 = vadd.f32 %v2551_v27, %v2383_v47  ;;  %v8722_v27 = vld [vmem:[#allocation14_spill] sm:$0xff] }
 0x2f2   : > { %8720 = vst [vmem:[#allocation124_spill] sm:$0xff] %v6768_v49 }
 0x2f3   : > { %v1280_v6 = vpop.f32.mrf.mxu2 }
 0x2f4   : > { %v1281_v34 = vadd.f32 %v1280_v6, %v6343_v32  ;;  %v1449_v7 = vpop.f32.mrf.mxu3  ;;  %v8725_v6 = vld [vmem:[#allocation39_spill] sm:$0xff] }
 0x2f5   : > { %v1450_v38 = vadd.f32 %v1449_v7, %v6347_v0  ;;  %v2385_v23 = vpop.f32.mrf.mxu0 }
 0x2f6   : > { %v1664_v13 = vmax.f32 %v1281_v34, 0.0  ;;  %v2386_v58 = vadd.f32 %v2385_v23, %v6389_v40  ;;  %v2554_v52 = vpop.f32.mrf.mxu1  ;;  %v4932_v34 = vld [vmem:[%s8423_s3 + $0x170] sm:$0xf] }
 0x2f7   : > { %v1665_v51 = vmax.f32 %v1450_v38, 0.0 }
 0x2f8   : > { %v6775_v47 = vadd.f32 %v2554_v52, %v2386_v58  ;;  %4708 = vmatmul.msk.bf16.gmra.mxu2 %vm749_vm0, %v8722_v27  ;;  %2424 = vmatmul.bf16.gmra.mxu0 %v8723_v59  ;;  %v6780_v17 = vpack.c.bf16 %v1664_v13, %v1660_v44  ;;  %v5128_v58 = vld [vmem:[%s8423_s3 + $0x174] sm:$0xf0]  ;;  %v4996_v44 = vld [vmem:[%s8423_s3 + $0x1f0] sm:$0xf] }
 0x2f9   : > { %4740 = vmatmul.msk.bf16.gmra.mxu3 %vm749_vm0, %v8722_v27  ;;  %2593 = vmatmul.bf16.gmra.mxu1 %v8725_v6  ;;  %v6791_v38 = vpack.c.bf16 %v1665_v51, %v1661_v3  ;;  %v4933_v52 = vor.u32 %v5128_v58, %v4932_v34  ;;  %v5144_v27 = vld [vmem:[%s8423_s3 + $0x1f4] sm:$0xf0] }
 0x2fa   : > { %8721 = vst [vmem:[#allocation125_spill] sm:$0xff] %v6775_v47  ;;  %v4997_v51 = vor.u32 %v5144_v27, %v4996_v44  ;;  %v8731_v27 = vld [vmem:[#allocation43_spill] sm:$0xff] }
 0x2fb   : > { %8724 = vst [vmem:[#allocation14_spill] sm:$0xff] %v6780_v17  ;;  %v1283_v9 = vpop.f32.mrf.mxu2  ;;  %2634 = vmatpush.bf16.msra.mxu2 %v4933_v52 }
 0x2fc   : > { %8726 = vst [vmem:[#allocation126_spill] sm:$0xff] %v6791_v38  ;;  %v1452_v11 = vpop.f32.mrf.mxu3  ;;  %v1284_v3 = vadd.f32 %v1283_v9, %v6343_v32  ;;  %2803 = vmatpush.bf16.msra.mxu3 %v4997_v51  ;;  %v8729_v9 = vld [vmem:[#allocation17_spill] sm:$0xff] }
 0x2fd   : > { %v2387_v13 = vpop.f32.mrf.mxu0  ;;  %v1453_v34 = vadd.f32 %v1452_v11, %v6347_v0 }
 0x2fe   : > { %v2388_v7 = vadd.f32 %v2387_v13, %v6389_v40  ;;  %v2556_v23 = vpop.f32.mrf.mxu1  ;;  %v1668_v49 = vmax.f32 %v1284_v3, 0.0 }
 0x300   : > { %v6800_v6 = vadd.f32 %v2556_v23, %v2388_v7  ;;  %v1669_v7 = vmax.f32 %v1453_v34, 0.0 }
 0x302   : > { %8727 = vst [vmem:[#allocation127_spill] sm:$0xff] %v6800_v6 }
 0x303   : > { %v1285_v58 = vpop.f32.mrf.mxu2 }
 0x304   : > { %v1286_v52 = vadd.f32 %v1285_v58, %v6343_v32  ;;  %v1454_v13 = vpop.f32.mrf.mxu3 }
 0x305   : > { %v1455_v59 = vadd.f32 %v1454_v13, %v6347_v0  ;;  %v2390_v47 = vpop.f32.mrf.mxu0 }
 0x306   : > { %v1672_v38 = vmax.f32 %v1286_v52, 0.0  ;;  %v2391_v17 = vadd.f32 %v2390_v47, %v6389_v40  ;;  %v2559_v8 = vpop.f32.mrf.mxu1 }
 0x307   : > { %v1673_v23 = vmax.f32 %v1455_v59, 0.0 }
 0x308   : > { %v6807_v44 = vadd.f32 %v2559_v8, %v2391_v17  ;;  %4709 = vmatmul.msk.bf16.gmra.mxu2 %vm749_vm0, %v8729_v9  ;;  %2429 = vmatmul.bf16.gmra.mxu0 %v6125_v2  ;;  %v6812_v11 = vpack.c.bf16 %v1672_v38, %v1668_v49 }
 0x309   : > { %4741 = vmatmul.msk.bf16.gmra.mxu3 %vm749_vm0, %v8729_v9  ;;  %2598 = vmatmul.bf16.gmra.mxu1 %v8731_v27  ;;  %v6817_v51 = vpack.c.bf16 %v1673_v23, %v1669_v7 }
 0x30a   : > { %8728 = vst [vmem:[#allocation128_spill] sm:$0xff] %v6807_v44 }
 0x30b   : > { %8730 = vst [vmem:[#allocation17_spill] sm:$0xff] %v6812_v11  ;;  %v1288_v47 = vpop.f32.mrf.mxu2 }
 0x30c   : > { %8732 = vst [vmem:[#allocation129_spill] sm:$0xff] %v6817_v51  ;;  %v1457_v3 = vpop.f32.mrf.mxu3  ;;  %v1289_v58 = vadd.f32 %v1288_v47, %v6343_v32 }
 0x30d   : > { %v2392_v34 = vpop.f32.mrf.mxu0  ;;  %v1458_v49 = vadd.f32 %v1457_v3, %v6347_v0  ;;  %v8737_v3 = vld [vmem:[#allocation47_spill] sm:$0xff] }
 0x30e   : > { %v2393_v8 = vadd.f32 %v2392_v34, %v6389_v40  ;;  %v2561_v59 = vpop.f32.mrf.mxu1  ;;  %v1676_v23 = vmax.f32 %v1289_v58, 0.0 }
 0x30f   : > { %v1677_v34 = vmax.f32 %v1458_v49, 0.0 }
 0x310   : > { %v6820_v17 = vadd.f32 %v2561_v59, %v2393_v8  ;;  %v8735_v59 = vld [vmem:[#allocation20_spill] sm:$0xff] }
 0x312   : > { %8733 = vst [vmem:[#allocation130_spill] sm:$0xff] %v6820_v17 }
 0x313   : > { %v1290_v38 = vpop.f32.mrf.mxu2 }
 0x314   : > { %v1291_v52 = vadd.f32 %v1290_v38, %v6343_v32  ;;  %v1459_v13 = vpop.f32.mrf.mxu3 }
 0x315   : > { %v1460_v9 = vadd.f32 %v1459_v13, %v6347_v0  ;;  %v2395_v7 = vpop.f32.mrf.mxu0 }
 0x316   : > { %v1680_v27 = vmax.f32 %v1291_v52, 0.0  ;;  %v2396_v2 = vadd.f32 %v2395_v7, %v6389_v40  ;;  %v2564_v44 = vpop.f32.mrf.mxu1 }
 0x317   : > { %v1681_v6 = vmax.f32 %v1460_v9, 0.0 }
 0x318   : > { %v6827_v8 = vadd.f32 %v2564_v44, %v2396_v2  ;;  %4710 = vmatmul.msk.bf16.gmra.mxu2 %vm749_vm0, %v8735_v59  ;;  %2434 = vmatmul.bf16.gmra.mxu0 %v6159_v25  ;;  %v6832_v47 = vpack.c.bf16 %v1680_v27, %v1676_v23  ;;  %v4924_v2 = vld [vmem:[%s8423_s3 + $0x160] sm:$0xf]  ;;  %v5126_v44 = vld [vmem:[%s8423_s3 + $0x164] sm:$0xf0] }
 0x319   : > { %4742 = vmatmul.msk.bf16.gmra.mxu3 %vm749_vm0, %v8735_v59  ;;  %2603 = vmatmul.bf16.gmra.mxu1 %v8737_v3  ;;  %v6837_v58 = vpack.c.bf16 %v1681_v6, %v1677_v34  ;;  %v4988_v27 = vld [vmem:[%s8423_s3 + $0x1e0] sm:$0xf]  ;;  %v4925_v52 = vor.u32 %v5126_v44, %v4924_v2  ;;  %v5142_v6 = vld [vmem:[%s8423_s3 + $0x1e4] sm:$0xf0]  ;;  %v4916_v34 = vld [vmem:[%s8423_s3 + $0x150] sm:$0xf] }
 0x31a   : > { %8734 = vst [vmem:[#allocation131_spill] sm:$0xff] %v6827_v8  ;;  %v4989_v9 = vor.u32 %v5142_v6, %v4988_v27  ;;  %v5124_v59 = vld [vmem:[%s8423_s3 + $0x154] sm:$0xf0]  ;;  %v4980_v27 = vld [vmem:[%s8423_s3 + $0x1d0] sm:$0xf] }
 0x31b   : > { %8736 = vst [vmem:[#allocation20_spill] sm:$0xff] %v6832_v47  ;;  %v1293_v38 = vpop.f32.mrf.mxu2  ;;  %2635 = vmatpush.bf16.msra.mxu2 %v4925_v52  ;;  %v4917_v44 = vor.u32 %v5124_v59, %v4916_v34  ;;  %v5140_v52 = vld [vmem:[%s8423_s3 + $0x1d4] sm:$0xf0]  ;;  %v4972_v34 = vld [vmem:[%s8423_s3 + $0x1c0] sm:$0xf] }
 0x31c   : > { %8738 = vst [vmem:[#allocation132_spill] sm:$0xff] %v6837_v58  ;;  %v1462_v49 = vpop.f32.mrf.mxu3  ;;  %2804 = vmatpush.bf16.msra.mxu3 %v4989_v9  ;;  %v4981_v6 = vor.u32 %v5140_v52, %v4980_v27 }
 0x31d   : > { %v2397_v13 = vpop.f32.mrf.mxu0  ;;  %v1463_v9 = vadd.f32 %v1462_v49, %v6347_v0  ;;  %v5138_v49 = vld [vmem:[%s8423_s3 + $0x1c4] sm:$0xf0] }
 0x31e   : > { %v2398_v7 = vadd.f32 %v2397_v13, %v6389_v40  ;;  %v2566_v23 = vpop.f32.mrf.mxu1  ;;  %v1294_v13 = vadd.f32 %v1293_v38, %v6343_v32 }
 0x31f   : > { %2636 = vmatpush.bf16.msra.mxu2 %v4917_v44  ;;  %v1685_v58 = vmax.f32 %v1463_v9, 0.0  ;;  %v4964_v9 = vld [vmem:[%s8423_s3 + $0x1b0] sm:$0xf] }
 0x320   : > { %v6858_v2 = vadd.f32 %v2566_v23, %v2398_v7  ;;  %2805 = vmatpush.bf16.msra.mxu3 %v4981_v6  ;;  %v4908_v7 = vld [vmem:[%s8423_s3 + $0x140] sm:$0xf]  ;;  %v5122_v23 = vld [vmem:[%s8423_s3 + $0x144] sm:$0xf0]  ;;  %v4973_v6 = vor.u32 %v5138_v49, %v4972_v34  ;;  %v1684_v25 = vmax.f32 %v1294_v13, 0.0  ;;  %v8741_v34 = vld [vmem:[#allocation23_spill] sm:$0xff] }
 0x321   : > { %v4909_v44 = vor.u32 %v5122_v23, %v4908_v7  ;;  %v5120_v7 = vld [vmem:[%s8423_s3 + $0x134] sm:$0xf0] }
 0x322   : > { %8739 = vst [vmem:[#allocation133_spill] sm:$0xff] %v6858_v2 }
 0x323   : > { %v1295_v3 = vpop.f32.mrf.mxu2  ;;  %2637 = vmatpush.bf16.msra.mxu2 %v4909_v44 }
 0x324   : > { %v1296_v59 = vadd.f32 %v1295_v3, %v6343_v32  ;;  %v1464_v38 = vpop.f32.mrf.mxu3  ;;  %2806 = vmatpush.bf16.msra.mxu3 %v4973_v6  ;;  %v4900_v3 = vld [vmem:[%s8423_s3 + $0x130] sm:$0xf] }
 0x325   : > { %v1465_v27 = vadd.f32 %v1464_v38, %v6347_v0  ;;  %v2400_v52 = vpop.f32.mrf.mxu0  ;;  %v4901_v13 = vor.u32 %v5120_v7, %v4900_v3 }
 0x326   : > { %v1688_v2 = vmax.f32 %v1296_v59, 0.0  ;;  %v2401_v8 = vadd.f32 %v2400_v52, %v6389_v40  ;;  %v2569_v17 = vpop.f32.mrf.mxu1  ;;  %v5136_v59 = vld [vmem:[%s8423_s3 + $0x1b4] sm:$0xf0] }
 0x327   : > { %v1689_v47 = vmax.f32 %v1465_v27, 0.0  ;;  %2638 = vmatpush.bf16.msra.mxu2 %v4901_v13  ;;  %v4892_v27 = vld [vmem:[%s8423_s3 + $0x120] sm:$0xf]  ;;  %v4884_v13 = vld [vmem:[%s8423_s3 + $0x110] sm:$0xf] }
 0x328   : > { %v6889_v23 = vadd.f32 %v2569_v17, %v2401_v8  ;;  %4711 = vmatmul.msk.bf16.gmra.mxu2 %vm749_vm0, %v8741_v34  ;;  %2439 = vmatmul.bf16.gmra.mxu0 %v6193_v21  ;;  %v6900_v38 = vpack.c.bf16 %v1688_v2, %v1684_v25  ;;  %v8743_v17 = vld [vmem:[#allocation51_spill] sm:$0xff]  ;;  %v4965_v8 = vor.u32 %v5136_v59, %v4964_v9  ;;  %v5118_v25 = vld [vmem:[%s8423_s3 + $0x124] sm:$0xf0]  ;;  %v4956_v2 = vld [vmem:[%s8423_s3 + $0x1a0] sm:$0xf] }
 0x329   : > { %4743 = vmatmul.msk.bf16.gmra.mxu3 %vm749_vm0, %v8741_v34  ;;  %2608 = vmatmul.bf16.gmra.mxu1 %v8743_v17  ;;  %v6905_v44 = vpack.c.bf16 %v1689_v47, %v1685_v58  ;;  %v4893_v6 = vor.u32 %v5118_v25, %v4892_v27  ;;  %v5134_v47 = vld [vmem:[%s8423_s3 + $0x1a4] sm:$0xf0]  ;;  %v5116_v9 = vld [vmem:[%s8423_s3 + $0x114] sm:$0xf0]  ;;  %v4948_v27 = vld [vmem:[%s8423_s3 + $0x190] sm:$0xf] }
 0x32a   : > { %8740 = vst [vmem:[#allocation134_spill] sm:$0xff] %v6889_v23  ;;  %2807 = vmatpush.bf16.msra.mxu3 %v4965_v8  ;;  %v4957_v3 = vor.u32 %v5134_v47, %v4956_v2  ;;  %v4885_v8 = vor.u32 %v5116_v9, %v4884_v13  ;;  %v5132_v25 = vld [vmem:[%s8423_s3 + $0x194] sm:$0xf0] }
 0x32b   : > { %8742 = vst [vmem:[#allocation23_spill] sm:$0xff] %v6900_v38  ;;  %v1298_v49 = vpop.f32.mrf.mxu2  ;;  %2639 = vmatpush.bf16.msra.mxu2 %v4893_v6  ;;  %v4949_v2 = vor.u32 %v5132_v25, %v4948_v27 }
 0x32c   : > { %8744 = vst [vmem:[#allocation135_spill] sm:$0xff] %v6905_v44  ;;  %v1467_v52 = vpop.f32.mrf.mxu3  ;;  %v1299_v6 = vadd.f32 %v1298_v49, %v6343_v32 }
 0x32d   : > { %v2402_v58 = vpop.f32.mrf.mxu0  ;;  %v1468_v47 = vadd.f32 %v1467_v52, %v6347_v0  ;;  %v5130_v52 = vld [vmem:[%s8423_s3 + $0x184] sm:$0xf0] }
 0x32e   : > { %v2403_v7 = vadd.f32 %v2402_v58, %v6389_v40  ;;  %v2571_v34 = vpop.f32.mrf.mxu1  ;;  %2808 = vmatpush.bf16.msra.mxu3 %v4957_v3  ;;  %v4876_v3 = vld [vmem:[%s8423_s3 + $0x100] sm:$0xf] }
 0x32f   : > { %2640 = vmatpush.bf16.msra.mxu2 %v4885_v8  ;;  %v1693_v23 = vmax.f32 %v1468_v47, 0.0  ;;  %v5111_v47 = vld [vmem:[%s8423_s3 + $0xf4] sm:$0xf] }
 0x330   : > { %v6926_v59 = vadd.f32 %v2571_v34, %v2403_v7  ;;  %v5114_v7 = vld [vmem:[%s8423_s3 + $0x104] sm:$0xf0]  ;;  %v4940_v34 = vld [vmem:[%s8423_s3 + $0x180] sm:$0xf] }
 0x331   : > { %v4877_v9 = vor.u32 %v5114_v7, %v4876_v3  ;;  %v4941_v25 = vor.u32 %v5130_v52, %v4940_v34  ;;  %v4806_v3 = vld [vmem:[%s8423_s3 + $0x78] sm:$0xf0]  ;;  %v8747_v34 = vld [vmem:[#allocation26_spill] sm:$0xff] }
 0x332   : > { %8745 = vst [vmem:[#allocation136_spill] sm:$0xff] %v6926_v59  ;;  %2809 = vmatpush.bf16.msra.mxu3 %v4949_v2  ;;  %v1692_v2 = vmax.f32 %v1299_v6, 0.0 }
 0x333   : > { %v1300_v58 = vpop.f32.mrf.mxu2  ;;  %2641 = vmatpush.bf16.msra.mxu2 %v4877_v9 }
 0x334   : > { %v1301_v13 = vadd.f32 %v1300_v58, %v6343_v32  ;;  %v1469_v49 = vpop.f32.mrf.mxu3  ;;  %v5095_v58 = vld [vmem:[%s8423_s3 + $0x74] sm:$0xf] }
 0x335   : > { %v1470_v8 = vadd.f32 %v1469_v49, %v6347_v0  ;;  %v2405_v27 = vpop.f32.mrf.mxu0  ;;  %v4809_v6 = vor.u32 %v5095_v58, %v4806_v3 }
 0x336   : > { %v1696_v17 = vmax.f32 %v1301_v13, 0.0  ;;  %v2406_v21 = vadd.f32 %v2405_v27, %v6389_v40  ;;  %v2574_v59 = vpop.f32.mrf.mxu1  ;;  %2810 = vmatpush.bf16.msra.mxu3 %v4941_v25  ;;  %v4870_v13 = vld [vmem:[%s8423_s3 + $0xf8] sm:$0xf0]  ;;  %v5109_v27 = vld [vmem:[%s8423_s3 + $0xe4] sm:$0xf] }
 0x337   : > { %v1697_v44 = vmax.f32 %v1470_v8, 0.0  ;;  %2972 = vmatpush.bf16.msra.mxu0 %v4809_v6  ;;  %v5093_v8 = vld [vmem:[%s8423_s3 + $0x64] sm:$0xf]  ;;  %v5091_v6 = vld [vmem:[%s8423_s3 + $0x54] sm:$0xf] }
 0x338   : > { %v6957_v7 = vadd.f32 %v2574_v59, %v2406_v21  ;;  %4712 = vmatmul.msk.bf16.gmra.mxu2 %vm749_vm0, %v8747_v34  ;;  %2444 = vmatmul.bf16.gmra.mxu0 %v6227_v55  ;;  %v6968_v49 = vpack.c.bf16 %v1696_v17, %v1692_v2  ;;  %v8749_v21 = vld [vmem:[#allocation55_spill] sm:$0xff]  ;;  %v4873_v59 = vor.u32 %v5111_v47, %v4870_v13  ;;  %v4790_v47 = vld [vmem:[%s8423_s3 + $0x58] sm:$0xf0] }
 0x339   : > { %4744 = vmatmul.msk.bf16.gmra.mxu3 %vm749_vm0, %v8747_v34  ;;  %2613 = vmatmul.bf16.gmra.mxu1 %v8749_v21  ;;  %v6973_v9 = vpack.c.bf16 %v1697_v44, %v1693_v23  ;;  %v4798_v17 = vld [vmem:[%s8423_s3 + $0x68] sm:$0xf0] }
 0x33a   : > { %8746 = vst [vmem:[#allocation137_spill] sm:$0xff] %v6957_v7  ;;  %3141 = vmatpush.bf16.msra.mxu1 %v4873_v59  ;;  %v4801_v2 = vor.u32 %v5093_v8, %v4798_v17  ;;  %v4862_v23 = vld [vmem:[%s8423_s3 + $0xe8] sm:$0xf0]  ;;  %v4793_v59 = vor.u32 %v5091_v6, %v4790_v47  ;;  %v5107_v8 = vld [vmem:[%s8423_s3 + $0xd4] sm:$0xf] }
 0x33b   : > { %8748 = vst [vmem:[#allocation26_spill] sm:$0xff] %v6968_v49  ;;  %v1303_v52 = vpop.f32.mrf.mxu2  ;;  %v4865_v58 = vor.u32 %v5109_v27, %v4862_v23  ;;  %v4854_v17 = vld [vmem:[%s8423_s3 + $0xd8] sm:$0xf0] }
 0x33c   : > { %8750 = vst [vmem:[#allocation138_spill] sm:$0xff] %v6973_v9  ;;  %v1472_v25 = vpop.f32.mrf.mxu3  ;;  %2973 = vmatpush.bf16.msra.mxu0 %v4801_v2  ;;  %v4857_v27 = vor.u32 %v5107_v8, %v4854_v17  ;;  %v1304_v2 = vadd.f32 %v1303_v52, %v6343_v32 }
 0x33d   : > { %v2407_v44 = vpop.f32.mrf.mxu0  ;;  %v1473_v23 = vadd.f32 %v1472_v25, %v6347_v0  ;;  %v4846_v25 = vld [vmem:[%s8423_s3 + $0xc8] sm:$0xf0] }
 0x33e   : > { %v2408_v3 = vadd.f32 %v2407_v44, %v6389_v40  ;;  %v2576_v34 = vpop.f32.mrf.mxu1  ;;  %3142 = vmatpush.bf16.msra.mxu1 %v4865_v58  ;;  %v5089_v58 = vld [vmem:[%s8423_s3 + $0x44] sm:$0xf] }
 0x33f   : > { %v1701_v7 = vmax.f32 %v1473_v23, 0.0  ;;  %v5103_v23 = vld [vmem:[%s8423_s3 + $0xb4] sm:$0xf] }
 0x340   : > { %v6994_v13 = vadd.f32 %v2576_v34, %v2408_v3  ;;  %2974 = vmatpush.bf16.msra.mxu0 %v4793_v59  ;;  %v4782_v3 = vld [vmem:[%s8423_s3 + $0x48] sm:$0xf0]  ;;  %v5105_v34 = vld [vmem:[%s8423_s3 + $0xc4] sm:$0xf] }
 0x341   : > { %v4785_v47 = vor.u32 %v5089_v58, %v4782_v3  ;;  %v4849_v17 = vor.u32 %v5105_v34, %v4846_v25  ;;  %v4774_v58 = vld [vmem:[%s8423_s3 + $0x38] sm:$0xf0] }
 0x342   : > { %8751 = vst [vmem:[#allocation139_spill] sm:$0xff] %v6994_v13  ;;  %3143 = vmatpush.bf16.msra.mxu1 %v4857_v27  ;;  %v1700_v27 = vmax.f32 %v1304_v2, 0.0  ;;  %v8753_v34 = vld [vmem:[#allocation29_spill] sm:$0xff] }
 0x343   : > { %v1305_v44 = vpop.f32.mrf.mxu2 }
 0x344   : > { %v1306_v6 = vadd.f32 %v1305_v44, %v6343_v32  ;;  %v1474_v52 = vpop.f32.mrf.mxu3  ;;  %2975 = vmatpush.bf16.msra.mxu0 %v4785_v47  ;;  %v5087_v44 = vld [vmem:[%s8423_s3 + $0x34] sm:$0xf] }
 0x345   : > { %v1475_v59 = vadd.f32 %v1474_v52, %v6347_v0  ;;  %v2410_v8 = vpop.f32.mrf.mxu0  ;;  %v4777_v2 = vor.u32 %v5087_v44, %v4774_v58 }
 0x346   : > { %v1704_v21 = vmax.f32 %v1306_v6, 0.0  ;;  %v2411_v55 = vadd.f32 %v2410_v8, %v6389_v40  ;;  %v2579_v13 = vpop.f32.mrf.mxu1  ;;  %3144 = vmatpush.bf16.msra.mxu1 %v4849_v17  ;;  %v4838_v6 = vld [vmem:[%s8423_s3 + $0xb8] sm:$0xf0]  ;;  %v5101_v8 = vld [vmem:[%s8423_s3 + $0xa4] sm:$0xf] }
 0x347   : > { %v1705_v9 = vmax.f32 %v1475_v59, 0.0  ;;  %v5085_v59 = vld [vmem:[%s8423_s3 + $0x24] sm:$0xf] }
 0x348   : > { %v7025_v3 = vadd.f32 %v2579_v13, %v2411_v55  ;;  %4713 = vmatmul.msk.bf16.gmra.mxu2 %vm749_vm0, %v8753_v34  ;;  %2449 = vmatmul.bf16.gmra.mxu0 %v6261_v35  ;;  %v7036_v52 = vpack.c.bf16 %v1704_v21, %v1700_v27  ;;  %v8755_v55 = vld [vmem:[#allocation59_spill] sm:$0xff]  ;;  %v4841_v13 = vor.u32 %v5103_v23, %v4838_v6  ;;  %v4758_v23 = vld [vmem:[%s8423_s3 + $0x18] sm:$0xf0] }
 0x349   : > { %4745 = vmatmul.msk.bf16.gmra.mxu3 %vm749_vm0, %v8753_v34  ;;  %2618 = vmatmul.bf16.gmra.mxu1 %v8755_v55  ;;  %v7041_v47 = vpack.c.bf16 %v1705_v9, %v1701_v7  ;;  %v4766_v21 = vld [vmem:[%s8423_s3 + $0x28] sm:$0xf0] }
 0x34a   : > { %8752 = vst [vmem:[#allocation140_spill] sm:$0xff] %v7025_v3  ;;  %2976 = vmatpush.bf16.msra.mxu0 %v4777_v2  ;;  %3145 = vmatpush.bf16.msra.mxu1 %v4841_v13  ;;  %v4769_v27 = vor.u32 %v5085_v59, %v4766_v21  ;;  %v4830_v7 = vld [vmem:[%s8423_s3 + $0xa8] sm:$0xf0]  ;;  %v5083_v2 = vld [vmem:[%s8423_s3 + $0x14] sm:$0xf] }
 0x34b   : > { %8754 = vst [vmem:[#allocation29_spill] sm:$0xff] %v7036_v52  ;;  %v1308_v25 = vpop.f32.mrf.mxu2  ;;  %v4833_v44 = vor.u32 %v5101_v8, %v4830_v7  ;;  %v4761_v13 = vor.u32 %v5083_v2, %v4758_v23  ;;  %v5099_v59 = vld [vmem:[%s8423_s3 + $0x94] sm:$0xf]  ;;  %v4822_v21 = vld [vmem:[%s8423_s3 + $0x98] sm:$0xf0] }
 0x34c   : > { %8756 = vst [vmem:[#allocation141_spill] sm:$0xff] %v7041_v47  ;;  %v1477_v17 = vpop.f32.mrf.mxu3  ;;  %v4825_v8 = vor.u32 %v5099_v59, %v4822_v21 }
 0x34d   : > { %v2412_v9 = vpop.f32.mrf.mxu0  ;;  %v1478_v7 = vadd.f32 %v1477_v17, %v6347_v0  ;;  %v4814_v17 = vld [vmem:[%s8423_s3 + $0x88] sm:$0xf0] }
 0x34e   : > { %v2413_v58 = vadd.f32 %v2412_v9, %v6389_v40  ;;  %v2581_v34 = vpop.f32.mrf.mxu1  ;;  %2977 = vmatpush.bf16.msra.mxu0 %v4769_v27  ;;  %3146 = vmatpush.bf16.msra.mxu1 %v4833_v44  ;;  %v1309_v27 = vadd.f32 %v1308_v25, %v6343_v32  ;;  %v5081_v44 = vld [vmem:[%s8423_s3 + $0x4] sm:$0xf] }
 0x34f   : > { %v1709_v3 = vmax.f32 %v1478_v7, 0.0 }
 0x350   : > { %v7062_v6 = vadd.f32 %v2581_v34, %v2413_v58  ;;  %v4750_v58 = vld [vmem:[%s8423_s3 + $0x8] sm:$0xf0]  ;;  %v5097_v34 = vld [vmem:[%s8423_s3 + $0x84] sm:$0xf] }
 0x351   : > { %v4753_v23 = vor.u32 %v5081_v44, %v4750_v58  ;;  %v4817_v21 = vor.u32 %v5097_v34, %v4814_v17  ;;  %v8759_v44 = vld [vmem:[#allocation61_spill] sm:$0xff]  ;;  %v8760_v58 = vld [vmem:[#allocation67_spill] sm:$0xff]  ;;  %v8763_v34 = vld [vmem:[#allocation68_spill] sm:$0xff] }
 0x352   : > { %8757 = vst [vmem:[#allocation142_spill] sm:$0xff] %v7062_v6  ;;  %2978 = vmatpush.bf16.msra.mxu0 %v4761_v13  ;;  %3147 = vmatpush.bf16.msra.mxu1 %v4825_v8  ;;  %v1708_v8 = vmax.f32 %v1309_v27, 0.0 }
 0x353   : > { %v1310_v9 = vpop.f32.mrf.mxu2 }
 0x354   : > { %v1311_v2 = vadd.f32 %v1310_v9, %v6343_v32  ;;  %v1479_v25 = vpop.f32.mrf.mxu3 }
 0x355   : > { %v1480_v13 = vadd.f32 %v1479_v25, %v6347_v0  ;;  %v2415_v59 = vpop.f32.mrf.mxu0  ;;  %v8762_v25 = vld [vmem:[#allocation62_spill] sm:$0xff] }
 0x356   : > { %v1712_v55 = vmax.f32 %v1311_v2, 0.0  ;;  %v2416_v35 = vadd.f32 %v2415_v59, %v6389_v40  ;;  %v2584_v6 = vpop.f32.mrf.mxu1  ;;  %2979 = vmatpush.bf16.msra.mxu0 %v4753_v23  ;;  %3148 = vmatpush.bf16.msra.mxu1 %v4817_v21 }
 0x357   : > { %v1713_v47 = vmax.f32 %v1480_v13, 0.0 }
 0x358   : > { %v7087_v9 = vadd.f32 %v2584_v6, %v2416_v35  ;;  %2454 = vmatmul.bf16.gmra.mxu0 %v8759_v44  ;;  %2642 = vmatmul.bf16.vlgmr.msra.gmra.mxu2 %v8760_v58  ;;  %v7091_v52 = vpack.c.bf16 %v1712_v55, %v1708_v8 }
 0x359   : > { %2623 = vmatmul.bf16.gmra.mxu1 %v8762_v25  ;;  %2811 = vmatmul.bf16.vlgmr.msra.gmra.mxu3 %v8763_v34  ;;  %v7095_v27 = vpack.c.bf16 %v1713_v47, %v1709_v3 }
 0x35a   : > { %8758 = vst [vmem:[#allocation143_spill] sm:$0xff] %v7087_v9 }
 0x35b   : > { %8761 = vst [vmem:[#allocation144_spill] sm:$0xff] %v7091_v52  ;;  %v1313_v2 = vpop.f32.mrf.mxu2 }
 0x35c   : > { %8764 = vst [vmem:[#allocation145_spill] sm:$0xff] %v7095_v27  ;;  %v1482_v17 = vpop.f32.mrf.mxu3  ;;  %v1314_v6 = vadd.f32 %v1313_v2, %v6343_v32 }
 0x35d   : > { %v2417_v23 = vpop.f32.mrf.mxu0  ;;  %v1483_v59 = vadd.f32 %v1482_v17, %v6347_v0  ;;  %v8769_v17 = vld [vmem:[#allocation65_spill] sm:$0xff] }
 0x35e   : > { %v2418_v7 = vadd.f32 %v2417_v23, %v6389_v40  ;;  %v2586_v13 = vpop.f32.mrf.mxu1  ;;  %v1716_v47 = vmax.f32 %v1314_v6, 0.0 }
 0x35f   : > { %v1717_v23 = vmax.f32 %v1483_v59, 0.0 }
 0x360   : > { %v7098_v35 = vadd.f32 %v2586_v13, %v2418_v7  ;;  %v8767_v13 = vld [vmem:[#allocation64_spill] sm:$0xff] }
 0x362   : > { %8765 = vst [vmem:[#allocation146_spill] sm:$0xff] %v7098_v35 }
 0x363   : > { %v1315_v55 = vpop.f32.mrf.mxu2 }
 0x364   : > { %v1316_v21 = vadd.f32 %v1315_v55, %v6343_v32  ;;  %v1484_v8 = vpop.f32.mrf.mxu3 }
 0x365   : > { %v1485_v34 = vadd.f32 %v1484_v8, %v6347_v0  ;;  %v2420_v3 = vpop.f32.mrf.mxu0 }
 0x366   : > { %v1720_v25 = vmax.f32 %v1316_v21, 0.0  ;;  %v2421_v58 = vadd.f32 %v2420_v3, %v6389_v40  ;;  %v2589_v44 = vpop.f32.mrf.mxu1 }
 0x367   : > { %v1721_v9 = vmax.f32 %v1485_v34, 0.0 }
 0x368   : > { %v7105_v7 = vadd.f32 %v2589_v44, %v2421_v58  ;;  %2459 = vmatmul.bf16.gmra.mxu0 %v8767_v13  ;;  %2647 = vmatmul.bf16.gmra.mxu2 %v6408_v63  ;;  %v7109_v2 = vpack.c.bf16 %v1720_v25, %v1716_v47 }
 0x369   : > { %2628 = vmatmul.bf16.gmra.mxu1 %v8769_v17  ;;  %2816 = vmatmul.bf16.gmra.mxu3 %v6413_v48  ;;  %v7113_v55 = vpack.c.bf16 %v1721_v9, %v1717_v23 }
 0x36a   : > { %8766 = vst [vmem:[#allocation147_spill] sm:$0xff] %v7105_v7 }
 0x36b   : > { %8768 = vst [vmem:[#allocation148_spill] sm:$0xff] %v7109_v2  ;;  %v1318_v6 = vpop.f32.mrf.mxu2 }
 0x36c   : > { %8770 = vst [vmem:[#allocation149_spill] sm:$0xff] %v7113_v55  ;;  %v1487_v21 = vpop.f32.mrf.mxu3  ;;  %v1319_v58 = vadd.f32 %v1318_v6, %v6343_v32  ;;  %v8773_v6 = vld [vmem:[#allocation12_spill] sm:$0xff] }
 0x36d   : > { %v2422_v8 = vpop.f32.mrf.mxu0  ;;  %v1488_v3 = vadd.f32 %v1487_v21, %v6347_v0 }
 0x36e   : > { %v2423_v59 = vadd.f32 %v2422_v8, %v6389_v40  ;;  %v2591_v34 = vpop.f32.mrf.mxu1  ;;  %v1724_v23 = vmax.f32 %v1319_v58, 0.0 }
 0x36f   : > { %v1725_v8 = vmax.f32 %v1488_v3, 0.0 }
 0x370   : > { %v7116_v44 = vadd.f32 %v2591_v34, %v2423_v59  ;;  %v8775_v34 = vld [vmem:[#allocation13_spill] sm:$0xff] }
 0x372   : > { %8771 = vst [vmem:[#allocation150_spill] sm:$0xff] %v7116_v44 }
 0x373   : > { %v1320_v25 = vpop.f32.mrf.mxu2 }
 0x374   : > { %v1321_v47 = vadd.f32 %v1320_v25, %v6343_v32  ;;  %v1489_v17 = vpop.f32.mrf.mxu3 }
 0x375   : > { %v1490_v48 = vadd.f32 %v1489_v17, %v6347_v0  ;;  %v2425_v9 = vpop.f32.mrf.mxu0 }
 0x376   : > { %v1728_v63 = vmax.f32 %v1321_v47, 0.0  ;;  %v2426_v13 = vadd.f32 %v2425_v9, %v6389_v40  ;;  %v2594_v7 = vpop.f32.mrf.mxu1 }
 0x377   : > { %v1729_v35 = vmax.f32 %v1490_v48, 0.0 }
 0x378   : > { %v7123_v59 = vadd.f32 %v2594_v7, %v2426_v13  ;;  %2652 = vmatmul.bf16.gmra.mxu2 %v6440_v39  ;;  %2980 = vmatmul.bf16.vlgmr.msra.gmra.mxu0 %v8773_v6  ;;  %v7127_v21 = vpack.c.bf16 %v1728_v63, %v1724_v23 }
 0x379   : > { %2821 = vmatmul.bf16.gmra.mxu3 %v6445_v54  ;;  %3149 = vmatmul.bf16.vlgmr.msra.gmra.mxu1 %v8775_v34  ;;  %v7131_v17 = vpack.c.bf16 %v1729_v35, %v1725_v8 }
 0x37a   : > { %8772 = vst [vmem:[#allocation151_spill] sm:$0xff] %v7123_v59 }
 0x37b   : > { %8774 = vst [vmem:[#allocation12_spill] sm:$0xff] %v7127_v21  ;;  %v1323_v58 = vpop.f32.mrf.mxu2 }
 0x37c   : > { %8776 = vst [vmem:[#allocation13_spill] sm:$0xff] %v7131_v17  ;;  %v1492_v25 = vpop.f32.mrf.mxu3  ;;  %v1324_v13 = vadd.f32 %v1323_v58, %v6343_v32  ;;  %v8779_v58 = vld [vmem:[#allocation32_spill] sm:$0xff] }
 0x37d   : > { %v2427_v47 = vpop.f32.mrf.mxu0  ;;  %v1493_v9 = vadd.f32 %v1492_v25, %v6347_v0 }
 0x37e   : > { %v2428_v3 = vadd.f32 %v2427_v47, %v6389_v40  ;;  %v2596_v48 = vpop.f32.mrf.mxu1  ;;  %v1732_v8 = vmax.f32 %v1324_v13, 0.0 }
 0x37f   : > { %v1733_v47 = vmax.f32 %v1493_v9, 0.0 }
 0x380   : > { %v7134_v7 = vadd.f32 %v2596_v48, %v2428_v3  ;;  %v8781_v48 = vld [vmem:[#allocation33_spill] sm:$0xff] }
 0x382   : > { %8777 = vst [vmem:[#allocation152_spill] sm:$0xff] %v7134_v7 }
 0x383   : > { %v1325_v63 = vpop.f32.mrf.mxu2 }
 0x384   : > { %v1326_v23 = vadd.f32 %v1325_v63, %v6343_v32  ;;  %v1494_v6 = vpop.f32.mrf.mxu3 }
 0x385   : > { %v1495_v34 = vadd.f32 %v1494_v6, %v6347_v0  ;;  %v2430_v35 = vpop.f32.mrf.mxu0 }
 0x386   : > { %v1736_v54 = vmax.f32 %v1326_v23, 0.0  ;;  %v2431_v39 = vadd.f32 %v2430_v35, %v6389_v40  ;;  %v2599_v59 = vpop.f32.mrf.mxu1 }
 0x387   : > { %v1737_v44 = vmax.f32 %v1495_v34, 0.0 }
 0x388   : > { %v7141_v3 = vadd.f32 %v2599_v59, %v2431_v39  ;;  %2657 = vmatmul.bf16.gmra.mxu2 %v6472_v20  ;;  %2985 = vmatmul.bf16.gmra.mxu0 %v8779_v58  ;;  %v7145_v25 = vpack.c.bf16 %v1736_v54, %v1732_v8 }
 0x389   : > { %2826 = vmatmul.bf16.gmra.mxu3 %v6477_v31  ;;  %3154 = vmatmul.bf16.gmra.mxu1 %v8781_v48  ;;  %v7149_v63 = vpack.c.bf16 %v1737_v44, %v1733_v47 }
 0x38a   : > { %8778 = vst [vmem:[#allocation153_spill] sm:$0xff] %v7141_v3 }
 0x38b   : > { %8780 = vst [vmem:[#allocation32_spill] sm:$0xff] %v7145_v25  ;;  %v1328_v13 = vpop.f32.mrf.mxu2 }
 0x38c   : > { %8782 = vst [vmem:[#allocation33_spill] sm:$0xff] %v7149_v63  ;;  %v1497_v23 = vpop.f32.mrf.mxu3  ;;  %v1329_v59 = vadd.f32 %v1328_v13, %v6343_v32  ;;  %v8785_v13 = vld [vmem:[#allocation36_spill] sm:$0xff] }
 0x38d   : > { %v2432_v6 = vpop.f32.mrf.mxu0  ;;  %v1498_v35 = vadd.f32 %v1497_v23, %v6347_v0 }
 0x38e   : > { %v2433_v9 = vadd.f32 %v2432_v6, %v6389_v40  ;;  %v2601_v34 = vpop.f32.mrf.mxu1  ;;  %v1740_v47 = vmax.f32 %v1329_v59, 0.0 }
 0x38f   : > { %v1741_v6 = vmax.f32 %v1498_v35, 0.0 }
 0x390   : > { %v7152_v39 = vadd.f32 %v2601_v34, %v2433_v9  ;;  %v8787_v34 = vld [vmem:[#allocation37_spill] sm:$0xff] }
 0x392   : > { %8783 = vst [vmem:[#allocation154_spill] sm:$0xff] %v7152_v39 }
 0x393   : > { %v1330_v54 = vpop.f32.mrf.mxu2 }
 0x394   : > { %v1331_v8 = vadd.f32 %v1330_v54, %v6343_v32  ;;  %v1499_v58 = vpop.f32.mrf.mxu3 }
 0x395   : > { %v1500_v48 = vadd.f32 %v1499_v58, %v6347_v0  ;;  %v2435_v44 = vpop.f32.mrf.mxu0 }
 0x396   : > { %v1744_v31 = vmax.f32 %v1331_v8, 0.0  ;;  %v2436_v20 = vadd.f32 %v2435_v44, %v6389_v40  ;;  %v2604_v3 = vpop.f32.mrf.mxu1 }
 0x397   : > { %v1745_v7 = vmax.f32 %v1500_v48, 0.0 }
 0x398   : > { %v7159_v9 = vadd.f32 %v2604_v3, %v2436_v20  ;;  %2662 = vmatmul.bf16.gmra.mxu2 %v6504_v22  ;;  %2990 = vmatmul.bf16.gmra.mxu0 %v8785_v13  ;;  %v7163_v23 = vpack.c.bf16 %v1744_v31, %v1740_v47 }
 0x399   : > { %2831 = vmatmul.bf16.gmra.mxu3 %v6509_v30  ;;  %3159 = vmatmul.bf16.gmra.mxu1 %v8787_v34  ;;  %v7167_v54 = vpack.c.bf16 %v1745_v7, %v1741_v6 }
 0x39a   : > { %8784 = vst [vmem:[#allocation155_spill] sm:$0xff] %v7159_v9 }
 0x39b   : > { %8786 = vst [vmem:[#allocation36_spill] sm:$0xff] %v7163_v23  ;;  %v1333_v59 = vpop.f32.mrf.mxu2 }
 0x39c   : > { %8788 = vst [vmem:[#allocation37_spill] sm:$0xff] %v7167_v54  ;;  %v1502_v8 = vpop.f32.mrf.mxu3  ;;  %v1334_v3 = vadd.f32 %v1333_v59, %v6343_v32  ;;  %v8791_v59 = vld [vmem:[#allocation40_spill] sm:$0xff] }
 0x39d   : > { %v2437_v58 = vpop.f32.mrf.mxu0  ;;  %v1503_v44 = vadd.f32 %v1502_v8, %v6347_v0 }
 0x39e   : > { %v2438_v35 = vadd.f32 %v2437_v58, %v6389_v40  ;;  %v2606_v48 = vpop.f32.mrf.mxu1  ;;  %v1748_v6 = vmax.f32 %v1334_v3, 0.0 }
 0x39f   : > { %v1749_v58 = vmax.f32 %v1503_v44, 0.0 }
 0x3a0   : > { %v7170_v20 = vadd.f32 %v2606_v48, %v2438_v35  ;;  %v8793_v48 = vld [vmem:[#allocation41_spill] sm:$0xff] }
 0x3a2   : > { %8789 = vst [vmem:[#allocation156_spill] sm:$0xff] %v7170_v20 }
 0x3a3   : > { %v1335_v31 = vpop.f32.mrf.mxu2 }
 0x3a4   : > { %v1336_v47 = vadd.f32 %v1335_v31, %v6343_v32  ;;  %v1504_v13 = vpop.f32.mrf.mxu3 }
 0x3a5   : > { %v1505_v34 = vadd.f32 %v1504_v13, %v6347_v0  ;;  %v2440_v7 = vpop.f32.mrf.mxu0 }
 0x3a6   : > { %v1752_v30 = vmax.f32 %v1336_v47, 0.0  ;;  %v2441_v22 = vadd.f32 %v2440_v7, %v6389_v40  ;;  %v2609_v9 = vpop.f32.mrf.mxu1 }
 0x3a7   : > { %v1753_v39 = vmax.f32 %v1505_v34, 0.0 }
 0x3a8   : > { %v7177_v35 = vadd.f32 %v2609_v9, %v2441_v22  ;;  %2667 = vmatmul.bf16.gmra.mxu2 %v6536_v5  ;;  %2995 = vmatmul.bf16.gmra.mxu0 %v8791_v59  ;;  %v7181_v8 = vpack.c.bf16 %v1752_v30, %v1748_v6 }
 0x3a9   : > { %2836 = vmatmul.bf16.gmra.mxu3 %v6541_v37  ;;  %3164 = vmatmul.bf16.gmra.mxu1 %v8793_v48  ;;  %v7185_v31 = vpack.c.bf16 %v1753_v39, %v1749_v58 }
 0x3aa   : > { %8790 = vst [vmem:[#allocation157_spill] sm:$0xff] %v7177_v35 }
 0x3ab   : > { %8792 = vst [vmem:[#allocation40_spill] sm:$0xff] %v7181_v8  ;;  %v1338_v3 = vpop.f32.mrf.mxu2 }
 0x3ac   : > { %8794 = vst [vmem:[#allocation41_spill] sm:$0xff] %v7185_v31  ;;  %v1507_v47 = vpop.f32.mrf.mxu3  ;;  %v1339_v9 = vadd.f32 %v1338_v3, %v6343_v32  ;;  %v8797_v3 = vld [vmem:[#allocation44_spill] sm:$0xff] }
 0x3ad   : > { %v2442_v13 = vpop.f32.mrf.mxu0  ;;  %v1508_v7 = vadd.f32 %v1507_v47, %v6347_v0 }
 0x3ae   : > { %v2443_v44 = vadd.f32 %v2442_v13, %v6389_v40  ;;  %v2611_v34 = vpop.f32.mrf.mxu1  ;;  %v1756_v58 = vmax.f32 %v1339_v9, 0.0 }
 0x3af   : > { %v1757_v13 = vmax.f32 %v1508_v7, 0.0 }
 0x3b0   : > { %v7188_v22 = vadd.f32 %v2611_v34, %v2443_v44  ;;  %v8799_v34 = vld [vmem:[#allocation45_spill] sm:$0xff] }
 0x3b2   : > { %8795 = vst [vmem:[#allocation158_spill] sm:$0xff] %v7188_v22 }
 0x3b3   : > { %v1340_v30 = vpop.f32.mrf.mxu2 }
 0x3b4   : > { %v1341_v6 = vadd.f32 %v1340_v30, %v6343_v32  ;;  %v1509_v59 = vpop.f32.mrf.mxu3 }
 0x3b5   : > { %v1510_v48 = vadd.f32 %v1509_v59, %v6347_v0  ;;  %v2445_v39 = vpop.f32.mrf.mxu0 }
 0x3b6   : > { %v1760_v37 = vmax.f32 %v1341_v6, 0.0  ;;  %v2446_v5 = vadd.f32 %v2445_v39, %v6389_v40  ;;  %v2614_v35 = vpop.f32.mrf.mxu1 }
 0x3b7   : > { %v1761_v20 = vmax.f32 %v1510_v48, 0.0 }
 0x3b8   : > { %v7195_v44 = vadd.f32 %v2614_v35, %v2446_v5  ;;  %2672 = vmatmul.bf16.gmra.mxu2 %v6560_v56  ;;  %3000 = vmatmul.bf16.gmra.mxu0 %v8797_v3  ;;  %v7199_v47 = vpack.c.bf16 %v1760_v37, %v1756_v58 }
 0x3b9   : > { %2841 = vmatmul.bf16.gmra.mxu3 %v6565_v62  ;;  %3169 = vmatmul.bf16.gmra.mxu1 %v8799_v34  ;;  %v7203_v30 = vpack.c.bf16 %v1761_v20, %v1757_v13 }
 0x3ba   : > { %8796 = vst [vmem:[#allocation159_spill] sm:$0xff] %v7195_v44 }
 0x3bb   : > { %8798 = vst [vmem:[#allocation44_spill] sm:$0xff] %v7199_v47  ;;  %v1343_v9 = vpop.f32.mrf.mxu2 }
 0x3bc   : > { %8800 = vst [vmem:[#allocation45_spill] sm:$0xff] %v7203_v30  ;;  %v1512_v6 = vpop.f32.mrf.mxu3  ;;  %v1344_v35 = vadd.f32 %v1343_v9, %v6343_v32  ;;  %v8803_v9 = vld [vmem:[#allocation48_spill] sm:$0xff] }
 0x3bd   : > { %v2447_v59 = vpop.f32.mrf.mxu0  ;;  %v1513_v39 = vadd.f32 %v1512_v6, %v6347_v0 }
 0x3be   : > { %v2448_v7 = vadd.f32 %v2447_v59, %v6389_v40  ;;  %v2616_v48 = vpop.f32.mrf.mxu1  ;;  %v1764_v13 = vmax.f32 %v1344_v35, 0.0 }
 0x3bf   : > { %v1765_v59 = vmax.f32 %v1513_v39, 0.0 }
 0x3c0   : > { %v7206_v5 = vadd.f32 %v2616_v48, %v2448_v7  ;;  %v8805_v48 = vld [vmem:[#allocation49_spill] sm:$0xff] }
 0x3c2   : > { %8801 = vst [vmem:[#allocation160_spill] sm:$0xff] %v7206_v5 }
 0x3c3   : > { %v1345_v37 = vpop.f32.mrf.mxu2 }
 0x3c4   : > { %v1346_v58 = vadd.f32 %v1345_v37, %v6343_v32  ;;  %v1514_v3 = vpop.f32.mrf.mxu3 }
 0x3c5   : > { %v1515_v34 = vadd.f32 %v1514_v3, %v6347_v0  ;;  %v2450_v20 = vpop.f32.mrf.mxu0 }
 0x3c6   : > { %v1768_v62 = vmax.f32 %v1346_v58, 0.0  ;;  %v2451_v56 = vadd.f32 %v2450_v20, %v6389_v40  ;;  %v2619_v44 = vpop.f32.mrf.mxu1 }
 0x3c7   : > { %v1769_v22 = vmax.f32 %v1515_v34, 0.0 }
 0x3c8   : > { %v7213_v7 = vadd.f32 %v2619_v44, %v2451_v56  ;;  %2677 = vmatmul.bf16.gmra.mxu2 %v6580_v10  ;;  %3005 = vmatmul.bf16.gmra.mxu0 %v8803_v9  ;;  %v7217_v6 = vpack.c.bf16 %v1768_v62, %v1764_v13 }
 0x3c9   : > { %2846 = vmatmul.bf16.gmra.mxu3 %v6585_v53  ;;  %3174 = vmatmul.bf16.gmra.mxu1 %v8805_v48  ;;  %v7221_v37 = vpack.c.bf16 %v1769_v22, %v1765_v59 }
 0x3ca   : > { %8802 = vst [vmem:[#allocation161_spill] sm:$0xff] %v7213_v7 }
 0x3cb   : > { %8804 = vst [vmem:[#allocation48_spill] sm:$0xff] %v7217_v6  ;;  %v1348_v35 = vpop.f32.mrf.mxu2 }
 0x3cc   : > { %8806 = vst [vmem:[#allocation49_spill] sm:$0xff] %v7221_v37  ;;  %v1517_v58 = vpop.f32.mrf.mxu3  ;;  %v1349_v44 = vadd.f32 %v1348_v35, %v6343_v32  ;;  %v8807_v35 = vld [vmem:[#allocation52_spill] sm:$0xff] }
 0x3cd   : > { %v2452_v3 = vpop.f32.mrf.mxu0  ;;  %v1518_v20 = vadd.f32 %v1517_v58, %v6347_v0 }
 0x3ce   : > { %v2453_v39 = vadd.f32 %v2452_v3, %v6389_v40  ;;  %v2621_v34 = vpop.f32.mrf.mxu1  ;;  %v1772_v59 = vmax.f32 %v1349_v44, 0.0 }
 0x3cf   : > { %v1773_v3 = vmax.f32 %v1518_v20, 0.0 }
 0x3d0   : > { %v7224_v56 = vadd.f32 %v2621_v34, %v2453_v39 }
 0x3d3   : > { %v1350_v62 = vpop.f32.mrf.mxu2 }
 0x3d4   : > { %v1351_v13 = vadd.f32 %v1350_v62, %v6343_v32  ;;  %v1519_v9 = vpop.f32.mrf.mxu3  ;;  %v8809_v32 = vld [vmem:[#allocation53_spill] sm:$0xff] }
 0x3d5   : > { %v1520_v48 = vadd.f32 %v1519_v9, %v6347_v0  ;;  %v2455_v22 = vpop.f32.mrf.mxu0 }
 0x3d6   : > { %v1776_v53 = vmax.f32 %v1351_v13, 0.0  ;;  %v2456_v10 = vadd.f32 %v2455_v22, %v6389_v40  ;;  %v2624_v7 = vpop.f32.mrf.mxu1 }
 0x3d7   : > { %v1777_v5 = vmax.f32 %v1520_v48, 0.0 }
 0x3d8   : > { %v7231_v39 = vadd.f32 %v2624_v7, %v2456_v10  ;;  %2682 = vmatmul.bf16.gmra.mxu2 %v6600_v4  ;;  %3010 = vmatmul.bf16.gmra.mxu0 %v8807_v35  ;;  %v7235_v58 = vpack.c.bf16 %v1776_v53, %v1772_v59 }
 0x3d9   : > { %2851 = vmatmul.bf16.gmra.mxu3 %v6605_v42  ;;  %3179 = vmatmul.bf16.gmra.mxu1 %v8809_v32  ;;  %v7239_v0 = vpack.c.bf16 %v1777_v5, %v1773_v3 }
 0x3da   : > { %8808 = vst [vmem:[#allocation52_spill] sm:$0xff] %v7235_v58 }
 0x3db   : > { %8810 = vst [vmem:[#allocation53_spill] sm:$0xff] %v7239_v0  ;;  %v2643_v34 = vpop.f32.mrf.mxu2 }
 0x3dc   : > { %v2644_v44 = vadd.f32 %v2643_v34, %v6403_v43  ;;  %v2812_v62 = vpop.f32.mrf.mxu3  ;;  %v8811_v34 = vld [vmem:[#allocation56_spill] sm:$0xff] }
 0x3dd   : > { %v2457_v20 = vpop.f32.mrf.mxu0 }
 0x3de   : > { %v2813_v13 = vadd.f32 %v2812_v62, %v2644_v44  ;;  %v2458_v10 = vadd.f32 %v2457_v20, %v6389_v40  ;;  %v2626_v7 = vpop.f32.mrf.mxu1  ;;  %v8812_v44 = vld [vmem:[#allocation57_spill] sm:$0xff] }
 0x3e0   : > { %v7243_v9 = vadd.f32 %v2626_v7, %v2458_v10  ;;  %v3648_v32 = vmax.f32 %v2813_v13, 0.0 }
 0x3e3   : > { %v2645_v48 = vpop.f32.mrf.mxu2 }
 0x3e4   : > { %v2646_v53 = vadd.f32 %v2645_v48, %v6420_v1  ;;  %v2814_v22 = vpop.f32.mrf.mxu3 }
 0x3e5   : > { %v2460_v59 = vpop.f32.mrf.mxu0 }
 0x3e6   : > { %v2815_v35 = vadd.f32 %v2814_v22, %v2646_v53  ;;  %v2461_v5 = vadd.f32 %v2460_v59, %v6389_v40  ;;  %v2629_v3 = vpop.f32.mrf.mxu1  ;;  %v5214_v59 = vld [vmem:[%s8424_s4] sm:$0x3] }
 0x3e8   : > { %v3650_v42 = vmax.f32 %v2815_v35, 0.0  ;;  %v7247_v43 = vadd.f32 %v2629_v3, %v2461_v5  ;;  %2687 = vmatmul.bf16.gmra.mxu2 %v6620_v45  ;;  %3015 = vmatmul.bf16.gmra.mxu0 %v8811_v34  ;;  %v7262_v35 = vperm.slane %v5214_v59, 1 }
 0x3e9   : > { %2856 = vmatmul.bf16.gmra.mxu3 %v6625_v26  ;;  %3184 = vmatmul.bf16.gmra.mxu1 %v8812_v44 }
 0x3ea   : > { %v7253_v62 = vpack.c.bf16 %v3650_v42, %v3648_v32 }
 0x3eb   : > { %v2648_v1 = vpop.f32.mrf.mxu2 }
 0x3ec   : > { %v2649_v20 = vadd.f32 %v2648_v1, %v6435_v24  ;;  %v2817_v10 = vpop.f32.mrf.mxu3 }
 0x3ed   : > { %v2462_v7 = vpop.f32.mrf.mxu0 }
 0x3ee   : > { %v2818_v48 = vadd.f32 %v2817_v10, %v2649_v20  ;;  %v2463_v13 = vadd.f32 %v2462_v7, %v6389_v40  ;;  %v2631_v53 = vpop.f32.mrf.mxu1  ;;  %v8813_v10 = vld [vmem:[#allocation60_spill] sm:$0xff] }
 0x3f0   : > { %v7257_v22 = vadd.f32 %v2631_v53, %v2463_v13  ;;  %v3652_v1 = vmax.f32 %v2818_v48, 0.0 }
 0x3f3   : > { %v2650_v5 = vpop.f32.mrf.mxu2 }
 0x3f4   : > { %v2651_v42 = vadd.f32 %v2650_v5, %v6452_v12  ;;  %v2819_v3 = vpop.f32.mrf.mxu3 }
 0x3f5   : > { %v2981_v32 = vpop.f32.mrf.mxu0 }
 0x3f6   : > { %v2820_v24 = vadd.f32 %v2819_v3, %v2651_v42  ;;  %v2982_v34 = vadd.f32 %v2981_v32, %v7262_v35  ;;  %v3150_v44 = vpop.f32.mrf.mxu1 }
 0x3f8   : > { %v3654_v40 = vmax.f32 %v2820_v24, 0.0  ;;  %v7266_v20 = vadd.f32 %v3150_v44, %v2982_v34  ;;  %2692 = vmatmul.bf16.gmra.mxu2 %v6640_v33  ;;  %3020 = vmatmul.bf16.gmra.mxu0 %v6270_v41 }
 0x3f9   : > { %2861 = vmatmul.bf16.gmra.mxu3 %v6645_v57  ;;  %3189 = vmatmul.bf16.gmra.mxu1 %v8813_v10 }
 0x3fa   : > { %v7272_v7 = vpack.c.bf16 %v3654_v40, %v3652_v1 }
 0x3fb   : > { %v2653_v12 = vpop.f32.mrf.mxu2 }
 0x3fc   : > { %v2654_v13 = vadd.f32 %v2653_v12, %v6467_v60  ;;  %v2822_v53 = vpop.f32.mrf.mxu3  ;;  %v8814_v12 = vld [vmem:[#allocation63_spill] sm:$0xff] }
 0x3fd   : > { %v2983_v59 = vpop.f32.mrf.mxu0 }
 0x3fe   : > { %v2823_v5 = vadd.f32 %v2822_v53, %v2654_v13  ;;  %v2984_v48 = vadd.f32 %v2983_v59, %v7262_v35  ;;  %v3152_v42 = vpop.f32.mrf.mxu1 }
 0x400   : > { %v7276_v3 = vadd.f32 %v3152_v42, %v2984_v48  ;;  %v3656_v10 = vmax.f32 %v2823_v5, 0.0 }
 0x403   : > { %v2655_v32 = vpop.f32.mrf.mxu2 }
 0x404   : > { %v2656_v41 = vadd.f32 %v2655_v32, %v6484_v19  ;;  %v2824_v24 = vpop.f32.mrf.mxu3 }
 0x405   : > { %v2986_v34 = vpop.f32.mrf.mxu0 }
 0x406   : > { %v2825_v44 = vadd.f32 %v2824_v24, %v2656_v41  ;;  %v2987_v1 = vadd.f32 %v2986_v34, %v7262_v35  ;;  %v3155_v40 = vpop.f32.mrf.mxu1 }
 0x408   : > { %v3658_v57 = vmax.f32 %v2825_v44, 0.0  ;;  %v7280_v60 = vadd.f32 %v3155_v40, %v2987_v1  ;;  %2697 = vmatmul.bf16.gmra.mxu2 %v6660_v36  ;;  %3025 = vmatmul.bf16.gmra.mxu0 %v6304_v18 }
 0x409   : > { %2866 = vmatmul.bf16.gmra.mxu3 %v6665_v50  ;;  %3194 = vmatmul.bf16.gmra.mxu1 %v8814_v12 }
 0x40a   : > { %v7286_v13 = vpack.c.bf16 %v3658_v57, %v3656_v10 }
 0x40b   : > { %v2658_v19 = vpop.f32.mrf.mxu2 }
 0x40c   : > { %v2659_v53 = vadd.f32 %v2658_v19, %v6499_v61  ;;  %v2827_v59 = vpop.f32.mrf.mxu3  ;;  %v8816_v19 = vld [vmem:[#allocation66_spill] sm:$0xff] }
 0x40d   : > { %v2988_v48 = vpop.f32.mrf.mxu0 }
 0x40e   : > { %v2828_v42 = vadd.f32 %v2827_v59, %v2659_v53  ;;  %v2989_v5 = vadd.f32 %v2988_v48, %v7262_v35  ;;  %v3157_v32 = vpop.f32.mrf.mxu1 }
 0x410   : > { %v7290_v41 = vadd.f32 %v3157_v32, %v2989_v5  ;;  %v3660_v10 = vmax.f32 %v2828_v42, 0.0 }
 0x413   : > { %v2660_v24 = vpop.f32.mrf.mxu2 }
 0x414   : > { %v2661_v18 = vadd.f32 %v2660_v24, %v6516_v16  ;;  %v2829_v34 = vpop.f32.mrf.mxu3 }
 0x415   : > { %v2991_v44 = vpop.f32.mrf.mxu0 }
 0x416   : > { %v2830_v1 = vadd.f32 %v2829_v34, %v2661_v18  ;;  %v2992_v57 = vadd.f32 %v2991_v44, %v7262_v35  ;;  %v3160_v40 = vpop.f32.mrf.mxu1 }
 0x418   : > { %v3662_v12 = vmax.f32 %v2830_v1, 0.0  ;;  %v7294_v61 = vadd.f32 %v3160_v40, %v2992_v57  ;;  %2702 = vmatmul.bf16.gmra.mxu2 %v6680_v29  ;;  %3030 = vmatmul.bf16.gmra.mxu0 %v6338_v15 }
 0x419   : > { %2871 = vmatmul.bf16.gmra.mxu3 %v6685_v14  ;;  %3199 = vmatmul.bf16.gmra.mxu1 %v8816_v19 }
 0x41a   : > { %8815 = vst [vmem:[#allocation56_spill] sm:$0xff] %v7294_v61  ;;  %v7300_v53 = vpack.c.bf16 %v3662_v12, %v3660_v10 }
 0x41b   : > { %v2663_v16 = vpop.f32.mrf.mxu2 }
 0x41c   : > { %v2664_v59 = vadd.f32 %v2663_v16, %v6531_v46  ;;  %v2832_v48 = vpop.f32.mrf.mxu3  ;;  %v8819_v16 = vld [vmem:[#allocation8_spill] sm:$0xff] }
 0x41d   : > { %v2993_v5 = vpop.f32.mrf.mxu0 }
 0x41e   : > { %v2833_v32 = vadd.f32 %v2832_v48, %v2664_v59  ;;  %v2994_v42 = vadd.f32 %v2993_v5, %v7262_v35  ;;  %v3162_v24 = vpop.f32.mrf.mxu1  ;;  %v8820_v59 = vld [vmem:[#allocation69_spill] sm:$0xff]  ;;  %v8821_v48 = vld [vmem:[#allocation114_spill] sm:$0xff] }
 0x41f   : > { %v8822_v5 = vld [vmem:[#allocation70_spill] sm:$0xff] }
 0x420   : > { %v7304_v18 = vadd.f32 %v3162_v24, %v2994_v42  ;;  %v3664_v12 = vmax.f32 %v2833_v32, 0.0  ;;  %v8823_v24 = vld [vmem:[#allocation91_spill] sm:$0xff] }
 0x422   : > { %8817 = vst [vmem:[#allocation57_spill] sm:$0xff] %v7304_v18 }
 0x423   : > { %v2665_v34 = vpop.f32.mrf.mxu2 }
 0x424   : > { %v2666_v15 = vadd.f32 %v2665_v34, %v6548_v28  ;;  %v2834_v44 = vpop.f32.mrf.mxu3 }
 0x425   : > { %v2996_v1 = vpop.f32.mrf.mxu0 }
 0x426   : > { %v2835_v57 = vadd.f32 %v2834_v44, %v2666_v15  ;;  %v2997_v40 = vadd.f32 %v2996_v1, %v7262_v35  ;;  %v3165_v10 = vpop.f32.mrf.mxu1 }
 0x428   : > { %v3666_v19 = vmax.f32 %v2835_v57, 0.0  ;;  %v7308_v46 = vadd.f32 %v3165_v10, %v2997_v40  ;;  %2707 = vmatmul.bf16.gmra.mxu2 %v8819_v16  ;;  %3035 = vmatmul.bf16.gmra.mxu0 %v8820_v59  ;;  %v8825_v16 = vld [vmem:[#allocation94_spill] sm:$0xff] }
 0x429   : > { %2876 = vmatmul.bf16.gmra.mxu3 %v8821_v48  ;;  %3204 = vmatmul.bf16.gmra.mxu1 %v8822_v5 }
 0x42a   : > { %8818 = vst [vmem:[#allocation60_spill] sm:$0xff] %v7308_v46  ;;  %v7314_v42 = vpack.c.bf16 %v3666_v19, %v3664_v12 }
 0x42b   : > { %v2668_v28 = vpop.f32.mrf.mxu2 }
 0x42c   : > { %v2669_v34 = vadd.f32 %v2668_v28, %v8823_v24  ;;  %v2837_v15 = vpop.f32.mrf.mxu3  ;;  %v8827_v24 = vld [vmem:[#allocation9_spill] sm:$0xff] }
 0x42d   : > { %v2998_v44 = vpop.f32.mrf.mxu0 }
 0x42e   : > { %v2838_v1 = vadd.f32 %v2837_v15, %v2669_v34  ;;  %v2999_v32 = vadd.f32 %v2998_v44, %v7262_v35  ;;  %v3167_v57 = vpop.f32.mrf.mxu1  ;;  %v8828_v34 = vld [vmem:[#allocation73_spill] sm:$0xff]  ;;  %v8830_v44 = vld [vmem:[#allocation74_spill] sm:$0xff] }
 0x42f   : > { %v8829_v15 = vld [vmem:[#allocation117_spill] sm:$0xff] }
 0x430   : > { %v7318_v40 = vadd.f32 %v3167_v57, %v2999_v32  ;;  %v3668_v5 = vmax.f32 %v2838_v1, 0.0  ;;  %v8831_v57 = vld [vmem:[#allocation95_spill] sm:$0xff] }
 0x432   : > { %8824 = vst [vmem:[#allocation63_spill] sm:$0xff] %v7318_v40 }
 0x433   : > { %v2670_v10 = vpop.f32.mrf.mxu2 }
 0x434   : > { %v2671_v59 = vadd.f32 %v2670_v10, %v8825_v16  ;;  %v2839_v14 = vpop.f32.mrf.mxu3 }
 0x435   : > { %v3001_v48 = vpop.f32.mrf.mxu0 }
 0x436   : > { %v2840_v29 = vadd.f32 %v2839_v14, %v2671_v59  ;;  %v3002_v12 = vadd.f32 %v3001_v48, %v7262_v35  ;;  %v3170_v19 = vpop.f32.mrf.mxu1 }
 0x438   : > { %v3670_v46 = vmax.f32 %v2840_v29, 0.0  ;;  %v7322_v28 = vadd.f32 %v3170_v19, %v3002_v12  ;;  %2712 = vmatmul.bf16.gmra.mxu2 %v8827_v24  ;;  %3040 = vmatmul.bf16.gmra.mxu0 %v8828_v34  ;;  %v8833_v24 = vld [vmem:[#allocation98_spill] sm:$0xff] }
 0x439   : > { %2881 = vmatmul.bf16.gmra.mxu3 %v8829_v15  ;;  %3209 = vmatmul.bf16.gmra.mxu1 %v8830_v44 }
 0x43a   : > { %8826 = vst [vmem:[#allocation66_spill] sm:$0xff] %v7322_v28  ;;  %v7328_v32 = vpack.c.bf16 %v3670_v46, %v3668_v5 }
 0x43b   : > { %v2673_v16 = vpop.f32.mrf.mxu2 }
 0x43c   : > { %v2674_v14 = vadd.f32 %v2673_v16, %v8831_v57  ;;  %v2842_v10 = vpop.f32.mrf.mxu3  ;;  %v8835_v57 = vld [vmem:[#allocation10_spill] sm:$0xff] }
 0x43d   : > { %v3003_v48 = vpop.f32.mrf.mxu0 }
 0x43e   : > { %v2843_v59 = vadd.f32 %v2842_v10, %v2674_v14  ;;  %v3004_v29 = vadd.f32 %v3003_v48, %v7262_v35  ;;  %v3172_v1 = vpop.f32.mrf.mxu1  ;;  %v8836_v14 = vld [vmem:[#allocation77_spill] sm:$0xff]  ;;  %v8837_v10 = vld [vmem:[#allocation120_spill] sm:$0xff]  ;;  %v8838_v48 = vld [vmem:[#allocation78_spill] sm:$0xff] }
 0x440   : > { %v7332_v12 = vadd.f32 %v3172_v1, %v3004_v29  ;;  %v3672_v44 = vmax.f32 %v2843_v59, 0.0  ;;  %v8839_v1 = vld [vmem:[#allocation99_spill] sm:$0xff] }
 0x442   : > { %8832 = vst [vmem:[#allocation69_spill] sm:$0xff] %v7332_v12 }
 0x443   : > { %v2675_v19 = vpop.f32.mrf.mxu2 }
 0x444   : > { %v2676_v34 = vadd.f32 %v2675_v19, %v8833_v24  ;;  %v2844_v28 = vpop.f32.mrf.mxu3 }
 0x445   : > { %v3006_v15 = vpop.f32.mrf.mxu0 }
 0x446   : > { %v2845_v40 = vadd.f32 %v2844_v28, %v2676_v34  ;;  %v3007_v46 = vadd.f32 %v3006_v15, %v7262_v35  ;;  %v3175_v5 = vpop.f32.mrf.mxu1 }
 0x448   : > { %v3674_v50 = vmax.f32 %v2845_v40, 0.0  ;;  %v7336_v16 = vadd.f32 %v3175_v5, %v3007_v46  ;;  %2717 = vmatmul.bf16.gmra.mxu2 %v8835_v57  ;;  %3045 = vmatmul.bf16.gmra.mxu0 %v8836_v14  ;;  %v8841_v57 = vld [vmem:[#allocation101_spill] sm:$0xff] }
 0x449   : > { %2886 = vmatmul.bf16.gmra.mxu3 %v8837_v10  ;;  %3214 = vmatmul.bf16.gmra.mxu1 %v8838_v48 }
 0x44a   : > { %8834 = vst [vmem:[#allocation70_spill] sm:$0xff] %v7336_v16  ;;  %v7342_v29 = vpack.c.bf16 %v3674_v50, %v3672_v44 }
 0x44b   : > { %v2678_v24 = vpop.f32.mrf.mxu2 }
 0x44c   : > { %v2679_v28 = vadd.f32 %v2678_v24, %v8839_v1  ;;  %v2847_v19 = vpop.f32.mrf.mxu3  ;;  %v8843_v1 = vld [vmem:[#allocation11_spill] sm:$0xff] }
 0x44d   : > { %v3008_v15 = vpop.f32.mrf.mxu0 }
 0x44e   : > { %v2848_v34 = vadd.f32 %v2847_v19, %v2679_v28  ;;  %v3009_v40 = vadd.f32 %v3008_v15, %v7262_v35  ;;  %v3177_v59 = vpop.f32.mrf.mxu1  ;;  %v8844_v28 = vld [vmem:[#allocation81_spill] sm:$0xff]  ;;  %v8845_v19 = vld [vmem:[#allocation123_spill] sm:$0xff]  ;;  %v8846_v15 = vld [vmem:[#allocation82_spill] sm:$0xff] }
 0x450   : > { %v7346_v46 = vadd.f32 %v3177_v59, %v3009_v40  ;;  %v3676_v48 = vmax.f32 %v2848_v34, 0.0  ;;  %v8847_v59 = vld [vmem:[#allocation102_spill] sm:$0xff] }
 0x452   : > { %8840 = vst [vmem:[#allocation91_spill] sm:$0xff] %v7346_v46 }
 0x453   : > { %v2680_v5 = vpop.f32.mrf.mxu2 }
 0x454   : > { %v2681_v14 = vadd.f32 %v2680_v5, %v8841_v57  ;;  %v2849_v16 = vpop.f32.mrf.mxu3 }
 0x455   : > { %v3011_v10 = vpop.f32.mrf.mxu0 }
 0x456   : > { %v2850_v12 = vadd.f32 %v2849_v16, %v2681_v14  ;;  %v3012_v50 = vadd.f32 %v3011_v10, %v7262_v35  ;;  %v3180_v44 = vpop.f32.mrf.mxu1 }
 0x458   : > { %v3678_v36 = vmax.f32 %v2850_v12, 0.0  ;;  %v7350_v24 = vadd.f32 %v3180_v44, %v3012_v50  ;;  %2722 = vmatmul.bf16.gmra.mxu2 %v8843_v1  ;;  %3050 = vmatmul.bf16.gmra.mxu0 %v8844_v28  ;;  %v8849_v1 = vld [vmem:[#allocation103_spill] sm:$0xff] }
 0x459   : > { %2891 = vmatmul.bf16.gmra.mxu3 %v8845_v19  ;;  %3219 = vmatmul.bf16.gmra.mxu1 %v8846_v15 }
 0x45a   : > { %8842 = vst [vmem:[#allocation94_spill] sm:$0xff] %v7350_v24  ;;  %v7356_v40 = vpack.c.bf16 %v3678_v36, %v3676_v48 }
 0x45b   : > { %v2683_v57 = vpop.f32.mrf.mxu2 }
 0x45c   : > { %v2684_v16 = vadd.f32 %v2683_v57, %v8847_v59  ;;  %v2852_v5 = vpop.f32.mrf.mxu3  ;;  %v8851_v59 = vld [vmem:[#allocation14_spill] sm:$0xff] }
 0x45d   : > { %v3013_v10 = vpop.f32.mrf.mxu0 }
 0x45e   : > { %v2853_v14 = vadd.f32 %v2852_v5, %v2684_v16  ;;  %v3014_v12 = vadd.f32 %v3013_v10, %v7262_v35  ;;  %v3182_v34 = vpop.f32.mrf.mxu1  ;;  %v8852_v16 = vld [vmem:[#allocation85_spill] sm:$0xff]  ;;  %v8853_v5 = vld [vmem:[#allocation126_spill] sm:$0xff] }
 0x45f   : > { %v8854_v10 = vld [vmem:[#allocation86_spill] sm:$0xff] }
 0x460   : > { %v7360_v50 = vadd.f32 %v3182_v34, %v3014_v12  ;;  %v3680_v15 = vmax.f32 %v2853_v14, 0.0  ;;  %v8855_v34 = vld [vmem:[#allocation104_spill] sm:$0xff] }
 0x462   : > { %8848 = vst [vmem:[#allocation73_spill] sm:$0xff] %v7360_v50 }
 0x463   : > { %v2685_v44 = vpop.f32.mrf.mxu2 }
 0x464   : > { %v2686_v28 = vadd.f32 %v2685_v44, %v8849_v1  ;;  %v2854_v24 = vpop.f32.mrf.mxu3 }
 0x465   : > { %v3016_v19 = vpop.f32.mrf.mxu0 }
 0x466   : > { %v2855_v46 = vadd.f32 %v2854_v24, %v2686_v28  ;;  %v3017_v36 = vadd.f32 %v3016_v19, %v7262_v35  ;;  %v3185_v48 = vpop.f32.mrf.mxu1 }
 0x468   : > { %v3682_v18 = vmax.f32 %v2855_v46, 0.0  ;;  %v7364_v57 = vadd.f32 %v3185_v48, %v3017_v36  ;;  %2727 = vmatmul.bf16.gmra.mxu2 %v8851_v59  ;;  %3055 = vmatmul.bf16.gmra.mxu0 %v8852_v16  ;;  %v8857_v59 = vld [vmem:[#allocation106_spill] sm:$0xff] }
 0x469   : > { %2896 = vmatmul.bf16.gmra.mxu3 %v8853_v5  ;;  %3224 = vmatmul.bf16.gmra.mxu1 %v8854_v10 }
 0x46a   : > { %8850 = vst [vmem:[#allocation74_spill] sm:$0xff] %v7364_v57  ;;  %v7370_v12 = vpack.c.bf16 %v3682_v18, %v3680_v15 }
 0x46b   : > { %v2688_v1 = vpop.f32.mrf.mxu2 }
 0x46c   : > { %v2689_v24 = vadd.f32 %v2688_v1, %v8855_v34  ;;  %v2857_v44 = vpop.f32.mrf.mxu3  ;;  %v8859_v34 = vld [vmem:[#allocation89_spill] sm:$0xff] }
 0x46d   : > { %v3018_v19 = vpop.f32.mrf.mxu0 }
 0x46e   : > { %v2858_v28 = vadd.f32 %v2857_v44, %v2689_v24  ;;  %v3019_v46 = vadd.f32 %v3018_v19, %v7262_v35  ;;  %v3187_v14 = vpop.f32.mrf.mxu1  ;;  %v8860_v24 = vld [vmem:[#allocation90_spill] sm:$0xff]  ;;  %v8861_v19 = vld [vmem:[#allocation107_spill] sm:$0xff] }
 0x470   : > { %v7374_v36 = vadd.f32 %v3187_v14, %v3019_v46  ;;  %v3684_v10 = vmax.f32 %v2858_v28, 0.0 }
 0x472   : > { %8856 = vst [vmem:[#allocation95_spill] sm:$0xff] %v7374_v36 }
 0x473   : > { %v2690_v48 = vpop.f32.mrf.mxu2 }
 0x474   : > { %v2691_v16 = vadd.f32 %v2690_v48, %v8857_v59  ;;  %v2859_v57 = vpop.f32.mrf.mxu3 }
 0x475   : > { %v3021_v5 = vpop.f32.mrf.mxu0 }
 0x476   : > { %v2860_v50 = vadd.f32 %v2859_v57, %v2691_v16  ;;  %v3022_v18 = vadd.f32 %v3021_v5, %v7262_v35  ;;  %v3190_v15 = vpop.f32.mrf.mxu1 }
 0x478   : > { %v3686_v61 = vmax.f32 %v2860_v50, 0.0  ;;  %v7378_v1 = vadd.f32 %v3190_v15, %v3022_v18  ;;  %2732 = vmatmul.bf16.gmra.mxu2 %v6812_v11  ;;  %3060 = vmatmul.bf16.gmra.mxu0 %v8859_v34  ;;  %v8863_v18 = vld [vmem:[#allocation109_spill] sm:$0xff] }
 0x479   : > { %2901 = vmatmul.bf16.gmra.mxu3 %v6817_v51  ;;  %3229 = vmatmul.bf16.gmra.mxu1 %v8860_v24 }
 0x47a   : > { %8858 = vst [vmem:[#allocation98_spill] sm:$0xff] %v7378_v1  ;;  %v7384_v44 = vpack.c.bf16 %v3686_v61, %v3684_v10 }
 0x47b   : > { %v2693_v59 = vpop.f32.mrf.mxu2 }
 0x47c   : > { %v2694_v57 = vadd.f32 %v2693_v59, %v8861_v19  ;;  %v2862_v46 = vpop.f32.mrf.mxu3  ;;  %v8865_v19 = vld [vmem:[#allocation20_spill] sm:$0xff] }
 0x47d   : > { %v3023_v5 = vpop.f32.mrf.mxu0 }
 0x47e   : > { %v2863_v14 = vadd.f32 %v2862_v46, %v2694_v57  ;;  %v3024_v50 = vadd.f32 %v3023_v5, %v7262_v35  ;;  %v3192_v28 = vpop.f32.mrf.mxu1  ;;  %v8866_v57 = vld [vmem:[#allocation15_spill] sm:$0xff]  ;;  %v8867_v46 = vld [vmem:[#allocation132_spill] sm:$0xff] }
 0x47f   : > { %v8868_v5 = vld [vmem:[#allocation16_spill] sm:$0xff] }
 0x480   : > { %v7388_v48 = vadd.f32 %v3192_v28, %v3024_v50  ;;  %v3688_v24 = vmax.f32 %v2863_v14, 0.0 }
 0x482   : > { %8862 = vst [vmem:[#allocation77_spill] sm:$0xff] %v7388_v48 }
 0x483   : > { %v2695_v16 = vpop.f32.mrf.mxu2 }
 0x484   : > { %v2696_v15 = vadd.f32 %v2695_v16, %v8863_v18  ;;  %v2864_v34 = vpop.f32.mrf.mxu3  ;;  %v8869_v16 = vld [vmem:[#allocation110_spill] sm:$0xff] }
 0x485   : > { %v3026_v51 = vpop.f32.mrf.mxu0 }
 0x486   : > { %v2865_v11 = vadd.f32 %v2864_v34, %v2696_v15  ;;  %v3027_v61 = vadd.f32 %v3026_v51, %v7262_v35  ;;  %v3195_v10 = vpop.f32.mrf.mxu1 }
 0x488   : > { %v3690_v1 = vmax.f32 %v2865_v11, 0.0  ;;  %v7392_v59 = vadd.f32 %v3195_v10, %v3027_v61  ;;  %2737 = vmatmul.bf16.gmra.mxu2 %v8865_v19  ;;  %3065 = vmatmul.bf16.gmra.mxu0 %v8866_v57  ;;  %v8871_v19 = vld [vmem:[#allocation112_spill] sm:$0xff] }
 0x489   : > { %2906 = vmatmul.bf16.gmra.mxu3 %v8867_v46  ;;  %3234 = vmatmul.bf16.gmra.mxu1 %v8868_v5 }
 0x48a   : > { %8864 = vst [vmem:[#allocation78_spill] sm:$0xff] %v7392_v59  ;;  %v7398_v50 = vpack.c.bf16 %v3690_v1, %v3688_v24 }
 0x48b   : > { %v2698_v28 = vpop.f32.mrf.mxu2 }
 0x48c   : > { %v2699_v18 = vadd.f32 %v2698_v28, %v8869_v16  ;;  %v2867_v15 = vpop.f32.mrf.mxu3  ;;  %v8873_v16 = vld [vmem:[#allocation18_spill] sm:$0xff] }
 0x48d   : > { %v3028_v51 = vpop.f32.mrf.mxu0 }
 0x48e   : > { %v2868_v34 = vadd.f32 %v2867_v15, %v2699_v18  ;;  %v3029_v11 = vadd.f32 %v3028_v51, %v7262_v35  ;;  %v3197_v14 = vpop.f32.mrf.mxu1  ;;  %v8874_v18 = vld [vmem:[#allocation135_spill] sm:$0xff] }
 0x48f   : > { %v8875_v15 = vld [vmem:[#allocation19_spill] sm:$0xff] }
 0x490   : > { %v7402_v61 = vadd.f32 %v3197_v14, %v3029_v11  ;;  %v3692_v5 = vmax.f32 %v2868_v34, 0.0  ;;  %v8876_v11 = vld [vmem:[#allocation113_spill] sm:$0xff] }
 0x492   : > { %8870 = vst [vmem:[#allocation99_spill] sm:$0xff] %v7402_v61 }
 0x493   : > { %v2700_v10 = vpop.f32.mrf.mxu2 }
 0x494   : > { %v2701_v57 = vadd.f32 %v2700_v10, %v8871_v19  ;;  %v2869_v59 = vpop.f32.mrf.mxu3 }
 0x495   : > { %v3031_v46 = vpop.f32.mrf.mxu0 }
 0x496   : > { %v2870_v48 = vadd.f32 %v2869_v59, %v2701_v57  ;;  %v3032_v1 = vadd.f32 %v3031_v46, %v7262_v35  ;;  %v3200_v24 = vpop.f32.mrf.mxu1 }
 0x498   : > { %v3694_v36 = vmax.f32 %v2870_v48, 0.0  ;;  %v7406_v28 = vadd.f32 %v3200_v24, %v3032_v1  ;;  %2742 = vmatmul.bf16.gmra.mxu2 %v6900_v38  ;;  %3070 = vmatmul.bf16.gmra.mxu0 %v8873_v16  ;;  %v8878_v24 = vld [vmem:[#allocation115_spill] sm:$0xff] }
 0x499   : > { %2911 = vmatmul.bf16.gmra.mxu3 %v8874_v18  ;;  %3239 = vmatmul.bf16.gmra.mxu1 %v8875_v15 }
 0x49a   : > { %8872 = vst [vmem:[#allocation101_spill] sm:$0xff] %v7406_v28  ;;  %v7412_v51 = vpack.c.bf16 %v3694_v36, %v3692_v5 }
 0x49b   : > { %v2703_v19 = vpop.f32.mrf.mxu2 }
 0x49c   : > { %v2704_v59 = vadd.f32 %v2703_v19, %v8876_v11  ;;  %v2872_v14 = vpop.f32.mrf.mxu3  ;;  %v8880_v11 = vld [vmem:[#allocation21_spill] sm:$0xff] }
 0x49d   : > { %v3033_v46 = vpop.f32.mrf.mxu0 }
 0x49e   : > { %v2873_v10 = vadd.f32 %v2872_v14, %v2704_v59  ;;  %v3034_v48 = vadd.f32 %v3033_v46, %v7262_v35  ;;  %v3202_v34 = vpop.f32.mrf.mxu1  ;;  %v8881_v59 = vld [vmem:[#allocation138_spill] sm:$0xff] }
 0x49f   : > { %v8882_v14 = vld [vmem:[#allocation22_spill] sm:$0xff] }
 0x4a0   : > { %v7416_v57 = vadd.f32 %v3202_v34, %v3034_v48  ;;  %v3696_v15 = vmax.f32 %v2873_v10, 0.0  ;;  %v8883_v34 = vld [vmem:[#allocation116_spill] sm:$0xff] }
 0x4a2   : > { %8877 = vst [vmem:[#allocation81_spill] sm:$0xff] %v7416_v57 }
 0x4a3   : > { %v2705_v1 = vpop.f32.mrf.mxu2 }
 0x4a4   : > { %v2706_v16 = vadd.f32 %v2705_v1, %v8878_v24  ;;  %v2874_v38 = vpop.f32.mrf.mxu3 }
 0x4a5   : > { %v3036_v18 = vpop.f32.mrf.mxu0 }
 0x4a6   : > { %v2875_v28 = vadd.f32 %v2874_v38, %v2706_v16  ;;  %v3037_v36 = vadd.f32 %v3036_v18, %v7262_v35  ;;  %v3205_v5 = vpop.f32.mrf.mxu1 }
 0x4a8   : > { %v3698_v61 = vmax.f32 %v2875_v28, 0.0  ;;  %v7420_v19 = vadd.f32 %v3205_v5, %v3037_v36  ;;  %2747 = vmatmul.bf16.gmra.mxu2 %v6968_v49  ;;  %3075 = vmatmul.bf16.gmra.mxu0 %v8880_v11  ;;  %v8885_v5 = vld [vmem:[#allocation118_spill] sm:$0xff] }
 0x4a9   : > { %2916 = vmatmul.bf16.gmra.mxu3 %v8881_v59  ;;  %3244 = vmatmul.bf16.gmra.mxu1 %v8882_v14 }
 0x4aa   : > { %8879 = vst [vmem:[#allocation82_spill] sm:$0xff] %v7420_v19  ;;  %v7426_v46 = vpack.c.bf16 %v3698_v61, %v3696_v15 }
 0x4ab   : > { %v2708_v48 = vpop.f32.mrf.mxu2 }
 0x4ac   : > { %v2709_v38 = vadd.f32 %v2708_v48, %v8883_v34  ;;  %v2877_v1 = vpop.f32.mrf.mxu3  ;;  %v8887_v34 = vld [vmem:[#allocation29_spill] sm:$0xff] }
 0x4ad   : > { %v3038_v18 = vpop.f32.mrf.mxu0 }
 0x4ae   : > { %v2878_v24 = vadd.f32 %v2877_v1, %v2709_v38  ;;  %v3039_v28 = vadd.f32 %v3038_v18, %v7262_v35  ;;  %v3207_v10 = vpop.f32.mrf.mxu1  ;;  %v8888_v38 = vld [vmem:[#allocation24_spill] sm:$0xff]  ;;  %v8889_v1 = vld [vmem:[#allocation141_spill] sm:$0xff] }
 0x4af   : > { %v8890_v18 = vld [vmem:[#allocation25_spill] sm:$0xff] }
 0x4b0   : > { %v7430_v16 = vadd.f32 %v3207_v10, %v3039_v28  ;;  %v3700_v14 = vmax.f32 %v2878_v24, 0.0 }
 0x4b2   : > { %8884 = vst [vmem:[#allocation102_spill] sm:$0xff] %v7430_v16 }
 0x4b3   : > { %v2710_v36 = vpop.f32.mrf.mxu2 }
 0x4b4   : > { %v2711_v11 = vadd.f32 %v2710_v36, %v8885_v5  ;;  %v2879_v49 = vpop.f32.mrf.mxu3  ;;  %v8892_v36 = vld [vmem:[#allocation119_spill] sm:$0xff] }
 0x4b5   : > { %v3041_v59 = vpop.f32.mrf.mxu0 }
 0x4b6   : > { %v2880_v19 = vadd.f32 %v2879_v49, %v2711_v11  ;;  %v3042_v61 = vadd.f32 %v3041_v59, %v7262_v35  ;;  %v3210_v15 = vpop.f32.mrf.mxu1 }
 0x4b8   : > { %v3702_v57 = vmax.f32 %v2880_v19, 0.0  ;;  %v7434_v48 = vadd.f32 %v3210_v15, %v3042_v61  ;;  %2752 = vmatmul.bf16.gmra.mxu2 %v8887_v34  ;;  %3080 = vmatmul.bf16.gmra.mxu0 %v8888_v38  ;;  %v8893_v34 = vld [vmem:[#allocation121_spill] sm:$0xff] }
 0x4b9   : > { %2921 = vmatmul.bf16.gmra.mxu3 %v8889_v1  ;;  %3249 = vmatmul.bf16.gmra.mxu1 %v8890_v18 }
 0x4ba   : > { %8886 = vst [vmem:[#allocation103_spill] sm:$0xff] %v7434_v48  ;;  %v7440_v28 = vpack.c.bf16 %v3702_v57, %v3700_v14 }
 0x4bb   : > { %v2713_v10 = vpop.f32.mrf.mxu2 }
 0x4bc   : > { %8891 = vst [vmem:[#allocation85_spill] sm:$0xff] %v7440_v28  ;;  %v2714_v49 = vadd.f32 %v2713_v10, %v8892_v36  ;;  %v2882_v5 = vpop.f32.mrf.mxu3  ;;  %v8895_v36 = vld [vmem:[#allocation27_spill] sm:$0xff] }
 0x4bd   : > { %v3043_v59 = vpop.f32.mrf.mxu0 }
 0x4be   : > { %v2883_v11 = vadd.f32 %v2882_v5, %v2714_v49  ;;  %v3044_v19 = vadd.f32 %v3043_v59, %v7262_v35  ;;  %v3212_v24 = vpop.f32.mrf.mxu1  ;;  %v8896_v49 = vld [vmem:[#allocation28_spill] sm:$0xff]  ;;  %v8897_v59 = vld [vmem:[#allocation122_spill] sm:$0xff] }
 0x4c0   : > { %v7444_v61 = vadd.f32 %v3212_v24, %v3044_v19  ;;  %v3704_v18 = vmax.f32 %v2883_v11, 0.0 }
 0x4c3   : > { %v2715_v15 = vpop.f32.mrf.mxu2 }
 0x4c4   : > { %v2716_v38 = vadd.f32 %v2715_v15, %v8893_v34  ;;  %v2884_v48 = vpop.f32.mrf.mxu3 }
 0x4c5   : > { %v3046_v1 = vpop.f32.mrf.mxu0 }
 0x4c6   : > { %v2885_v16 = vadd.f32 %v2884_v48, %v2716_v38  ;;  %v3047_v57 = vadd.f32 %v3046_v1, %v7262_v35  ;;  %v3215_v14 = vpop.f32.mrf.mxu1 }
 0x4c8   : > { %v3706_v28 = vmax.f32 %v2885_v16, 0.0  ;;  %v7448_v10 = vadd.f32 %v3215_v14, %v3047_v57  ;;  %2757 = vmatmul.bf16.gmra.mxu2 %v7091_v52  ;;  %3085 = vmatmul.bf16.gmra.mxu0 %v8895_v36  ;;  %v8898_v57 = vld [vmem:[#allocation124_spill] sm:$0xff] }
 0x4c9   : > { %2926 = vmatmul.bf16.gmra.mxu3 %v7095_v27  ;;  %3254 = vmatmul.bf16.gmra.mxu1 %v8896_v49 }
 0x4ca   : > { %8894 = vst [vmem:[#allocation86_spill] sm:$0xff] %v7448_v10  ;;  %v7454_v5 = vpack.c.bf16 %v3706_v28, %v3704_v18 }
 0x4cb   : > { %v2718_v34 = vpop.f32.mrf.mxu2 }
 0x4cc   : > { %v2719_v48 = vadd.f32 %v2718_v34, %v8897_v59  ;;  %v2887_v19 = vpop.f32.mrf.mxu3  ;;  %v8900_v59 = vld [vmem:[#allocation30_spill] sm:$0xff] }
 0x4cd   : > { %v3048_v1 = vpop.f32.mrf.mxu0 }
 0x4ce   : > { %v2888_v24 = vadd.f32 %v2887_v19, %v2719_v48  ;;  %v3049_v16 = vadd.f32 %v3048_v1, %v7262_v35  ;;  %v3217_v11 = vpop.f32.mrf.mxu1  ;;  %v8901_v48 = vld [vmem:[#allocation31_spill] sm:$0xff] }
 0x4d0   : > { %v7458_v15 = vadd.f32 %v3217_v11, %v3049_v16  ;;  %v3708_v49 = vmax.f32 %v2888_v24, 0.0  ;;  %v8902_v16 = vld [vmem:[#allocation125_spill] sm:$0xff] }
 0x4d3   : > { %v2720_v38 = vpop.f32.mrf.mxu2 }
 0x4d4   : > { %v2721_v14 = vadd.f32 %v2720_v38, %v8898_v57  ;;  %v2889_v36 = vpop.f32.mrf.mxu3 }
 0x4d5   : > { %v3051_v27 = vpop.f32.mrf.mxu0 }
 0x4d6   : > { %v2890_v52 = vadd.f32 %v2889_v36, %v2721_v14  ;;  %v3052_v28 = vadd.f32 %v3051_v27, %v7262_v35  ;;  %v3220_v18 = vpop.f32.mrf.mxu1 }
 0x4d8   : > { %v3710_v10 = vmax.f32 %v2890_v52, 0.0  ;;  %v7462_v34 = vadd.f32 %v3220_v18, %v3052_v28  ;;  %2762 = vmatmul.bf16.gmra.mxu2 %v7109_v2  ;;  %3090 = vmatmul.bf16.gmra.mxu0 %v8900_v59  ;;  %v8903_v28 = vld [vmem:[#allocation127_spill] sm:$0xff] }
 0x4d9   : > { %2931 = vmatmul.bf16.gmra.mxu3 %v7113_v55  ;;  %3259 = vmatmul.bf16.gmra.mxu1 %v8901_v48 }
 0x4da   : > { %8899 = vst [vmem:[#allocation104_spill] sm:$0xff] %v7462_v34  ;;  %v7468_v19 = vpack.c.bf16 %v3710_v10, %v3708_v49 }
 0x4db   : > { %v2723_v1 = vpop.f32.mrf.mxu2 }
 0x4dc   : > { %v2724_v11 = vadd.f32 %v2723_v1, %v8902_v16  ;;  %v2892_v38 = vpop.f32.mrf.mxu3  ;;  %v8905_v16 = vld [vmem:[#allocation34_spill] sm:$0xff] }
 0x4dd   : > { %v3053_v27 = vpop.f32.mrf.mxu0 }
 0x4de   : > { %v2893_v57 = vadd.f32 %v2892_v38, %v2724_v11  ;;  %v3054_v52 = vadd.f32 %v3053_v27, %v7262_v35  ;;  %v3222_v24 = vpop.f32.mrf.mxu1  ;;  %v8906_v11 = vld [vmem:[#allocation35_spill] sm:$0xff] }
 0x4e0   : > { %v7472_v14 = vadd.f32 %v3222_v24, %v3054_v52  ;;  %v3712_v48 = vmax.f32 %v2893_v57, 0.0  ;;  %v8907_v52 = vld [vmem:[#allocation128_spill] sm:$0xff] }
 0x4e3   : > { %v2725_v36 = vpop.f32.mrf.mxu2 }
 0x4e4   : > { %v2726_v18 = vadd.f32 %v2725_v36, %v8903_v28  ;;  %v2894_v59 = vpop.f32.mrf.mxu3 }
 0x4e5   : > { %v3056_v55 = vpop.f32.mrf.mxu0 }
 0x4e6   : > { %v2895_v2 = vadd.f32 %v2894_v59, %v2726_v18  ;;  %v3057_v10 = vadd.f32 %v3056_v55, %v7262_v35  ;;  %v3225_v49 = vpop.f32.mrf.mxu1 }
 0x4e8   : > { %v3714_v34 = vmax.f32 %v2895_v2, 0.0  ;;  %v7476_v1 = vadd.f32 %v3225_v49, %v3057_v10  ;;  %2767 = vmatmul.bf16.gmra.mxu2 %v7127_v21  ;;  %3095 = vmatmul.bf16.gmra.mxu0 %v8905_v16  ;;  %v8908_v10 = vld [vmem:[#allocation130_spill] sm:$0xff] }
 0x4e9   : > { %2936 = vmatmul.bf16.gmra.mxu3 %v7131_v17  ;;  %3264 = vmatmul.bf16.gmra.mxu1 %v8906_v11 }
 0x4ea   : > { %8904 = vst [vmem:[#allocation106_spill] sm:$0xff] %v7476_v1  ;;  %v7482_v38 = vpack.c.bf16 %v3714_v34, %v3712_v48 }
 0x4eb   : > { %v2728_v27 = vpop.f32.mrf.mxu2 }
 0x4ec   : > { %v2729_v24 = vadd.f32 %v2728_v27, %v8907_v52  ;;  %v2897_v36 = vpop.f32.mrf.mxu3  ;;  %v8909_v52 = vld [vmem:[#allocation38_spill] sm:$0xff] }
 0x4ed   : > { %v3058_v55 = vpop.f32.mrf.mxu0 }
 0x4ee   : > { %v2898_v28 = vadd.f32 %v2897_v36, %v2729_v24  ;;  %v3059_v2 = vadd.f32 %v3058_v55, %v7262_v35  ;;  %v3227_v57 = vpop.f32.mrf.mxu1  ;;  %v8910_v24 = vld [vmem:[#allocation39_spill] sm:$0xff]  ;;  %v5127_v36 = vld [vmem:[%s8423_s3 + $0x174] sm:$0xf] }
 0x4f0   : > { %v7486_v18 = vadd.f32 %v3227_v57, %v3059_v2  ;;  %v3716_v11 = vmax.f32 %v2898_v28, 0.0  ;;  %v8911_v2 = vld [vmem:[#allocation131_spill] sm:$0xff] }
 0x4f3   : > { %v2730_v59 = vpop.f32.mrf.mxu2 }
 0x4f4   : > { %v2731_v49 = vadd.f32 %v2730_v59, %v8908_v10  ;;  %v2899_v16 = vpop.f32.mrf.mxu3 }
 0x4f5   : > { %v3061_v17 = vpop.f32.mrf.mxu0 }
 0x4f6   : > { %v2900_v21 = vadd.f32 %v2899_v16, %v2731_v49  ;;  %v3062_v34 = vadd.f32 %v3061_v17, %v7262_v35  ;;  %v3230_v48 = vpop.f32.mrf.mxu1  ;;  %v4934_v17 = vld [vmem:[%s8423_s3 + $0x178] sm:$0xf0] }
 0x4f7   : > { %v4937_v55 = vor.u32 %v5127_v36, %v4934_v17  ;;  %v8913_v36 = vld [vmem:[#allocation133_spill] sm:$0xff] }
 0x4f8   : > { %v3718_v1 = vmax.f32 %v2900_v21, 0.0  ;;  %v7490_v27 = vadd.f32 %v3230_v48, %v3062_v34  ;;  %2772 = vmatmul.bf16.gmra.mxu2 %v7145_v25  ;;  %3100 = vmatmul.bf16.gmra.mxu0 %v8909_v52  ;;  %v5143_v52 = vld [vmem:[%s8423_s3 + $0x1f4] sm:$0xf] }
 0x4f9   : > { %2941 = vmatmul.bf16.gmra.mxu3 %v7149_v63  ;;  %3269 = vmatmul.bf16.gmra.mxu1 %v8910_v24  ;;  %v8915_v63 = vld [vmem:[#allocation42_spill] sm:$0xff] }
 0x4fa   : > { %v7502_v21 = vpack.c.bf16 %v3718_v1, %v3716_v11  ;;  %3310 = vmatpush.bf16.msrb.mxu2 %v4937_v55  ;;  %v4998_v1 = vld [vmem:[%s8423_s3 + $0x1f8] sm:$0xf0] }
 0x4fb   : > { %v2733_v28 = vpop.f32.mrf.mxu2  ;;  %v5001_v11 = vor.u32 %v5143_v52, %v4998_v1  ;;  %v8916_v52 = vld [vmem:[#allocation43_spill] sm:$0xff] }
 0x4fc   : > { %v2734_v57 = vadd.f32 %v2733_v28, %v8911_v2  ;;  %v2902_v59 = vpop.f32.mrf.mxu3 }
 0x4fd   : > { %v3063_v10 = vpop.f32.mrf.mxu0  ;;  %3479 = vmatpush.bf16.msrb.mxu3 %v5001_v11 }
 0x4fe   : > { %v2903_v49 = vadd.f32 %v2902_v59, %v2734_v57  ;;  %v3064_v16 = vadd.f32 %v3063_v10, %v7262_v35  ;;  %v3232_v34 = vpop.f32.mrf.mxu1 }
 0x500   : > { %v7506_v48 = vadd.f32 %v3232_v34, %v3064_v16  ;;  %v3720_v10 = vmax.f32 %v2903_v49, 0.0 }
 0x502   : > { %8912 = vst [vmem:[#allocation89_spill] sm:$0xff] %v7506_v48 }
 0x503   : > { %v2735_v24 = vpop.f32.mrf.mxu2 }
 0x504   : > { %v2736_v17 = vadd.f32 %v2735_v24, %v8913_v36  ;;  %v2904_v55 = vpop.f32.mrf.mxu3  ;;  %v8917_v24 = vld [vmem:[#allocation134_spill] sm:$0xff] }
 0x505   : > { %v3066_v28 = vpop.f32.mrf.mxu0 }
 0x506   : > { %v2905_v2 = vadd.f32 %v2904_v55, %v2736_v17  ;;  %v3067_v57 = vadd.f32 %v3066_v28, %v7262_v35  ;;  %v3235_v59 = vpop.f32.mrf.mxu1 }
 0x508   : > { %v3722_v16 = vmax.f32 %v2905_v2, 0.0  ;;  %v7516_v34 = vadd.f32 %v3235_v59, %v3067_v57  ;;  %2777 = vmatmul.bf16.gmra.mxu2 %v7163_v23  ;;  %3105 = vmatmul.bf16.gmra.mxu0 %v8915_v63  ;;  %v8918_v23 = vld [vmem:[#allocation136_spill] sm:$0xff] }
 0x509   : > { %2946 = vmatmul.bf16.gmra.mxu3 %v7167_v54  ;;  %3274 = vmatmul.bf16.gmra.mxu1 %v8916_v52 }
 0x50a   : > { %8914 = vst [vmem:[#allocation90_spill] sm:$0xff] %v7516_v34  ;;  %v7522_v1 = vpack.c.bf16 %v3722_v16, %v3720_v10 }
 0x50b   : > { %v2738_v11 = vpop.f32.mrf.mxu2 }
 0x50c   : > { %v2739_v36 = vadd.f32 %v2738_v11, %v8917_v24  ;;  %v2907_v17 = vpop.f32.mrf.mxu3  ;;  %v8919_v24 = vld [vmem:[#allocation46_spill] sm:$0xff] }
 0x50d   : > { %v3068_v55 = vpop.f32.mrf.mxu0 }
 0x50e   : > { %v2908_v28 = vadd.f32 %v2907_v17, %v2739_v36  ;;  %v3069_v49 = vadd.f32 %v3068_v55, %v7262_v35  ;;  %v3237_v2 = vpop.f32.mrf.mxu1  ;;  %v8920_v36 = vld [vmem:[#allocation47_spill] sm:$0xff]  ;;  %v8921_v55 = vld [vmem:[#allocation137_spill] sm:$0xff] }
 0x510   : > { %v7526_v57 = vadd.f32 %v3237_v2, %v3069_v49  ;;  %v3724_v52 = vmax.f32 %v2908_v28, 0.0 }
 0x513   : > { %v2740_v59 = vpop.f32.mrf.mxu2 }
 0x514   : > { %v2741_v63 = vadd.f32 %v2740_v59, %v8918_v23  ;;  %v2909_v25 = vpop.f32.mrf.mxu3 }
 0x515   : > { %v3071_v54 = vpop.f32.mrf.mxu0 }
 0x516   : > { %v2910_v34 = vadd.f32 %v2909_v25, %v2741_v63  ;;  %v3072_v10 = vadd.f32 %v3071_v54, %v7262_v35  ;;  %v3240_v16 = vpop.f32.mrf.mxu1  ;;  %v5125_v25 = vld [vmem:[%s8423_s3 + $0x164] sm:$0xf]  ;;  %v4926_v54 = vld [vmem:[%s8423_s3 + $0x168] sm:$0xf0] }
 0x517   : > { %v4929_v2 = vor.u32 %v5125_v25, %v4926_v54 }
 0x518   : > { %v3726_v48 = vmax.f32 %v2910_v34, 0.0  ;;  %v7530_v11 = vadd.f32 %v3240_v16, %v3072_v10  ;;  %2782 = vmatmul.bf16.gmra.mxu2 %v7181_v8  ;;  %3110 = vmatmul.bf16.gmra.mxu0 %v8919_v24  ;;  %v5141_v34 = vld [vmem:[%s8423_s3 + $0x1e4] sm:$0xf]  ;;  %v5123_v24 = vld [vmem:[%s8423_s3 + $0x154] sm:$0xf] }
 0x519   : > { %2951 = vmatmul.bf16.gmra.mxu3 %v7185_v31  ;;  %3279 = vmatmul.bf16.gmra.mxu1 %v8920_v36  ;;  %v4918_v36 = vld [vmem:[%s8423_s3 + $0x158] sm:$0xf0]  ;;  %v5119_v31 = vld [vmem:[%s8423_s3 + $0x134] sm:$0xf] }
 0x51a   : > { %v7536_v17 = vpack.c.bf16 %v3726_v48, %v3724_v52  ;;  %v4990_v48 = vld [vmem:[%s8423_s3 + $0x1e8] sm:$0xf0]  ;;  %3311 = vmatpush.bf16.msrb.mxu2 %v4929_v2  ;;  %v4921_v54 = vor.u32 %v5123_v24, %v4918_v36 }
 0x51b   : > { %v2743_v23 = vpop.f32.mrf.mxu2  ;;  %v4993_v63 = vor.u32 %v5141_v34, %v4990_v48  ;;  %v4982_v34 = vld [vmem:[%s8423_s3 + $0x1d8] sm:$0xf0]  ;;  %v4910_v2 = vld [vmem:[%s8423_s3 + $0x148] sm:$0xf0]  ;;  %v5137_v48 = vld [vmem:[%s8423_s3 + $0x1c4] sm:$0xf] }
 0x51c   : > { %v2744_v28 = vadd.f32 %v2743_v23, %v8921_v55  ;;  %v2912_v49 = vpop.f32.mrf.mxu3  ;;  %v5139_v23 = vld [vmem:[%s8423_s3 + $0x1d4] sm:$0xf]  ;;  %v4974_v24 = vld [vmem:[%s8423_s3 + $0x1c8] sm:$0xf0] }
 0x51d   : > { %v3073_v59 = vpop.f32.mrf.mxu0  ;;  %3480 = vmatpush.bf16.msrb.mxu3 %v4993_v63  ;;  %v4985_v55 = vor.u32 %v5139_v23, %v4982_v34  ;;  %v4977_v23 = vor.u32 %v5137_v48, %v4974_v24  ;;  %v8925_v24 = vld [vmem:[#allocation51_spill] sm:$0xff] }
 0x51e   : > { %v2913_v10 = vadd.f32 %v2912_v49, %v2744_v28  ;;  %v3074_v16 = vadd.f32 %v3073_v59, %v7262_v35  ;;  %v3242_v52 = vpop.f32.mrf.mxu1  ;;  %3312 = vmatpush.bf16.msrb.mxu2 %v4921_v54  ;;  %v5121_v49 = vld [vmem:[%s8423_s3 + $0x144] sm:$0xf]  ;;  %v8922_v59 = vld [vmem:[#allocation139_spill] sm:$0xff] }
 0x520   : > { %v7561_v25 = vadd.f32 %v3242_v52, %v3074_v16  ;;  %v4913_v52 = vor.u32 %v5121_v49, %v4910_v2  ;;  %v5135_v49 = vld [vmem:[%s8423_s3 + $0x1b4] sm:$0xf]  ;;  %v3728_v2 = vmax.f32 %v2913_v10, 0.0 }
 0x521   : > { %3481 = vmatpush.bf16.msrb.mxu3 %v4985_v55 }
 0x522   : > { %3313 = vmatpush.bf16.msrb.mxu2 %v4913_v52  ;;  %v4966_v52 = vld [vmem:[%s8423_s3 + $0x1b8] sm:$0xf0] }
 0x523   : > { %v2745_v28 = vpop.f32.mrf.mxu2 }
 0x524   : > { %v2746_v63 = vadd.f32 %v2745_v28, %v8922_v59  ;;  %v2914_v16 = vpop.f32.mrf.mxu3  ;;  %v4902_v28 = vld [vmem:[%s8423_s3 + $0x138] sm:$0xf0] }
 0x525   : > { %v3076_v36 = vpop.f32.mrf.mxu0  ;;  %3482 = vmatpush.bf16.msrb.mxu3 %v4977_v23 }
 0x526   : > { %v2915_v54 = vadd.f32 %v2914_v16, %v2746_v63  ;;  %v3077_v34 = vadd.f32 %v3076_v36, %v7262_v35  ;;  %v3245_v55 = vpop.f32.mrf.mxu1  ;;  %v8924_v63 = vld [vmem:[#allocation50_spill] sm:$0xff]  ;;  %v4905_v16 = vor.u32 %v5119_v31, %v4902_v28  ;;  %v4969_v36 = vor.u32 %v5135_v49, %v4966_v52  ;;  %v4894_v31 = vld [vmem:[%s8423_s3 + $0x128] sm:$0xf0] }
 0x528   : > { %v3730_v48 = vmax.f32 %v2915_v54, 0.0  ;;  %v7589_v59 = vadd.f32 %v3245_v55, %v3077_v34  ;;  %2787 = vmatmul.bf16.gmra.mxu2 %v7199_v47  ;;  %3115 = vmatmul.bf16.gmra.mxu0 %v8924_v63  ;;  %v5117_v54 = vld [vmem:[%s8423_s3 + $0x124] sm:$0xf]  ;;  %v8926_v55 = vld [vmem:[#allocation140_spill] sm:$0xff] }
 0x529   : > { %2956 = vmatmul.bf16.gmra.mxu3 %v7203_v30  ;;  %3284 = vmatmul.bf16.gmra.mxu1 %v8925_v24  ;;  %v5133_v34 = vld [vmem:[%s8423_s3 + $0x1a4] sm:$0xf]  ;;  %v4897_v63 = vor.u32 %v5117_v54, %v4894_v31  ;;  %v5115_v30 = vld [vmem:[%s8423_s3 + $0x114] sm:$0xf] }
 0x52a   : > { %8923 = vst [vmem:[#allocation107_spill] sm:$0xff] %v7589_v59  ;;  %3314 = vmatpush.bf16.msrb.mxu2 %v4905_v16  ;;  %v7598_v23 = vpack.c.bf16 %v3730_v48, %v3728_v2  ;;  %3483 = vmatpush.bf16.msrb.mxu3 %v4969_v36  ;;  %v4958_v2 = vld [vmem:[%s8423_s3 + $0x1a8] sm:$0xf0]  ;;  %v5131_v54 = vld [vmem:[%s8423_s3 + $0x194] sm:$0xf] }
 0x52b   : > { %v2748_v10 = vpop.f32.mrf.mxu2  ;;  %v4961_v16 = vor.u32 %v5133_v34, %v4958_v2  ;;  %v4878_v2 = vld [vmem:[%s8423_s3 + $0x108] sm:$0xf0] }
 0x52c   : > { %v2749_v28 = vadd.f32 %v2748_v10, %v8926_v55  ;;  %v2917_v49 = vpop.f32.mrf.mxu3  ;;  %v4886_v10 = vld [vmem:[%s8423_s3 + $0x118] sm:$0xf0] }
 0x52d   : > { %v3078_v48 = vpop.f32.mrf.mxu0  ;;  %v4889_v34 = vor.u32 %v5115_v30, %v4886_v10  ;;  %v4950_v55 = vld [vmem:[%s8423_s3 + $0x198] sm:$0xf0]  ;;  %v5129_v30 = vld [vmem:[%s8423_s3 + $0x184] sm:$0xf]  ;;  %v4942_v10 = vld [vmem:[%s8423_s3 + $0x188] sm:$0xf0] }
 0x52e   : > { %v2918_v52 = vadd.f32 %v2917_v49, %v2749_v28  ;;  %v3079_v24 = vadd.f32 %v3078_v48, %v7262_v35  ;;  %v3247_v36 = vpop.f32.mrf.mxu1  ;;  %3315 = vmatpush.bf16.msrb.mxu2 %v4897_v63  ;;  %3484 = vmatpush.bf16.msrb.mxu3 %v4961_v16  ;;  %v4953_v28 = vor.u32 %v5131_v54, %v4950_v55  ;;  %v5113_v63 = vld [vmem:[%s8423_s3 + $0x104] sm:$0xf] }
 0x52f   : > { %v8928_v48 = vld [vmem:[#allocation142_spill] sm:$0xff] }
 0x530   : > { %v7623_v31 = vadd.f32 %v3247_v36, %v3079_v24  ;;  %v4881_v36 = vor.u32 %v5113_v63, %v4878_v2  ;;  %v3732_v8 = vmax.f32 %v2918_v52, 0.0  ;;  %v5152_v63 = vld [vmem:[%s8425_s5 + $0x38] sm:$0xff]  ;;  %v8931_v2 = vld [vmem:[#allocation55_spill] sm:$0xff] }
 0x531   : > { %3972 = vmatpush.bf16.msrb.mxu0 %v5152_v63  ;;  %v8932_v52 = vld [vmem:[#allocation143_spill] sm:$0xff] }
 0x532   : > { %8927 = vst [vmem:[#allocation109_spill] sm:$0xff] %v7623_v31  ;;  %3316 = vmatpush.bf16.msrb.mxu2 %v4889_v34  ;;  %3485 = vmatpush.bf16.msrb.mxu3 %v4953_v28  ;;  %v4945_v34 = vor.u32 %v5129_v30, %v4942_v10 }
 0x533   : > { %v2750_v49 = vpop.f32.mrf.mxu2 }
 0x534   : > { %v2751_v16 = vadd.f32 %v2750_v49, %v8928_v48  ;;  %v2919_v24 = vpop.f32.mrf.mxu3  ;;  %v8930_v49 = vld [vmem:[#allocation54_spill] sm:$0xff] }
 0x535   : > { %v3081_v54 = vpop.f32.mrf.mxu0 }
 0x536   : > { %v2920_v55 = vadd.f32 %v2919_v24, %v2751_v16  ;;  %v3082_v28 = vadd.f32 %v3081_v54, %v7262_v35  ;;  %v3250_v47 = vpop.f32.mrf.mxu1  ;;  %3317 = vmatpush.bf16.msrb.mxu2 %v4881_v36  ;;  %3486 = vmatpush.bf16.msrb.mxu3 %v4945_v34  ;;  %v5151_v24 = vld [vmem:[%s8425_s5 + $0x30] sm:$0xff]  ;;  %v5150_v34 = vld [vmem:[%s8425_s5 + $0x28] sm:$0xff] }
 0x537   : > { %3973 = vmatpush.bf16.msrb.mxu0 %v5151_v24 }
 0x538   : > { %v3734_v31 = vmax.f32 %v2920_v55, 0.0  ;;  %v7642_v59 = vadd.f32 %v3250_v47, %v3082_v28  ;;  %2792 = vmatmul.bf16.gmra.mxu2 %v7217_v6  ;;  %3120 = vmatmul.bf16.gmra.mxu0 %v8930_v49  ;;  %v5149_v49 = vld [vmem:[%s8425_s5 + $0x20] sm:$0xff] }
 0x539   : > { %2961 = vmatmul.bf16.gmra.mxu3 %v7221_v37  ;;  %3289 = vmatmul.bf16.gmra.mxu1 %v8931_v2 }
 0x53a   : > { %8929 = vst [vmem:[#allocation15_spill] sm:$0xff] %v7642_v59  ;;  %v7651_v30 = vpack.c.bf16 %v3734_v31, %v3732_v8  ;;  %v8935_v31 = vld [vmem:[#allocation146_spill] sm:$0xff] }
 0x53b   : > { %v2753_v48 = vpop.f32.mrf.mxu2  ;;  %3974 = vmatpush.bf16.msrb.mxu0 %v5150_v34  ;;  %v8937_v34 = vld [vmem:[#allocation58_spill] sm:$0xff] }
 0x53c   : > { %v2754_v16 = vadd.f32 %v2753_v48, %v8932_v52  ;;  %v2922_v47 = vpop.f32.mrf.mxu3 }
 0x53d   : > { %v7657_v36 = vpop.f32.mrf.mxu0 }
 0x53e   : > { %8933 = vst [vmem:[#allocation16_spill] sm:$0xff] %v7657_v36  ;;  %v2923_v10 = vadd.f32 %v2922_v47, %v2754_v16  ;;  %v7659_v54 = vpop.f32.mrf.mxu1 }
 0x53f   : > { %8934 = vst [vmem:[#allocation110_spill] sm:$0xff] %v7659_v54  ;;  %3975 = vmatpush.bf16.msrb.mxu0 %v5149_v49 }
 0x540   : > { %v3736_v16 = vmax.f32 %v2923_v10, 0.0  ;;  %v8939_v10 = vld [vmem:[#allocation147_spill] sm:$0xff] }
 0x543   : > { %v2755_v8 = vpop.f32.mrf.mxu2 }
 0x544   : > { %v2756_v55 = vadd.f32 %v2755_v8, %v8935_v31  ;;  %v2924_v28 = vpop.f32.mrf.mxu3  ;;  %v5148_v8 = vld [vmem:[%s8425_s5 + $0x18] sm:$0xff]  ;;  %v8938_v31 = vld [vmem:[#allocation59_spill] sm:$0xff] }
 0x545   : > { %v3086_v63 = vpop.f32.mrf.mxu0  ;;  %3976 = vmatpush.bf16.msrb.mxu0 %v5148_v8  ;;  %v5146_v8 = vld [vmem:[%s8425_s5 + $0x8] sm:$0xff] }
 0x546   : > { %v2925_v2 = vadd.f32 %v2924_v28, %v2756_v55  ;;  %v3087_v48 = vadd.f32 %v3086_v63, %v7262_v35  ;;  %v3255_v52 = vpop.f32.mrf.mxu1 }
 0x548   : > { %v3738_v47 = vmax.f32 %v2925_v2, 0.0  ;;  %v7669_v24 = vadd.f32 %v3255_v52, %v3087_v48  ;;  %2797 = vmatmul.bf16.gmra.mxu2 %v7235_v58  ;;  %3125 = vmatmul.bf16.gmra.mxu0 %v8937_v34  ;;  %v5147_v2 = vld [vmem:[%s8425_s5 + $0x10] sm:$0xff] }
 0x549   : > { %2966 = vmatmul.bf16.gmra.mxu3 %v7239_v0  ;;  %3294 = vmatmul.bf16.gmra.mxu1 %v8938_v31 }
 0x54a   : > { %8936 = vst [vmem:[#allocation112_spill] sm:$0xff] %v7669_v24  ;;  %v7678_v55 = vpack.c.bf16 %v3738_v47, %v3736_v16  ;;  %3977 = vmatpush.bf16.msrb.mxu0 %v5147_v2  ;;  %v8942_v47 = vld [vmem:[#allocation150_spill] sm:$0xff] }
 0x54b   : > { %v2758_v28 = vpop.f32.mrf.mxu2 }
 0x54c   : > { %v2759_v49 = vadd.f32 %v2758_v28, %v8939_v10  ;;  %v2927_v63 = vpop.f32.mrf.mxu3  ;;  %v5145_v10 = vld [vmem:[%s8425_s5] sm:$0xff] }
 0x54d   : > { %v7684_v48 = vpop.f32.mrf.mxu0 }
 0x54e   : > { %8940 = vst [vmem:[#allocation18_spill] sm:$0xff] %v7684_v48  ;;  %v2928_v52 = vadd.f32 %v2927_v63, %v2759_v49  ;;  %v7686_v34 = vpop.f32.mrf.mxu1  ;;  %3978 = vmatpush.bf16.msrb.mxu0 %v5146_v8  ;;  %v8945_v8 = vld [vmem:[#allocation67_spill] sm:$0xff] }
 0x54f   : > { %8941 = vst [vmem:[#allocation19_spill] sm:$0xff] %v7686_v34  ;;  %v8944_v34 = vld [vmem:[#allocation61_spill] sm:$0xff] }
 0x550   : > { %v3740_v2 = vmax.f32 %v2928_v52, 0.0 }
 0x552   : > { %3979 = vmatpush.bf16.msrb.mxu0 %v5145_v10 }
 0x553   : > { %v2760_v16 = vpop.f32.mrf.mxu2 }
 0x554   : > { %v2761_v31 = vadd.f32 %v2760_v16, %v8942_v47  ;;  %v2929_v28 = vpop.f32.mrf.mxu3  ;;  %v8946_v16 = vld [vmem:[#allocation62_spill] sm:$0xff]  ;;  %v8947_v47 = vld [vmem:[#allocation68_spill] sm:$0xff] }
 0x555   : > { %v3091_v0 = vpop.f32.mrf.mxu0 }
 0x556   : > { %v2930_v58 = vadd.f32 %v2929_v28, %v2761_v31  ;;  %v3092_v49 = vadd.f32 %v3091_v0, %v7262_v35  ;;  %v3260_v63 = vpop.f32.mrf.mxu1  ;;  %v8948_v31 = vld [vmem:[#allocation151_spill] sm:$0xff] }
 0x558   : > { %v3742_v37 = vmax.f32 %v2930_v58, 0.0  ;;  %v7696_v6 = vadd.f32 %v3260_v63, %v3092_v49  ;;  %3130 = vmatmul.bf16.gmra.mxu0 %v8944_v34  ;;  %3318 = vmatmul.bf16.vlgmr.msrb.gmra.mxu2 %v8945_v8  ;;  %v8951_v49 = vld [vmem:[#allocation152_spill] sm:$0xff] }
 0x559   : > { %3299 = vmatmul.bf16.gmra.mxu1 %v8946_v16  ;;  %3487 = vmatmul.bf16.vlgmr.msrb.gmra.mxu3 %v8947_v47 }
 0x55a   : > { %8943 = vst [vmem:[#allocation113_spill] sm:$0xff] %v7696_v6  ;;  %v7702_v24 = vpack.c.bf16 %v3742_v37, %v3740_v2 }
 0x55b   : > { %v2763_v48 = vpop.f32.mrf.mxu2 }
 0x55c   : > { %v2764_v28 = vadd.f32 %v2763_v48, %v8948_v31  ;;  %v2932_v0 = vpop.f32.mrf.mxu3  ;;  %v8953_v48 = vld [vmem:[#allocation64_spill] sm:$0xff]  ;;  %v8954_v31 = vld [vmem:[#allocation71_spill] sm:$0xff] }
 0x55d   : > { %v7705_v54 = vpop.f32.mrf.mxu0 }
 0x55e   : > { %8949 = vst [vmem:[#allocation115_spill] sm:$0xff] %v7705_v54  ;;  %v2933_v52 = vadd.f32 %v2932_v0, %v2764_v28  ;;  %v7707_v58 = vpop.f32.mrf.mxu1  ;;  %v8955_v28 = vld [vmem:[#allocation65_spill] sm:$0xff]  ;;  %v8956_v0 = vld [vmem:[#allocation72_spill] sm:$0xff] }
 0x55f   : > { %8950 = vst [vmem:[#allocation21_spill] sm:$0xff] %v7707_v58 }
 0x560   : > { %v3744_v37 = vmax.f32 %v2933_v52, 0.0 }
 0x563   : > { %v2765_v10 = vpop.f32.mrf.mxu2 }
 0x564   : > { %v2766_v34 = vadd.f32 %v2765_v10, %v8951_v49  ;;  %v2934_v63 = vpop.f32.mrf.mxu3  ;;  %v8957_v49 = vld [vmem:[#allocation153_spill] sm:$0xff] }
 0x565   : > { %v3096_v8 = vpop.f32.mrf.mxu0 }
 0x566   : > { %v2935_v6 = vadd.f32 %v2934_v63, %v2766_v34  ;;  %v3097_v16 = vadd.f32 %v3096_v8, %v7262_v35  ;;  %v3265_v47 = vpop.f32.mrf.mxu1 }
 0x568   : > { %v3746_v2 = vmax.f32 %v2935_v6, 0.0  ;;  %v7711_v59 = vadd.f32 %v3265_v47, %v3097_v16  ;;  %3135 = vmatmul.bf16.gmra.mxu0 %v8953_v48  ;;  %3323 = vmatmul.bf16.gmra.mxu2 %v8954_v31  ;;  %v8960_v47 = vld [vmem:[#allocation154_spill] sm:$0xff] }
 0x569   : > { %3304 = vmatmul.bf16.gmra.mxu1 %v8955_v28  ;;  %3492 = vmatmul.bf16.gmra.mxu3 %v8956_v0 }
 0x56a   : > { %8952 = vst [vmem:[#allocation22_spill] sm:$0xff] %v7711_v59  ;;  %v7717_v58 = vpack.c.bf16 %v3746_v2, %v3744_v37 }
 0x56b   : > { %v2768_v10 = vpop.f32.mrf.mxu2 }
 0x56c   : > { %v2769_v34 = vadd.f32 %v2768_v10, %v8957_v49  ;;  %v2937_v63 = vpop.f32.mrf.mxu3  ;;  %v8962_v10 = vld [vmem:[#allocation75_spill] sm:$0xff]  ;;  %v8963_v49 = vld [vmem:[#allocation76_spill] sm:$0xff] }
 0x56d   : > { %v7720_v8 = vpop.f32.mrf.mxu0 }
 0x56e   : > { %8958 = vst [vmem:[#allocation116_spill] sm:$0xff] %v7720_v8  ;;  %v2938_v52 = vadd.f32 %v2937_v63, %v2769_v34  ;;  %v7722_v6 = vpop.f32.mrf.mxu1 }
 0x56f   : > { %8959 = vst [vmem:[#allocation118_spill] sm:$0xff] %v7722_v6 }
 0x570   : > { %v3748_v37 = vmax.f32 %v2938_v52, 0.0  ;;  %v8967_v52 = vld [vmem:[#allocation156_spill] sm:$0xff] }
 0x573   : > { %v2770_v16 = vpop.f32.mrf.mxu2 }
 0x574   : > { %v2771_v48 = vadd.f32 %v2770_v16, %v8960_v47  ;;  %v2939_v59 = vpop.f32.mrf.mxu3  ;;  %v8964_v16 = vld [vmem:[#allocation155_spill] sm:$0xff] }
 0x575   : > { %v3101_v31 = vpop.f32.mrf.mxu0 }
 0x576   : > { %v2940_v54 = vadd.f32 %v2939_v59, %v2771_v48  ;;  %v3102_v28 = vadd.f32 %v3101_v31, %v7262_v35  ;;  %v3270_v0 = vpop.f32.mrf.mxu1 }
 0x578   : > { %v3750_v2 = vmax.f32 %v2940_v54, 0.0  ;;  %v7726_v36 = vadd.f32 %v3270_v0, %v3102_v28  ;;  %3328 = vmatmul.bf16.gmra.mxu2 %v8962_v10  ;;  %3980 = vmatmul.bf16.vlgmr.msrb.gmra.mxu0 %v7253_v62 }
 0x579   : > { %3497 = vmatmul.bf16.gmra.mxu3 %v8963_v49 }
 0x57a   : > { %8961 = vst [vmem:[#allocation24_spill] sm:$0xff] %v7726_v36  ;;  %v7731_v34 = vpack.c.bf16 %v3750_v2, %v3748_v37 }
 0x57b   : > { %v2773_v63 = vpop.f32.mrf.mxu2 }
 0x57c   : > { %v2774_v47 = vadd.f32 %v2773_v63, %v8964_v16  ;;  %v2942_v6 = vpop.f32.mrf.mxu3  ;;  %v8969_v63 = vld [vmem:[#allocation79_spill] sm:$0xff] }
 0x57d   : > { %v7734_v59 = vpop.f32.mrf.mxu0 }
 0x57e   : > { %8965 = vst [vmem:[#allocation25_spill] sm:$0xff] %v7734_v59  ;;  %v2943_v48 = vadd.f32 %v2942_v6, %v2774_v47  ;;  %v7736_v31 = vpop.f32.mrf.mxu1  ;;  %v8970_v6 = vld [vmem:[#allocation80_spill] sm:$0xff] }
 0x57f   : > { %8966 = vst [vmem:[#allocation119_spill] sm:$0xff] %v7736_v31 }
 0x580   : > { %v3752_v37 = vmax.f32 %v2943_v48, 0.0 }
 0x583   : > { %v2775_v54 = vpop.f32.mrf.mxu2 }
 0x584   : > { %v2776_v28 = vadd.f32 %v2775_v54, %v8967_v52  ;;  %v2944_v0 = vpop.f32.mrf.mxu3  ;;  %v8971_v54 = vld [vmem:[#allocation157_spill] sm:$0xff] }
 0x585   : > { %v3106_v10 = vpop.f32.mrf.mxu0 }
 0x586   : > { %v2945_v36 = vadd.f32 %v2944_v0, %v2776_v28  ;;  %v3107_v62 = vadd.f32 %v3106_v10, %v7262_v35  ;;  %v3275_v49 = vpop.f32.mrf.mxu1 }
 0x588   : > { %v3754_v2 = vmax.f32 %v2945_v36, 0.0  ;;  %v7740_v8 = vadd.f32 %v3275_v49, %v3107_v62  ;;  %3333 = vmatmul.bf16.gmra.mxu2 %v8969_v63  ;;  %3985 = vmatmul.bf16.gmra.mxu0 %v7272_v7  ;;  %v5160_v36 = vld [vmem:[%s8425_s5 + $0x78] sm:$0xff]  ;;  %v8974_v7 = vld [vmem:[#allocation158_spill] sm:$0xff] }
 0x589   : > { %3502 = vmatmul.bf16.gmra.mxu3 %v8970_v6  ;;  %4141 = vmatpush.bf16.msrb.mxu1 %v5160_v36 }
 0x58a   : > { %8968 = vst [vmem:[#allocation121_spill] sm:$0xff] %v7740_v8  ;;  %v7745_v16 = vpack.c.bf16 %v3754_v2, %v3752_v37 }
 0x58b   : > { %v2778_v47 = vpop.f32.mrf.mxu2 }
 0x58c   : > { %v2779_v52 = vadd.f32 %v2778_v47, %v8971_v54  ;;  %v2947_v31 = vpop.f32.mrf.mxu3 }
 0x58d   : > { %v7748_v28 = vpop.f32.mrf.mxu0 }
 0x58e   : > { %8972 = vst [vmem:[#allocation27_spill] sm:$0xff] %v7748_v28  ;;  %v2948_v0 = vadd.f32 %v2947_v31, %v2779_v52  ;;  %v7750_v10 = vpop.f32.mrf.mxu1  ;;  %v8976_v31 = vld [vmem:[#allocation83_spill] sm:$0xff]  ;;  %v8977_v52 = vld [vmem:[#allocation84_spill] sm:$0xff] }
 0x58f   : > { %8973 = vst [vmem:[#allocation28_spill] sm:$0xff] %v7750_v10 }
 0x590   : > { %v3756_v47 = vmax.f32 %v2948_v0, 0.0 }
 0x593   : > { %v2780_v48 = vpop.f32.mrf.mxu2 }
 0x594   : > { %v2781_v62 = vadd.f32 %v2780_v48, %v8974_v7  ;;  %v2949_v49 = vpop.f32.mrf.mxu3  ;;  %v8978_v48 = vld [vmem:[#allocation159_spill] sm:$0xff] }
 0x595   : > { %v3111_v37 = vpop.f32.mrf.mxu0 }
 0x596   : > { %v2950_v2 = vadd.f32 %v2949_v49, %v2781_v62  ;;  %v3112_v63 = vadd.f32 %v3111_v37, %v7262_v35  ;;  %v3280_v6 = vpop.f32.mrf.mxu1 }
 0x598   : > { %v3758_v54 = vmax.f32 %v2950_v2, 0.0  ;;  %v7757_v8 = vadd.f32 %v3280_v6, %v3112_v63  ;;  %3338 = vmatmul.bf16.gmra.mxu2 %v8976_v31  ;;  %3990 = vmatmul.bf16.gmra.mxu0 %v7286_v13  ;;  %v8980_v2 = vld [vmem:[#allocation160_spill] sm:$0xff] }
 0x599   : > { %3507 = vmatmul.bf16.gmra.mxu3 %v8977_v52 }
 0x59a   : > { %8975 = vst [vmem:[#allocation122_spill] sm:$0xff] %v7757_v8  ;;  %v7762_v36 = vpack.c.bf16 %v3758_v54, %v3756_v47 }
 0x59b   : > { %v2783_v10 = vpop.f32.mrf.mxu2 }
 0x59c   : > { %v2784_v7 = vadd.f32 %v2783_v10, %v8978_v48  ;;  %v2952_v28 = vpop.f32.mrf.mxu3  ;;  %v8981_v10 = vld [vmem:[#allocation87_spill] sm:$0xff] }
 0x59d   : > { %v7765_v62 = vpop.f32.mrf.mxu0 }
 0x59e   : > { %v2953_v49 = vadd.f32 %v2952_v28, %v2784_v7  ;;  %v7767_v37 = vpop.f32.mrf.mxu1  ;;  %v8982_v28 = vld [vmem:[#allocation88_spill] sm:$0xff] }
 0x59f   : > { %8979 = vst [vmem:[#allocation124_spill] sm:$0xff] %v7767_v37 }
 0x5a0   : > { %v3760_v47 = vmax.f32 %v2953_v49, 0.0 }
 0x5a3   : > { %v2785_v0 = vpop.f32.mrf.mxu2 }
 0x5a4   : > { %v2786_v63 = vadd.f32 %v2785_v0, %v8980_v2  ;;  %v2954_v6 = vpop.f32.mrf.mxu3  ;;  %v8983_v0 = vld [vmem:[#allocation161_spill] sm:$0xff] }
 0x5a5   : > { %v3116_v31 = vpop.f32.mrf.mxu0 }
 0x5a6   : > { %v2955_v8 = vadd.f32 %v2954_v6, %v2786_v63  ;;  %v3117_v13 = vadd.f32 %v3116_v31, %v7262_v35  ;;  %v3285_v52 = vpop.f32.mrf.mxu1 }
 0x5a8   : > { %v3762_v54 = vmax.f32 %v2955_v8, 0.0  ;;  %v7771_v59 = vadd.f32 %v3285_v52, %v3117_v13  ;;  %3343 = vmatmul.bf16.gmra.mxu2 %v8981_v10  ;;  %3995 = vmatmul.bf16.gmra.mxu0 %v7300_v53  ;;  %v5159_v8 = vld [vmem:[%s8425_s5 + $0x70] sm:$0xff]  ;;  %v5158_v52 = vld [vmem:[%s8425_s5 + $0x68] sm:$0xff] }
 0x5a9   : > { %3512 = vmatmul.bf16.gmra.mxu3 %v8982_v28  ;;  %4142 = vmatpush.bf16.msrb.mxu1 %v5159_v8  ;;  %v8986_v8 = vld [vmem:[#allocation93_spill] sm:$0xff] }
 0x5aa   : > { %v7776_v48 = vpack.c.bf16 %v3762_v54, %v3760_v47 }
 0x5ab   : > { %v2788_v7 = vpop.f32.mrf.mxu2 }
 0x5ac   : > { %v2789_v2 = vadd.f32 %v2788_v7, %v8983_v0  ;;  %v2957_v37 = vpop.f32.mrf.mxu3 }
 0x5ad   : > { %v7779_v63 = vpop.f32.mrf.mxu0  ;;  %4143 = vmatpush.bf16.msrb.mxu1 %v5158_v52  ;;  %v5156_v52 = vld [vmem:[%s8425_s5 + $0x58] sm:$0xff] }
 0x5ae   : > { %v2958_v6 = vadd.f32 %v2957_v37, %v2789_v2  ;;  %v7781_v31 = vpop.f32.mrf.mxu1  ;;  %v8985_v2 = vld [vmem:[#allocation92_spill] sm:$0xff] }
 0x5b0   : > { %v3764_v28 = vmax.f32 %v2958_v6, 0.0 }
 0x5b3   : > { %v2790_v49 = vpop.f32.mrf.mxu2 }
 0x5b4   : > { %v2791_v53 = vadd.f32 %v2790_v49, %v7224_v56  ;;  %v2959_v13 = vpop.f32.mrf.mxu3  ;;  %v5157_v56 = vld [vmem:[%s8425_s5 + $0x60] sm:$0xff] }
 0x5b5   : > { %v3121_v47 = vpop.f32.mrf.mxu0  ;;  %4144 = vmatpush.bf16.msrb.mxu1 %v5157_v56 }
 0x5b6   : > { %v2960_v54 = vadd.f32 %v2959_v13, %v2791_v53  ;;  %v3122_v10 = vadd.f32 %v3121_v47, %v7262_v35  ;;  %v3290_v37 = vpop.f32.mrf.mxu1 }
 0x5b8   : > { %v3766_v7 = vmax.f32 %v2960_v54, 0.0  ;;  %v7791_v0 = vadd.f32 %v3290_v37, %v3122_v10  ;;  %3348 = vmatmul.bf16.gmra.mxu2 %v8985_v2  ;;  %4000 = vmatmul.bf16.gmra.mxu0 %v7314_v42  ;;  %v5155_v10 = vld [vmem:[%s8425_s5 + $0x50] sm:$0xff] }
 0x5b9   : > { %3517 = vmatmul.bf16.gmra.mxu3 %v8986_v8  ;;  %4145 = vmatpush.bf16.msrb.mxu1 %v5156_v52 }
 0x5ba   : > { %8984 = vst [vmem:[#allocation30_spill] sm:$0xff] %v7791_v0  ;;  %v7799_v49 = vpack.c.bf16 %v3766_v7, %v3764_v28  ;;  %v5154_v7 = vld [vmem:[%s8425_s5 + $0x48] sm:$0xff] }
 0x5bb   : > { %v2793_v53 = vpop.f32.mrf.mxu2 }
 0x5bc   : > { %v2794_v13 = vadd.f32 %v2793_v53, %v7231_v39  ;;  %v2962_v6 = vpop.f32.mrf.mxu3 }
 0x5bd   : > { %v7805_v47 = vpop.f32.mrf.mxu0  ;;  %4146 = vmatpush.bf16.msrb.mxu1 %v5155_v10  ;;  %v8991_v10 = vld [vmem:[#allocation97_spill] sm:$0xff] }
 0x5be   : > { %8987 = vst [vmem:[#allocation31_spill] sm:$0xff] %v7805_v47  ;;  %v2963_v42 = vadd.f32 %v2962_v6, %v2794_v13  ;;  %v7807_v54 = vpop.f32.mrf.mxu1  ;;  %v9041_v47 = vld [vmem:[#allocation23_spill] sm:$0xff] }
 0x5bf   : > { %8988 = vst [vmem:[#allocation125_spill] sm:$0xff] %v7807_v54  ;;  %v8990_v54 = vld [vmem:[#allocation96_spill] sm:$0xff] }
 0x5c0   : > { %v3768_v13 = vmax.f32 %v2963_v42, 0.0 }
 0x5c1   : > { %4147 = vmatpush.bf16.msrb.mxu1 %v5154_v7 }
 0x5c3   : > { %v2795_v37 = vpop.f32.mrf.mxu2 }
 0x5c4   : > { %v2796_v28 = vadd.f32 %v2795_v37, %v7243_v9  ;;  %v2964_v39 = vpop.f32.mrf.mxu3  ;;  %v5153_v9 = vld [vmem:[%s8425_s5 + $0x40] sm:$0xff] }
 0x5c5   : > { %v3126_v2 = vpop.f32.mrf.mxu0  ;;  %4148 = vmatpush.bf16.msrb.mxu1 %v5153_v9 }
 0x5c6   : > { %v2965_v56 = vadd.f32 %v2964_v39, %v2796_v28  ;;  %v3127_v8 = vadd.f32 %v3126_v2, %v7262_v35  ;;  %v3295_v53 = vpop.f32.mrf.mxu1 }
 0x5c8   : > { %v3770_v6 = vmax.f32 %v2965_v56, 0.0  ;;  %v7817_v52 = vadd.f32 %v3295_v53, %v3127_v8  ;;  %3353 = vmatmul.bf16.gmra.mxu2 %v8990_v54  ;;  %4005 = vmatmul.bf16.gmra.mxu0 %v7328_v32 }
 0x5c9   : > { %3522 = vmatmul.bf16.gmra.mxu3 %v8991_v10 }
 0x5ca   : > { %8989 = vst [vmem:[#allocation127_spill] sm:$0xff] %v7817_v52  ;;  %v7825_v37 = vpack.c.bf16 %v3770_v6, %v3768_v13 }
 0x5cb   : > { %v2798_v28 = vpop.f32.mrf.mxu2 }
 0x5cc   : > { %v2799_v39 = vadd.f32 %v2798_v28, %v7247_v43  ;;  %v2967_v42 = vpop.f32.mrf.mxu3  ;;  %v8995_v43 = vld [vmem:[#allocation100_spill] sm:$0xff] }
 0x5cd   : > { %v7828_v7 = vpop.f32.mrf.mxu0 }
 0x5ce   : > { %8992 = vst [vmem:[#allocation34_spill] sm:$0xff] %v7828_v7  ;;  %v2968_v2 = vadd.f32 %v2967_v42, %v2799_v39  ;;  %v7830_v56 = vpop.f32.mrf.mxu1  ;;  %v9033_v7 = vld [vmem:[#allocation17_spill] sm:$0xff] }
 0x5cf   : > { %8993 = vst [vmem:[#allocation35_spill] sm:$0xff] %v7830_v56 }
 0x5d0   : > { %v3772_v13 = vmax.f32 %v2968_v2, 0.0 }
 0x5d3   : > { %v2800_v54 = vpop.f32.mrf.mxu2 }
 0x5d4   : > { %v2801_v32 = vadd.f32 %v2800_v54, %v7257_v22  ;;  %v2969_v8 = vpop.f32.mrf.mxu3 }
 0x5d5   : > { %v3131_v53 = vpop.f32.mrf.mxu0 }
 0x5d6   : > { %v2970_v52 = vadd.f32 %v2969_v8, %v2801_v32  ;;  %v3132_v10 = vadd.f32 %v3131_v53, %v7262_v35  ;;  %v3300_v9 = vpop.f32.mrf.mxu1 }
 0x5d8   : > { %v3774_v6 = vmax.f32 %v2970_v52, 0.0  ;;  %v7834_v0 = vadd.f32 %v3300_v9, %v3132_v10  ;;  %3358 = vmatmul.bf16.gmra.mxu2 %v6600_v4  ;;  %4010 = vmatmul.bf16.gmra.mxu0 %v7342_v29 }
 0x5d9   : > { %3527 = vmatmul.bf16.gmra.mxu3 %v8995_v43 }
 0x5da   : > { %8994 = vst [vmem:[#allocation128_spill] sm:$0xff] %v7834_v0  ;;  %v7839_v28 = vpack.c.bf16 %v3774_v6, %v3772_v13 }
 0x5db   : > { %v3319_v39 = vpop.f32.mrf.mxu2 }
 0x5dc   : > { %v3488_v22 = vpop.f32.mrf.mxu3  ;;  %v3320_v32 = vadd.f32 %v3319_v39, %v7266_v20 }
 0x5dd   : > { %v7841_v42 = vpop.f32.mrf.mxu0 }
 0x5de   : > { %8996 = vst [vmem:[#allocation130_spill] sm:$0xff] %v7841_v42  ;;  %v7843_v54 = vpop.f32.mrf.mxu1  ;;  %v3489_v52 = vadd.f32 %v3488_v22, %v3320_v32  ;;  %v9024_v42 = vld [vmem:[#allocation11_spill] sm:$0xff] }
 0x5df   : > { %8997 = vst [vmem:[#allocation38_spill] sm:$0xff] %v7843_v54  ;;  %v9019_v54 = vld [vmem:[#allocation10_spill] sm:$0xff] }
 0x5e0   : > { %v3649_v13 = vmax.f32 %v3489_v52, 0.0 }
 0x5e3   : > { %v3321_v2 = vpop.f32.mrf.mxu2 }
 0x5e4   : > { %v3322_v8 = vadd.f32 %v3321_v2, %v7276_v3  ;;  %v3490_v53 = vpop.f32.mrf.mxu3 }
 0x5e5   : > { %v3136_v4 = vpop.f32.mrf.mxu0 }
 0x5e6   : > { %v3491_v10 = vadd.f32 %v3490_v53, %v3322_v8  ;;  %v3137_v29 = vadd.f32 %v3136_v4, %v7262_v35  ;;  %v3305_v9 = vpop.f32.mrf.mxu1 }
 0x5e8   : > { %v3651_v6 = vmax.f32 %v3491_v10, 0.0  ;;  %v7848_v43 = vadd.f32 %v3305_v9, %v3137_v29  ;;  %3363 = vmatmul.bf16.gmra.mxu2 %v6620_v45  ;;  %4015 = vmatmul.bf16.gmra.mxu0 %v7356_v40 }
 0x5e9   : > { %3532 = vmatmul.bf16.gmra.mxu3 %v6625_v26  ;;  %v9000_v26 = vld [vmem:[#allocation105_spill] sm:$0xff] }
 0x5ea   : > { %8998 = vst [vmem:[#allocation39_spill] sm:$0xff] %v7848_v43  ;;  %v3777_v20 = vpack.c.bf16 %v3651_v6, %v3649_v13  ;;  %v9001_v6 = vld [vmem:[#allocation56_spill] sm:$0xff] }
 0x5eb   : > { %v3324_v39 = vpop.f32.mrf.mxu2  ;;  %v9011_v43 = vld [vmem:[#allocation8_spill] sm:$0xff] }
 0x5ec   : > { %v3493_v22 = vpop.f32.mrf.mxu3  ;;  %4149 = vmatmul.bf16.vlgmr.msrb.gmra.mxu1 %v3777_v20  ;;  %v3325_v32 = vadd.f32 %v3324_v39, %v7280_v60 }
 0x5ed   : > { %v7853_v3 = vpop.f32.mrf.mxu0 }
 0x5ee   : > { %8999 = vst [vmem:[#allocation131_spill] sm:$0xff] %v7853_v3  ;;  %v3494_v8 = vadd.f32 %v3493_v22, %v3325_v32  ;;  %v9002_v22 = vld [vmem:[#allocation57_spill] sm:$0xff] }
 0x5ef   : > { %v9015_v3 = vld [vmem:[#allocation9_spill] sm:$0xff] }
 0x5f0   : > { %v3653_v10 = vmax.f32 %v3494_v8, 0.0 }
 0x5f3   : > { %v3326_v2 = vpop.f32.mrf.mxu2 }
 0x5f4   : > { %v3327_v52 = vadd.f32 %v3326_v2, %v7290_v41  ;;  %v3495_v53 = vpop.f32.mrf.mxu3 }
 0x5f5   : > { %v7857_v4 = vpop.f32.mrf.mxu0 }
 0x5f6   : > { %v3496_v45 = vadd.f32 %v3495_v53, %v3327_v52  ;;  %v9003_v53 = vld [vmem:[#allocation6_spill] sm:$0xff] }
 0x5f8   : > { %v3655_v40 = vmax.f32 %v3496_v45, 0.0  ;;  %3368 = vmatmul.bf16.gmra.mxu2 %v6640_v33  ;;  %4020 = vmatmul.bf16.gmra.mxu0 %v7370_v12  ;;  %v9004_v45 = vld [vmem:[#allocation108_spill] sm:$0xff] }
 0x5f9   : > { %3537 = vmatmul.bf16.gmra.mxu3 %v9000_v26 }
 0x5fa   : > { %v3779_v29 = vpack.c.bf16 %v3655_v40, %v3653_v10 }
 0x5fb   : > { %v3329_v9 = vpop.f32.mrf.mxu2 }
 0x5fc   : > { %v3498_v13 = vpop.f32.mrf.mxu3  ;;  %4154 = vmatmul.bf16.gmra.mxu1 %v3779_v29  ;;  %v3330_v41 = vadd.f32 %v3329_v9, %v9001_v6  ;;  %v9005_v9 = vld [vmem:[#allocation60_spill] sm:$0xff] }
 0x5fd   : > { %v7862_v60 = vpop.f32.mrf.mxu0 }
 0x5fe   : > { %v3499_v39 = vadd.f32 %v3498_v13, %v3330_v41 }
 0x600   : > { %v3657_v52 = vmax.f32 %v3499_v39, 0.0 }
 0x603   : > { %v3331_v20 = vpop.f32.mrf.mxu2 }
 0x604   : > { %v3332_v32 = vadd.f32 %v3331_v20, %v9002_v22  ;;  %v3500_v2 = vpop.f32.mrf.mxu3  ;;  %v9006_v20 = vld [vmem:[#allocation63_spill] sm:$0xff] }
 0x605   : > { %v7866_v8 = vpop.f32.mrf.mxu0 }
 0x606   : > { %v3501_v33 = vadd.f32 %v3500_v2, %v3332_v32 }
 0x608   : > { %v3659_v12 = vmax.f32 %v3501_v33, 0.0  ;;  %3373 = vmatmul.bf16.gmra.mxu2 %v9003_v53  ;;  %4025 = vmatmul.bf16.gmra.mxu0 %v7384_v44  ;;  %v9007_v53 = vld [vmem:[#allocation7_spill] sm:$0xff] }
 0x609   : > { %3542 = vmatmul.bf16.gmra.mxu3 %v9004_v45 }
 0x60a   : > { %v3781_v10 = vpack.c.bf16 %v3659_v12, %v3657_v52  ;;  %v9008_v52 = vld [vmem:[#allocation111_spill] sm:$0xff] }
 0x60b   : > { %v3334_v40 = vpop.f32.mrf.mxu2 }
 0x60c   : > { %v3503_v26 = vpop.f32.mrf.mxu3  ;;  %4159 = vmatmul.bf16.gmra.mxu1 %v3781_v10  ;;  %v3335_v13 = vadd.f32 %v3334_v40, %v9005_v9 }
 0x60d   : > { %v7871_v29 = vpop.f32.mrf.mxu0 }
 0x60e   : > { %v3504_v41 = vadd.f32 %v3503_v26, %v3335_v13  ;;  %v9009_v26 = vld [vmem:[#allocation66_spill] sm:$0xff] }
 0x610   : > { %v3661_v33 = vmax.f32 %v3504_v41, 0.0 }
 0x613   : > { %v3336_v6 = vpop.f32.mrf.mxu2 }
 0x614   : > { %v3337_v22 = vadd.f32 %v3336_v6, %v9006_v20  ;;  %v3505_v39 = vpop.f32.mrf.mxu3  ;;  %v9010_v20 = vld [vmem:[#allocation69_spill] sm:$0xff] }
 0x615   : > { %v7875_v32 = vpop.f32.mrf.mxu0 }
 0x616   : > { %v3506_v2 = vadd.f32 %v3505_v39, %v3337_v22 }
 0x618   : > { %v3663_v44 = vmax.f32 %v3506_v2, 0.0  ;;  %3378 = vmatmul.bf16.gmra.mxu2 %v9007_v53  ;;  %4030 = vmatmul.bf16.gmra.mxu0 %v7398_v50 }
 0x619   : > { %3547 = vmatmul.bf16.gmra.mxu3 %v9008_v52 }
 0x61a   : > { %v3783_v12 = vpack.c.bf16 %v3663_v44, %v3661_v33  ;;  %v9012_v33 = vld [vmem:[#allocation114_spill] sm:$0xff] }
 0x61b   : > { %v3339_v45 = vpop.f32.mrf.mxu2 }
 0x61c   : > { %v3508_v10 = vpop.f32.mrf.mxu3  ;;  %4164 = vmatmul.bf16.gmra.mxu1 %v3783_v12  ;;  %v3340_v9 = vadd.f32 %v3339_v45, %v9009_v26 }
 0x61d   : > { %v7880_v40 = vpop.f32.mrf.mxu0 }
 0x61e   : > { %v3509_v6 = vadd.f32 %v3508_v10, %v3340_v9  ;;  %v9013_v10 = vld [vmem:[#allocation70_spill] sm:$0xff] }
 0x620   : > { %v3665_v53 = vmax.f32 %v3509_v6, 0.0 }
 0x623   : > { %v3341_v13 = vpop.f32.mrf.mxu2 }
 0x624   : > { %v3342_v22 = vadd.f32 %v3341_v13, %v9010_v20  ;;  %v3510_v41 = vpop.f32.mrf.mxu3  ;;  %v9014_v20 = vld [vmem:[#allocation91_spill] sm:$0xff] }
 0x625   : > { %v7884_v39 = vpop.f32.mrf.mxu0 }
 0x626   : > { %v3511_v2 = vadd.f32 %v3510_v41, %v3342_v22 }
 0x628   : > { %v3667_v50 = vmax.f32 %v3511_v2, 0.0  ;;  %3383 = vmatmul.bf16.gmra.mxu2 %v9011_v43  ;;  %4035 = vmatmul.bf16.gmra.mxu0 %v7412_v51 }
 0x629   : > { %3552 = vmatmul.bf16.gmra.mxu3 %v9012_v33 }
 0x62a   : > { %v3785_v44 = vpack.c.bf16 %v3667_v50, %v3665_v53  ;;  %v9016_v53 = vld [vmem:[#allocation117_spill] sm:$0xff] }
 0x62b   : > { %v3344_v52 = vpop.f32.mrf.mxu2 }
 0x62c   : > { %v3513_v12 = vpop.f32.mrf.mxu3  ;;  %4169 = vmatmul.bf16.gmra.mxu1 %v3785_v44  ;;  %v3345_v26 = vadd.f32 %v3344_v52, %v9013_v10 }
 0x62d   : > { %v7889_v45 = vpop.f32.mrf.mxu0 }
 0x62e   : > { %v3514_v13 = vadd.f32 %v3513_v12, %v3345_v26  ;;  %v9017_v12 = vld [vmem:[#allocation94_spill] sm:$0xff] }
 0x630   : > { %v3669_v2 = vmax.f32 %v3514_v13, 0.0 }
 0x633   : > { %v3346_v9 = vpop.f32.mrf.mxu2 }
 0x634   : > { %v3347_v22 = vadd.f32 %v3346_v9, %v9014_v20  ;;  %v3515_v6 = vpop.f32.mrf.mxu3  ;;  %v9018_v20 = vld [vmem:[#allocation73_spill] sm:$0xff] }
 0x635   : > { %v7893_v41 = vpop.f32.mrf.mxu0 }
 0x636   : > { %v3516_v43 = vadd.f32 %v3515_v6, %v3347_v22 }
 0x638   : > { %v3671_v51 = vmax.f32 %v3516_v43, 0.0  ;;  %3388 = vmatmul.bf16.gmra.mxu2 %v9015_v3  ;;  %4040 = vmatmul.bf16.gmra.mxu0 %v7426_v46 }
 0x639   : > { %3557 = vmatmul.bf16.gmra.mxu3 %v9016_v53 }
 0x63a   : > { %v3787_v50 = vpack.c.bf16 %v3671_v51, %v3669_v2  ;;  %v9020_v2 = vld [vmem:[#allocation85_spill] sm:$0xff]  ;;  %v9021_v51 = vld [vmem:[#allocation120_spill] sm:$0xff] }
 0x63b   : > { %v3349_v33 = vpop.f32.mrf.mxu2 }
 0x63c   : > { %v3518_v44 = vpop.f32.mrf.mxu3  ;;  %4174 = vmatmul.bf16.gmra.mxu1 %v3787_v50  ;;  %v3350_v10 = vadd.f32 %v3349_v33, %v9017_v12  ;;  %v9022_v33 = vld [vmem:[#allocation74_spill] sm:$0xff] }
 0x63d   : > { %v7898_v52 = vpop.f32.mrf.mxu0 }
 0x63e   : > { %v3519_v9 = vadd.f32 %v3518_v44, %v3350_v10 }
 0x640   : > { %v3673_v3 = vmax.f32 %v3519_v9, 0.0 }
 0x643   : > { %v3351_v26 = vpop.f32.mrf.mxu2 }
 0x644   : > { %v3352_v22 = vadd.f32 %v3351_v26, %v9018_v20  ;;  %v3520_v13 = vpop.f32.mrf.mxu3  ;;  %v9023_v20 = vld [vmem:[#allocation95_spill] sm:$0xff] }
 0x645   : > { %v7902_v43 = vpop.f32.mrf.mxu0 }
 0x646   : > { %v3521_v6 = vadd.f32 %v3520_v13, %v3352_v22 }
 0x648   : > { %v3675_v46 = vmax.f32 %v3521_v6, 0.0  ;;  %3393 = vmatmul.bf16.gmra.mxu2 %v9019_v54  ;;  %4045 = vmatmul.bf16.gmra.mxu0 %v9020_v2 }
 0x649   : > { %3562 = vmatmul.bf16.gmra.mxu3 %v9021_v51 }
 0x64a   : > { %v3789_v53 = vpack.c.bf16 %v3675_v46, %v3673_v3  ;;  %v9025_v3 = vld [vmem:[#allocation123_spill] sm:$0xff] }
 0x64b   : > { %v3354_v50 = vpop.f32.mrf.mxu2 }
 0x64c   : > { %v3523_v0 = vpop.f32.mrf.mxu3  ;;  %4179 = vmatmul.bf16.gmra.mxu1 %v3789_v53  ;;  %v3355_v44 = vadd.f32 %v3354_v50, %v9022_v33  ;;  %v9026_v50 = vld [vmem:[#allocation98_spill] sm:$0xff]  ;;  %v7917_v33 = vpop.f32.mrf.mxu1 }
 0x64d   : > { %v7908_v12 = vpop.f32.mrf.mxu0  ;;  %9027 = vst [vmem:[#allocation133_spill] sm:$0xff] %v7917_v33 }
 0x64e   : > { %v3524_v26 = vadd.f32 %v3523_v0, %v3355_v44 }
 0x650   : > { %v3677_v6 = vmax.f32 %v3524_v26, 0.0  ;;  %v9028_v26 = vld [vmem:[#allocation77_spill] sm:$0xff] }
 0x653   : > { %v3356_v10 = vpop.f32.mrf.mxu2 }
 0x654   : > { %v3357_v22 = vadd.f32 %v3356_v10, %v9023_v20  ;;  %v3525_v9 = vpop.f32.mrf.mxu3  ;;  %v7922_v10 = vld [vmem:[%s8426_s6] ss:$0 sm:$0xff] }
 0x655   : > { %v7914_v46 = vpop.f32.mrf.mxu0 }
 0x656   : > { %v3526_v13 = vadd.f32 %v3525_v9, %v3357_v22 }
 0x658   : > { %v3679_v54 = vmax.f32 %v3526_v13, 0.0  ;;  %3398 = vmatmul.bf16.gmra.mxu2 %v9024_v42  ;;  %4050 = vmatmul.bf16.gmra.mxu0 %v7454_v5  ;;  %v3982_v13 = vadd.f32 %v7922_v10, %v7857_v4  ;;  %v3984_v4 = vadd.f32 %v7922_v10, %v7862_v60  ;;  %v9034_v60 = vld [vmem:[#allocation129_spill] sm:$0xff] }
 0x659   : > { %3567 = vmatmul.bf16.gmra.mxu3 %v9025_v3  ;;  %v9029_v3 = vld [vmem:[#allocation14_spill] sm:$0xff] }
 0x65a   : > { %v3791_v2 = vpack.c.bf16 %v3679_v54, %v3677_v6 }
 0x65b   : > { %v3359_v51 = vpop.f32.mrf.mxu2 }
 0x65c   : > { %v3528_v53 = vpop.f32.mrf.mxu3  ;;  %4184 = vmatmul.bf16.gmra.mxu1 %v3791_v2  ;;  %v3360_v0 = vadd.f32 %v3359_v51, %v9026_v50  ;;  %v9030_v2 = vld [vmem:[#allocation126_spill] sm:$0xff] }
 0x65d   : > { %v7924_v5 = vpop.f32.mrf.mxu0 }
 0x65e   : > { %v3529_v42 = vadd.f32 %v3528_v53, %v3360_v0 }
 0x660   : > { %v3681_v6 = vmax.f32 %v3529_v42, 0.0  ;;  %v9031_v42 = vld [vmem:[#allocation78_spill] sm:$0xff] }
 0x663   : > { %v3361_v44 = vpop.f32.mrf.mxu2 }
 0x664   : > { %v3362_v20 = vadd.f32 %v3361_v44, %v9028_v26  ;;  %v3530_v22 = vpop.f32.mrf.mxu3 }
 0x665   : > { %v7934_v44 = vpop.f32.mrf.mxu0 }
 0x666   : > { %v3531_v9 = vadd.f32 %v3530_v22, %v3362_v20 }
 0x668   : > { %v3683_v54 = vmax.f32 %v3531_v9, 0.0  ;;  %3403 = vmatmul.bf16.gmra.mxu2 %v9029_v3  ;;  %4055 = vmatmul.bf16.gmra.mxu0 %v7468_v19  ;;  %v9032_v3 = vld [vmem:[#allocation99_spill] sm:$0xff] }
 0x669   : > { %3572 = vmatmul.bf16.gmra.mxu3 %v9030_v2  ;;  %v4150_v51 = vpop.f32.mrf.mxu1 }
 0x66a   : > { %v7932_v50 = vadd.f32 %v4150_v51, %v3982_v13  ;;  %v3793_v53 = vpack.c.bf16 %v3683_v54, %v3681_v6  ;;  %v3987_v6 = vadd.f32 %v7922_v10, %v7866_v8  ;;  %v3989_v8 = vadd.f32 %v7922_v10, %v7871_v29  ;;  %v9038_v29 = vld [vmem:[#allocation132_spill] sm:$0xff] }
 0x66b   : > { %v3364_v0 = vpop.f32.mrf.mxu2 }
 0x66c   : > { %v3533_v33 = vpop.f32.mrf.mxu3  ;;  %4189 = vmatmul.bf16.gmra.mxu1 %v3793_v53  ;;  %v3365_v26 = vadd.f32 %v3364_v0, %v9031_v42 }
 0x66d   : > { %v7944_v53 = vpop.f32.mrf.mxu0 }
 0x66e   : > { %v3534_v9 = vadd.f32 %v3533_v33, %v3365_v26 }
 0x670   : > { %v3685_v54 = vmax.f32 %v3534_v9, 0.0 }
 0x671   : > { %v4152_v20 = vpop.f32.mrf.mxu1 }
 0x672   : > { %v7939_v22 = vadd.f32 %v4152_v20, %v3984_v4  ;;  %v9035_v20 = vld [vmem:[#allocation101_spill] sm:$0xff] }
 0x673   : > { %v3366_v19 = vpop.f32.mrf.mxu2 }
 0x674   : > { %v3367_v2 = vadd.f32 %v3366_v19, %v9032_v3  ;;  %v3535_v13 = vpop.f32.mrf.mxu3 }
 0x675   : > { %v7954_v3 = vpop.f32.mrf.mxu0 }
 0x676   : > { %v3536_v51 = vadd.f32 %v3535_v13, %v3367_v2  ;;  %v9036_v13 = vld [vmem:[#allocation81_spill] sm:$0xff] }
 0x678   : > { %v3687_v56 = vmax.f32 %v3536_v51, 0.0  ;;  %3408 = vmatmul.bf16.gmra.mxu2 %v9033_v7  ;;  %4060 = vmatmul.bf16.gmra.mxu0 %v7482_v38 }
 0x679   : > { %3577 = vmatmul.bf16.gmra.mxu3 %v9034_v60  ;;  %v4155_v0 = vpop.f32.mrf.mxu1 }
 0x67a   : > { %v7949_v4 = vadd.f32 %v4155_v0, %v3987_v6  ;;  %v3795_v33 = vpack.c.bf16 %v3687_v56, %v3685_v54  ;;  %v3992_v56 = vadd.f32 %v7922_v10, %v7875_v32  ;;  %v3994_v32 = vadd.f32 %v7922_v10, %v7880_v40  ;;  %v9042_v40 = vld [vmem:[#allocation135_spill] sm:$0xff] }
 0x67b   : > { %v3369_v42 = vpop.f32.mrf.mxu2 }
 0x67c   : > { %v3538_v26 = vpop.f32.mrf.mxu3  ;;  %4194 = vmatmul.bf16.gmra.mxu1 %v3795_v33  ;;  %v3370_v19 = vadd.f32 %v3369_v42, %v9035_v20  ;;  %v9037_v33 = vld [vmem:[#allocation20_spill] sm:$0xff] }
 0x67e   : > { %v3539_v2 = vadd.f32 %v3538_v26, %v3370_v19  ;;  %v7966_v19 = vpop.f32.mrf.mxu0 }
 0x680   : > { %v3689_v54 = vmax.f32 %v3539_v2, 0.0 }
 0x681   : > { %v4157_v9 = vpop.f32.mrf.mxu1 }
 0x682   : > { %v7956_v7 = vadd.f32 %v4157_v9, %v3989_v8 }
 0x683   : > { %v3371_v38 = vpop.f32.mrf.mxu2 }
 0x684   : > { %v3372_v51 = vadd.f32 %v3371_v38, %v9036_v13  ;;  %v3540_v6 = vpop.f32.mrf.mxu3  ;;  %v9039_v38 = vld [vmem:[#allocation82_spill] sm:$0xff] }
 0x686   : > { %v3541_v60 = vadd.f32 %v3540_v6, %v3372_v51 }
 0x688   : > { %v3691_v0 = vmax.f32 %v3541_v60, 0.0  ;;  %3413 = vmatmul.bf16.gmra.mxu2 %v9037_v33  ;;  %4065 = vmatmul.bf16.gmra.mxu0 %v7502_v21  ;;  %v9040_v60 = vld [vmem:[#allocation102_spill] sm:$0xff] }
 0x689   : > { %3582 = vmatmul.bf16.gmra.mxu3 %v9038_v29  ;;  %v4160_v42 = vpop.f32.mrf.mxu1  ;;  %v7974_v29 = vpop.f32.mrf.mxu0 }
 0x68a   : > { %v7964_v8 = vadd.f32 %v4160_v42, %v3992_v56  ;;  %v3797_v20 = vpack.c.bf16 %v3691_v0, %v3689_v54  ;;  %v3997_v0 = vadd.f32 %v7922_v10, %v7884_v39  ;;  %v9043_v39 = vld [vmem:[#allocation103_spill] sm:$0xff] }
 0x68b   : > { %v3374_v26 = vpop.f32.mrf.mxu2 }
 0x68c   : > { %v3543_v9 = vpop.f32.mrf.mxu3  ;;  %4199 = vmatmul.bf16.gmra.mxu1 %v3797_v20  ;;  %v3375_v2 = vadd.f32 %v3374_v26, %v9039_v38 }
 0x68e   : > { %v3544_v6 = vadd.f32 %v3543_v9, %v3375_v2 }
 0x690   : > { %v3693_v42 = vmax.f32 %v3544_v6, 0.0 }
 0x691   : > { %v4162_v13 = vpop.f32.mrf.mxu1 }
 0x692   : > { %v7971_v51 = vadd.f32 %v4162_v13, %v3994_v32  ;;  %v3999_v13 = vadd.f32 %v7922_v10, %v7889_v45  ;;  %v9045_v45 = vld [vmem:[#allocation138_spill] sm:$0xff] }
 0x693   : > { %v3376_v21 = vpop.f32.mrf.mxu2 }
 0x694   : > { %v3377_v33 = vadd.f32 %v3376_v21, %v9040_v60  ;;  %v3545_v56 = vpop.f32.mrf.mxu3  ;;  %v7985_v21 = vpop.f32.mrf.mxu0 }
 0x696   : > { %v3546_v54 = vadd.f32 %v3545_v56, %v3377_v33 }
 0x698   : > { %v3695_v20 = vmax.f32 %v3546_v54, 0.0  ;;  %3418 = vmatmul.bf16.gmra.mxu2 %v9041_v47  ;;  %4070 = vmatmul.bf16.gmra.mxu0 %v7522_v1 }
 0x699   : > { %3587 = vmatmul.bf16.gmra.mxu3 %v9042_v40  ;;  %v4165_v26 = vpop.f32.mrf.mxu1 }
 0x69a   : > { %v7981_v32 = vadd.f32 %v4165_v26, %v3997_v0  ;;  %v3799_v9 = vpack.c.bf16 %v3695_v20, %v3693_v42  ;;  %v4002_v42 = vadd.f32 %v7922_v10, %v7893_v41  ;;  %v9044_v26 = vld [vmem:[#allocation26_spill] sm:$0xff]  ;;  %v4004_v41 = vadd.f32 %v7922_v10, %v7898_v52  ;;  %v9048_v52 = vld [vmem:[#allocation141_spill] sm:$0xff] }
 0x69b   : > { %v3379_v38 = vpop.f32.mrf.mxu2 }
 0x69c   : > { %v3548_v2 = vpop.f32.mrf.mxu3  ;;  %4204 = vmatmul.bf16.gmra.mxu1 %v3799_v9  ;;  %v3380_v6 = vadd.f32 %v3379_v38, %v9043_v39  ;;  %v7996_v38 = vpop.f32.mrf.mxu0 }
 0x69e   : > { %v3549_v33 = vadd.f32 %v3548_v2, %v3380_v6  ;;  %v9046_v6 = vld [vmem:[#allocation86_spill] sm:$0xff] }
 0x6a0   : > { %v3697_v20 = vmax.f32 %v3549_v33, 0.0 }
 0x6a1   : > { %v4167_v60 = vpop.f32.mrf.mxu1 }
 0x6a2   : > { %v7988_v47 = vadd.f32 %v4167_v60, %v3999_v13 }
 0x6a3   : > { %v3381_v1 = vpop.f32.mrf.mxu2 }
 0x6a4   : > { %v3382_v56 = vadd.f32 %v3381_v1, %v7444_v61  ;;  %v3550_v54 = vpop.f32.mrf.mxu3 }
 0x6a6   : > { %v3551_v0 = vadd.f32 %v3550_v54, %v3382_v56  ;;  %v8005_v56 = vpop.f32.mrf.mxu0 }
 0x6a8   : > { %v3699_v40 = vmax.f32 %v3551_v0, 0.0  ;;  %3423 = vmatmul.bf16.gmra.mxu2 %v9044_v26  ;;  %4075 = vmatmul.bf16.gmra.mxu0 %v7536_v17 }
 0x6a9   : > { %3592 = vmatmul.bf16.gmra.mxu3 %v9045_v45  ;;  %v4170_v9 = vpop.f32.mrf.mxu1 }
 0x6aa   : > { %v7998_v13 = vadd.f32 %v4170_v9, %v4002_v42  ;;  %v3801_v2 = vpack.c.bf16 %v3699_v40, %v3697_v20  ;;  %v4007_v20 = vadd.f32 %v7922_v10, %v7902_v43  ;;  %v9047_v9 = vld [vmem:[#allocation29_spill] sm:$0xff]  ;;  %v4009_v43 = vadd.f32 %v7922_v10, %v7908_v12 }
 0x6ab   : > { %v3384_v61 = vpop.f32.mrf.mxu2  ;;  %v9051_v12 = vld [vmem:[#allocation145_spill] sm:$0xff] }
 0x6ac   : > { %v3553_v39 = vpop.f32.mrf.mxu3  ;;  %4209 = vmatmul.bf16.gmra.mxu1 %v3801_v2  ;;  %v3385_v60 = vadd.f32 %v3384_v61, %v9046_v6 }
 0x6ae   : > { %v3554_v54 = vadd.f32 %v3553_v39, %v3385_v60  ;;  %v9049_v60 = vld [vmem:[#allocation104_spill] sm:$0xff] }
 0x6b0   : > { %v3701_v40 = vmax.f32 %v3554_v54, 0.0 }
 0x6b1   : > { %v4172_v1 = vpop.f32.mrf.mxu1 }
 0x6b2   : > { %v8003_v33 = vadd.f32 %v4172_v1, %v4004_v41 }
 0x6b3   : > { %v3386_v17 = vpop.f32.mrf.mxu2 }
 0x6b4   : > { %v3387_v0 = vadd.f32 %v3386_v17, %v7458_v15  ;;  %v3555_v42 = vpop.f32.mrf.mxu3  ;;  %v8015_v15 = vpop.f32.mrf.mxu0 }
 0x6b6   : > { %v3556_v26 = vadd.f32 %v3555_v42, %v3387_v0 }
 0x6b8   : > { %v3703_v45 = vmax.f32 %v3556_v26, 0.0  ;;  %3428 = vmatmul.bf16.gmra.mxu2 %v9047_v9  ;;  %4080 = vmatmul.bf16.gmra.mxu0 %v7598_v23 }
 0x6b9   : > { %3597 = vmatmul.bf16.gmra.mxu3 %v9048_v52  ;;  %v4175_v2 = vpop.f32.mrf.mxu1 }
 0x6ba   : > { %v8013_v61 = vadd.f32 %v4175_v2, %v4007_v20  ;;  %v3803_v41 = vpack.c.bf16 %v3703_v45, %v3701_v40  ;;  %v4012_v40 = vadd.f32 %v7922_v10, %v7914_v46  ;;  %v9050_v2 = vld [vmem:[#allocation144_spill] sm:$0xff]  ;;  %v4014_v46 = vadd.f32 %v7922_v10, %v7924_v5  ;;  %v9054_v5 = vld [vmem:[#allocation149_spill] sm:$0xff] }
 0x6bb   : > { %v3389_v39 = vpop.f32.mrf.mxu2 }
 0x6bc   : > { %v3558_v6 = vpop.f32.mrf.mxu3  ;;  %4214 = vmatmul.bf16.gmra.mxu1 %v3803_v41  ;;  %v3390_v1 = vadd.f32 %v3389_v39, %v9049_v60  ;;  %v8025_v45 = vpop.f32.mrf.mxu0  ;;  %v9052_v60 = vld [vmem:[#allocation106_spill] sm:$0xff] }
 0x6be   : > { %v3559_v0 = vadd.f32 %v3558_v6, %v3390_v1 }
 0x6c0   : > { %v3705_v9 = vmax.f32 %v3559_v0, 0.0 }
 0x6c1   : > { %v4177_v17 = vpop.f32.mrf.mxu1 }
 0x6c2   : > { %v8020_v54 = vadd.f32 %v4177_v17, %v4009_v43 }
 0x6c3   : > { %v3391_v23 = vpop.f32.mrf.mxu2 }
 0x6c4   : > { %v3392_v42 = vadd.f32 %v3391_v23, %v7472_v14  ;;  %v3560_v26 = vpop.f32.mrf.mxu3  ;;  %v8035_v23 = vpop.f32.mrf.mxu0 }
 0x6c6   : > { %v3561_v20 = vadd.f32 %v3560_v26, %v3392_v42 }
 0x6c8   : > { %v3707_v52 = vmax.f32 %v3561_v20, 0.0  ;;  %3433 = vmatmul.bf16.gmra.mxu2 %v9050_v2  ;;  %4085 = vmatmul.bf16.gmra.mxu0 %v7651_v30 }
 0x6c9   : > { %3602 = vmatmul.bf16.gmra.mxu3 %v9051_v12  ;;  %v4180_v41 = vpop.f32.mrf.mxu1  ;;  %v9053_v12 = vld [vmem:[#allocation148_spill] sm:$0xff] }
 0x6ca   : > { %v8030_v39 = vadd.f32 %v4180_v41, %v4012_v40  ;;  %v3805_v6 = vpack.c.bf16 %v3707_v52, %v3705_v9  ;;  %v4017_v9 = vadd.f32 %v7922_v10, %v7934_v44  ;;  %v4019_v44 = vadd.f32 %v7922_v10, %v7944_v53 }
 0x6cb   : > { %v3394_v14 = vpop.f32.mrf.mxu2 }
 0x6cc   : > { %v3563_v43 = vpop.f32.mrf.mxu3  ;;  %4219 = vmatmul.bf16.gmra.mxu1 %v3805_v6  ;;  %v3395_v1 = vadd.f32 %v3394_v14, %v9052_v60 }
 0x6ce   : > { %v3564_v42 = vadd.f32 %v3563_v43, %v3395_v1 }
 0x6d0   : > { %v3709_v52 = vmax.f32 %v3564_v42, 0.0  ;;  %v9055_v42 = vld [vmem:[#allocation89_spill] sm:$0xff] }
 0x6d1   : > { %v4182_v17 = vpop.f32.mrf.mxu1 }
 0x6d2   : > { %v8037_v0 = vadd.f32 %v4182_v17, %v4014_v46  ;;  %v8047_v46 = vpop.f32.mrf.mxu0 }
 0x6d3   : > { %v3396_v30 = vpop.f32.mrf.mxu2 }
 0x6d4   : > { %v3397_v26 = vadd.f32 %v3396_v30, %v7486_v18  ;;  %v3565_v20 = vpop.f32.mrf.mxu3 }
 0x6d6   : > { %v3566_v40 = vadd.f32 %v3565_v20, %v3397_v26 }
 0x6d8   : > { %v3711_v2 = vmax.f32 %v3566_v40, 0.0  ;;  %3438 = vmatmul.bf16.gmra.mxu2 %v9053_v12  ;;  %4090 = vmatmul.bf16.gmra.mxu0 %v7678_v55 }
 0x6d9   : > { %3607 = vmatmul.bf16.gmra.mxu3 %v9054_v5  ;;  %v4185_v41 = vpop.f32.mrf.mxu1  ;;  %v9056_v5 = vld [vmem:[#allocation12_spill] sm:$0xff] }
 0x6da   : > { %v8045_v6 = vadd.f32 %v4185_v41, %v4017_v9  ;;  %v3807_v14 = vpack.c.bf16 %v3711_v2, %v3709_v52  ;;  %v8055_v40 = vpop.f32.mrf.mxu0  ;;  %v4022_v52 = vadd.f32 %v7922_v10, %v7954_v3  ;;  %v9058_v3 = vld [vmem:[#allocation90_spill] sm:$0xff] }
 0x6db   : > { %v3399_v43 = vpop.f32.mrf.mxu2 }
 0x6dc   : > { %v3568_v18 = vpop.f32.mrf.mxu3  ;;  %4224 = vmatmul.bf16.gmra.mxu1 %v3807_v14  ;;  %v3400_v60 = vadd.f32 %v3399_v43, %v7490_v27  ;;  %v9057_v27 = vld [vmem:[#allocation13_spill] sm:$0xff] }
 0x6de   : > { %v3569_v30 = vadd.f32 %v3568_v18, %v3400_v60 }
 0x6e0   : > { %v3713_v2 = vmax.f32 %v3569_v30, 0.0 }
 0x6e1   : > { %v4187_v1 = vpop.f32.mrf.mxu1 }
 0x6e2   : > { %v8052_v17 = vadd.f32 %v4187_v1, %v4019_v44  ;;  %v4024_v44 = vadd.f32 %v7922_v10, %v7966_v19  ;;  %v8066_v60 = vpop.f32.mrf.mxu0  ;;  %v9060_v19 = vld [vmem:[#allocation33_spill] sm:$0xff] }
 0x6e3   : > { %v3401_v55 = vpop.f32.mrf.mxu2 }
 0x6e4   : > { %v3402_v26 = vadd.f32 %v3401_v55, %v9055_v42  ;;  %v3570_v20 = vpop.f32.mrf.mxu3 }
 0x6e6   : > { %v3571_v9 = vadd.f32 %v3570_v20, %v3402_v26 }
 0x6e8   : > { %v3715_v12 = vmax.f32 %v3571_v9, 0.0  ;;  %3443 = vmatmul.bf16.gmra.mxu2 %v9056_v5  ;;  %4095 = vmatmul.bf16.gmra.mxu0 %v7702_v24  ;;  %v9059_v5 = vld [vmem:[#allocation32_spill] sm:$0xff] }
 0x6e9   : > { %3612 = vmatmul.bf16.gmra.mxu3 %v9057_v27  ;;  %v4190_v53 = vpop.f32.mrf.mxu1 }
 0x6ea   : > { %v8062_v41 = vadd.f32 %v4190_v53, %v4022_v52  ;;  %v3809_v14 = vpack.c.bf16 %v3715_v12, %v3713_v2  ;;  %v4027_v52 = vadd.f32 %v7922_v10, %v7974_v29  ;;  %v8077_v53 = vpop.f32.mrf.mxu0  ;;  %v4029_v29 = vadd.f32 %v7922_v10, %v7985_v21 }
 0x6eb   : > { %v3404_v43 = vpop.f32.mrf.mxu2 }
 0x6ec   : > { %v3573_v18 = vpop.f32.mrf.mxu3  ;;  %4229 = vmatmul.bf16.gmra.mxu1 %v3809_v14  ;;  %v3405_v1 = vadd.f32 %v3404_v43, %v9058_v3 }
 0x6ee   : > { %v3574_v42 = vadd.f32 %v3573_v18, %v3405_v1 }
 0x6f0   : > { %v3717_v2 = vmax.f32 %v3574_v42, 0.0 }
 0x6f1   : > { %v4192_v55 = vpop.f32.mrf.mxu1 }
 0x6f2   : > { %v8069_v30 = vadd.f32 %v4192_v55, %v4024_v44  ;;  %v8086_v55 = vpop.f32.mrf.mxu0 }
 0x6f3   : > { %v3406_v24 = vpop.f32.mrf.mxu2 }
 0x6f4   : > { %v3407_v26 = vadd.f32 %v3406_v24, %v7526_v57  ;;  %v3575_v20 = vpop.f32.mrf.mxu3 }
 0x6f6   : > { %v3576_v9 = vadd.f32 %v3575_v20, %v3407_v26 }
 0x6f8   : > { %v3719_v12 = vmax.f32 %v3576_v9, 0.0  ;;  %3448 = vmatmul.bf16.gmra.mxu2 %v9059_v5  ;;  %4100 = vmatmul.bf16.gmra.mxu0 %v7717_v58  ;;  %v4032_v9 = vadd.f32 %v7922_v10, %v7996_v38  ;;  %v4034_v38 = vadd.f32 %v7922_v10, %v8005_v56  ;;  %v9066_v56 = vld [vmem:[#allocation41_spill] sm:$0xff] }
 0x6f9   : > { %3617 = vmatmul.bf16.gmra.mxu3 %v9060_v19  ;;  %v4195_v27 = vpop.f32.mrf.mxu1 }
 0x6fa   : > { %v8079_v14 = vadd.f32 %v4195_v27, %v4027_v52  ;;  %v3811_v43 = vpack.c.bf16 %v3719_v12, %v3717_v2  ;;  %v9061_v12 = vld [vmem:[#allocation36_spill] sm:$0xff] }
 0x6fb   : > { %v3409_v57 = vpop.f32.mrf.mxu2 }
 0x6fc   : > { %v3578_v18 = vpop.f32.mrf.mxu3  ;;  %4234 = vmatmul.bf16.gmra.mxu1 %v3811_v43  ;;  %v3410_v44 = vadd.f32 %v3409_v57, %v7530_v11  ;;  %v9062_v11 = vld [vmem:[#allocation37_spill] sm:$0xff]  ;;  %v9063_v57 = vld [vmem:[#allocation107_spill] sm:$0xff] }
 0x6fe   : > { %v3579_v24 = vadd.f32 %v3578_v18, %v3410_v44 }
 0x700   : > { %v3721_v52 = vmax.f32 %v3579_v24, 0.0 }
 0x701   : > { %v4197_v3 = vpop.f32.mrf.mxu1 }
 0x702   : > { %v8084_v1 = vadd.f32 %v4197_v3, %v4029_v29 }
 0x703   : > { %v3411_v58 = vpop.f32.mrf.mxu2 }
 0x704   : > { %v3412_v42 = vadd.f32 %v3411_v58, %v7561_v25  ;;  %v3580_v26 = vpop.f32.mrf.mxu3  ;;  %v8096_v25 = vpop.f32.mrf.mxu0  ;;  %v9064_v58 = vld [vmem:[#allocation109_spill] sm:$0xff] }
 0x706   : > { %v3581_v20 = vadd.f32 %v3580_v26, %v3412_v42 }
 0x708   : > { %v3723_v2 = vmax.f32 %v3581_v20, 0.0  ;;  %3453 = vmatmul.bf16.gmra.mxu2 %v9061_v12  ;;  %4105 = vmatmul.bf16.gmra.mxu0 %v7731_v34  ;;  %v4037_v20 = vadd.f32 %v7922_v10, %v8015_v15  ;;  %v9065_v12 = vld [vmem:[#allocation40_spill] sm:$0xff] }
 0x709   : > { %3622 = vmatmul.bf16.gmra.mxu3 %v9062_v11  ;;  %v4200_v21 = vpop.f32.mrf.mxu1 }
 0x70a   : > { %v8094_v5 = vadd.f32 %v4200_v21, %v4032_v9  ;;  %v3813_v19 = vpack.c.bf16 %v3723_v2, %v3721_v52 }
 0x70b   : > { %v3414_v27 = vpop.f32.mrf.mxu2 }
 0x70c   : > { %v3583_v43 = vpop.f32.mrf.mxu3  ;;  %4239 = vmatmul.bf16.gmra.mxu1 %v3813_v19  ;;  %v3415_v18 = vadd.f32 %v3414_v27, %v9063_v57  ;;  %v8106_v9 = vpop.f32.mrf.mxu0  ;;  %v4039_v57 = vadd.f32 %v7922_v10, %v8025_v45  ;;  %v9070_v45 = vld [vmem:[#allocation44_spill] sm:$0xff] }
 0x70e   : > { %v3584_v3 = vadd.f32 %v3583_v43, %v3415_v18  ;;  %v9068_v18 = vld [vmem:[#allocation15_spill] sm:$0xff] }
 0x710   : > { %v3725_v52 = vmax.f32 %v3584_v3, 0.0  ;;  %v9069_v3 = vld [vmem:[#allocation110_spill] sm:$0xff] }
 0x711   : > { %v4202_v29 = vpop.f32.mrf.mxu1 }
 0x712   : > { %v8101_v44 = vadd.f32 %v4202_v29, %v4034_v38  ;;  %v9067_v38 = vld [vmem:[#allocation16_spill] sm:$0xff] }
 0x713   : > { %v3416_v34 = vpop.f32.mrf.mxu2  ;;  %v3084_v15 = vadd.f32 %v9067_v38, %v7262_v35 }
 0x714   : > { %v3417_v24 = vadd.f32 %v3416_v34, %v9064_v58  ;;  %v3585_v42 = vpop.f32.mrf.mxu3  ;;  %v8119_v58 = vpop.f32.mrf.mxu0 }
 0x716   : > { %v3586_v26 = vadd.f32 %v3585_v42, %v3417_v24 }
 0x718   : > { %v3727_v2 = vmax.f32 %v3586_v26, 0.0  ;;  %3458 = vmatmul.bf16.gmra.mxu2 %v9065_v12  ;;  %4110 = vmatmul.bf16.gmra.mxu0 %v7745_v16  ;;  %v3253_v16 = vadd.f32 %v9069_v3, %v3084_v15  ;;  %v4042_v12 = vadd.f32 %v7922_v10, %v8035_v23  ;;  %v9073_v3 = vld [vmem:[#allocation112_spill] sm:$0xff] }
 0x719   : > { %3627 = vmatmul.bf16.gmra.mxu3 %v9066_v56  ;;  %v4205_v11 = vpop.f32.mrf.mxu1 }
 0x71a   : > { %v8111_v21 = vadd.f32 %v4205_v11, %v4037_v20  ;;  %v3815_v19 = vpack.c.bf16 %v3727_v2, %v3725_v52 }
 0x71b   : > { %v3419_v27 = vpop.f32.mrf.mxu2 }
 0x71c   : > { %v3588_v43 = vpop.f32.mrf.mxu3  ;;  %4244 = vmatmul.bf16.gmra.mxu1 %v3815_v19  ;;  %v3420_v29 = vadd.f32 %v3419_v27, %v9068_v18  ;;  %v9071_v19 = vld [vmem:[#allocation45_spill] sm:$0xff] }
 0x71e   : > { %v3589_v26 = vadd.f32 %v3588_v43, %v3420_v29  ;;  %v8130_v43 = vpop.f32.mrf.mxu0  ;;  %v9072_v29 = vld [vmem:[#allocation18_spill] sm:$0xff] }
 0x71f   : > { %v3089_v23 = vadd.f32 %v9072_v29, %v7262_v35 }
 0x720   : > { %v3729_v56 = vmax.f32 %v3589_v26, 0.0 }
 0x721   : > { %v4207_v34 = vpop.f32.mrf.mxu1 }
 0x722   : > { %v8121_v24 = vadd.f32 %v4207_v34, %v4039_v57  ;;  %v4044_v34 = vadd.f32 %v7922_v10, %v8047_v46  ;;  %v9075_v46 = vld [vmem:[#allocation48_spill] sm:$0xff] }
 0x723   : > { %v3421_v42 = vpop.f32.mrf.mxu2 }
 0x724   : > { %v3422_v20 = vadd.f32 %v3421_v42, %v3253_v16  ;;  %v3590_v52 = vpop.f32.mrf.mxu3  ;;  %v9074_v42 = vld [vmem:[#allocation19_spill] sm:$0xff] }
 0x725   : > { %v3258_v26 = vadd.f32 %v9074_v42, %v3089_v23 }
 0x726   : > { %v3591_v2 = vadd.f32 %v3590_v52, %v3422_v20 }
 0x728   : > { %v3731_v11 = vmax.f32 %v3591_v2, 0.0  ;;  %3463 = vmatmul.bf16.gmra.mxu2 %v9070_v45  ;;  %4115 = vmatmul.bf16.gmra.mxu0 %v7762_v36 }
 0x729   : > { %3632 = vmatmul.bf16.gmra.mxu3 %v9071_v19  ;;  %v4210_v27 = vpop.f32.mrf.mxu1  ;;  %v4047_v19 = vadd.f32 %v7922_v10, %v8055_v40  ;;  %v4049_v40 = vadd.f32 %v7922_v10, %v8066_v60  ;;  %v9081_v60 = vld [vmem:[#allocation52_spill] sm:$0xff] }
 0x72a   : > { %v3817_v38 = vpack.c.bf16 %v3731_v11, %v3729_v56  ;;  %v8128_v15 = vadd.f32 %v4210_v27, %v4042_v12  ;;  %v8140_v11 = vpop.f32.mrf.mxu0 }
 0x72b   : > { %v3424_v57 = vpop.f32.mrf.mxu2 }
 0x72c   : > { %v3593_v18 = vpop.f32.mrf.mxu3  ;;  %4249 = vmatmul.bf16.gmra.mxu1 %v3817_v38  ;;  %v3425_v16 = vadd.f32 %v3424_v57, %v9073_v3  ;;  %v9076_v57 = vld [vmem:[#allocation49_spill] sm:$0xff] }
 0x72e   : > { %v3594_v2 = vadd.f32 %v3593_v18, %v3425_v16  ;;  %v9078_v16 = vld [vmem:[#allocation115_spill] sm:$0xff] }
 0x730   : > { %v3733_v27 = vmax.f32 %v3594_v2, 0.0  ;;  %v9080_v2 = vld [vmem:[#allocation21_spill] sm:$0xff] }
 0x731   : > { %v4212_v36 = vpop.f32.mrf.mxu1 }
 0x732   : > { %v8138_v20 = vadd.f32 %v4212_v36, %v4044_v34  ;;  %v3094_v36 = vadd.f32 %v9078_v16, %v7262_v35  ;;  %v8153_v42 = vpop.f32.mrf.mxu0 }
 0x733   : > { %v3426_v52 = vpop.f32.mrf.mxu2 }
 0x734   : > { %v3427_v12 = vadd.f32 %v3426_v52, %v3258_v26  ;;  %v3595_v56 = vpop.f32.mrf.mxu3  ;;  %v9079_v26 = vld [vmem:[#allocation113_spill] sm:$0xff] }
 0x736   : > { %v3596_v45 = vadd.f32 %v3595_v56, %v3427_v12  ;;  %v3263_v12 = vadd.f32 %v9080_v2, %v3094_v36  ;;  %v4054_v2 = vadd.f32 %v7922_v10, %v8086_v55 }
 0x738   : > { %v3735_v38 = vmax.f32 %v3596_v45, 0.0  ;;  %3468 = vmatmul.bf16.gmra.mxu2 %v9075_v46  ;;  %4120 = vmatmul.bf16.gmra.mxu0 %v7776_v48 }
 0x739   : > { %3637 = vmatmul.bf16.gmra.mxu3 %v9076_v57  ;;  %v4215_v29 = vpop.f32.mrf.mxu1  ;;  %v4052_v57 = vadd.f32 %v7922_v10, %v8077_v53 }
 0x73a   : > { %v3819_v23 = vpack.c.bf16 %v3735_v38, %v3733_v27  ;;  %v8147_v34 = vadd.f32 %v4215_v29, %v4047_v19  ;;  %v8164_v36 = vpop.f32.mrf.mxu0 }
 0x73b   : > { %v3429_v18 = vpop.f32.mrf.mxu2 }
 0x73c   : > { %9077 = vst [vmem:[#allocation42_spill] sm:$0xff] %v8147_v34  ;;  %v3598_v3 = vpop.f32.mrf.mxu3  ;;  %4254 = vmatmul.bf16.gmra.mxu1 %v3819_v23  ;;  %v3430_v52 = vadd.f32 %v3429_v18, %v9079_v26  ;;  %v9082_v18 = vld [vmem:[#allocation53_spill] sm:$0xff] }
 0x73e   : > { %v3599_v19 = vadd.f32 %v3598_v3, %v3430_v52 }
 0x740   : > { %v3737_v29 = vmax.f32 %v3599_v19, 0.0  ;;  %v9085_v19 = vld [vmem:[#allocation118_spill] sm:$0xff] }
 0x741   : > { %v4217_v48 = vpop.f32.mrf.mxu1 }
 0x742   : > { %v8157_v56 = vadd.f32 %v4217_v48, %v4049_v40  ;;  %v9083_v48 = vld [vmem:[#allocation116_spill] sm:$0xff] }
 0x743   : > { %v3431_v45 = vpop.f32.mrf.mxu2  ;;  %v3099_v53 = vadd.f32 %v9083_v48, %v7262_v35 }
 0x744   : > { %v3432_v27 = vadd.f32 %v3431_v45, %v3263_v12  ;;  %v3600_v38 = vpop.f32.mrf.mxu3  ;;  %v9084_v12 = vld [vmem:[#allocation22_spill] sm:$0xff] }
 0x746   : > { %v3601_v46 = vadd.f32 %v3600_v38, %v3432_v27  ;;  %v3268_v27 = vadd.f32 %v9085_v19, %v3099_v53  ;;  %v4059_v19 = vadd.f32 %v7922_v10, %v8106_v9 }
 0x748   : > { %v3739_v23 = vmax.f32 %v3601_v46, 0.0  ;;  %3473 = vmatmul.bf16.gmra.mxu2 %v9081_v60  ;;  %4125 = vmatmul.bf16.gmra.mxu0 %v7799_v49 }
 0x749   : > { %3642 = vmatmul.bf16.gmra.mxu3 %v9082_v18  ;;  %v4220_v16 = vpop.f32.mrf.mxu1 }
 0x74a   : > { %v3821_v40 = vpack.c.bf16 %v3739_v23, %v3737_v29  ;;  %v8166_v26 = vadd.f32 %v4220_v16, %v4052_v57  ;;  %v8176_v29 = vpop.f32.mrf.mxu0  ;;  %v4057_v16 = vadd.f32 %v7922_v10, %v8096_v25  ;;  %v9087_v25 = vld [vmem:[#allocation24_spill] sm:$0xff] }
 0x74b   : > { %v3434_v3 = vpop.f32.mrf.mxu2 }
 0x74c   : > { %v3603_v52 = vpop.f32.mrf.mxu3  ;;  %4259 = vmatmul.bf16.gmra.mxu1 %v3821_v40  ;;  %v3435_v45 = vadd.f32 %v3434_v3, %v9084_v12 }
 0x74e   : > { %v3604_v57 = vadd.f32 %v3603_v52, %v3435_v45 }
 0x750   : > { %v3741_v40 = vmax.f32 %v3604_v57, 0.0  ;;  %v9088_v57 = vld [vmem:[#allocation119_spill] sm:$0xff] }
 0x751   : > { %v4222_v49 = vpop.f32.mrf.mxu1 }
 0x752   : > { %v8174_v38 = vadd.f32 %v4222_v49, %v4054_v2  ;;  %v9086_v49 = vld [vmem:[#allocation25_spill] sm:$0xff]  ;;  %v8185_v45 = vpop.f32.mrf.mxu0 }
 0x753   : > { %v3436_v46 = vpop.f32.mrf.mxu2  ;;  %v3104_v52 = vadd.f32 %v9086_v49, %v7262_v35 }
 0x754   : > { %v3437_v23 = vadd.f32 %v3436_v46, %v3268_v27  ;;  %v3605_v60 = vpop.f32.mrf.mxu3 }
 0x756   : > { %v3606_v18 = vadd.f32 %v3605_v60, %v3437_v23 }
 0x758   : > { %v3743_v48 = vmax.f32 %v3606_v18, 0.0  ;;  %4130 = vmatmul.bf16.gmra.mxu0 %v7825_v37  ;;  %v3273_v37 = vadd.f32 %v9088_v57, %v3104_v52 }
 0x759   : > { %v4225_v55 = vpop.f32.mrf.mxu1 }
 0x75a   : > { %v3823_v3 = vpack.c.bf16 %v3743_v48, %v3741_v40  ;;  %v8181_v12 = vadd.f32 %v4225_v55, %v4057_v16  ;;  %v4062_v55 = vadd.f32 %v7922_v10, %v8119_v58  ;;  %v4064_v58 = vadd.f32 %v7922_v10, %v8130_v43 }
 0x75b   : > { %v3439_v53 = vpop.f32.mrf.mxu2  ;;  %v4067_v43 = vadd.f32 %v7922_v10, %v8140_v11  ;;  %v9092_v11 = vld [vmem:[#allocation122_spill] sm:$0xff] }
 0x75c   : > { %v3608_v2 = vpop.f32.mrf.mxu3  ;;  %4264 = vmatmul.bf16.gmra.mxu1 %v3823_v3  ;;  %v3440_v27 = vadd.f32 %v3439_v53, %v9087_v25  ;;  %v8195_v3 = vpop.f32.mrf.mxu0 }
 0x75e   : > { %v3609_v18 = vadd.f32 %v3608_v2, %v3440_v27  ;;  %v9089_v27 = vld [vmem:[#allocation27_spill] sm:$0xff] }
 0x75f   : > { %v3109_v57 = vadd.f32 %v9089_v27, %v7262_v35 }
 0x760   : > { %v3745_v49 = vmax.f32 %v3609_v18, 0.0 }
 0x761   : > { %v4227_v46 = vpop.f32.mrf.mxu1 }
 0x762   : > { %v8191_v23 = vadd.f32 %v4227_v46, %v4059_v19  ;;  %v4310_v19 = vmax.f32 %v7932_v50, 0.0  ;;  %v4311_v50 = vmax.f32 %v7939_v22, 0.0  ;;  %v4312_v22 = vmax.f32 %v7949_v4, 0.0 }
 0x763   : > { %v3441_v60 = vpop.f32.mrf.mxu2 }
 0x764   : > { %v3442_v16 = vadd.f32 %v3441_v60, %v3273_v37  ;;  %v3610_v40 = vpop.f32.mrf.mxu3  ;;  %v9090_v60 = vld [vmem:[#allocation121_spill] sm:$0xff] }
 0x766   : > { %v3611_v48 = vadd.f32 %v3610_v40, %v3442_v16  ;;  %v9091_v16 = vld [vmem:[#allocation28_spill] sm:$0xff] }
 0x768   : > { %v3747_v34 = vmax.f32 %v3611_v48, 0.0  ;;  %4135 = vmatmul.bf16.gmra.mxu0 %v7839_v28 }
 0x769   : > { %v4230_v9 = vpop.f32.mrf.mxu1 }
 0x76a   : > { %v3825_v53 = vpack.c.bf16 %v3747_v34, %v3745_v49  ;;  %v4231_v25 = vadd.f32 %v4230_v9, %v4062_v55  ;;  %v3278_v34 = vadd.f32 %v9091_v16, %v3109_v57  ;;  %v3114_v16 = vadd.f32 %v7765_v62, %v7262_v35 }
 0x76b   : > { %v3444_v52 = vpop.f32.mrf.mxu2 }
 0x76c   : > { %v4342_v46 = vmax.f32 %v4231_v25, 0.0  ;;  %v3613_v2 = vpop.f32.mrf.mxu3  ;;  %4269 = vmatmul.bf16.gmra.mxu1 %v3825_v53  ;;  %v3445_v18 = vadd.f32 %v3444_v52, %v9090_v60 }
 0x76e   : > { %v8201_v37 = vsub.f32 %v4310_v19, %v4342_v46  ;;  %v3614_v55 = vadd.f32 %v3613_v2, %v3445_v18  ;;  %v8210_v19 = vpop.f32.mrf.mxu0 }
 0x770   : > { %v3749_v52 = vmax.f32 %v3614_v55, 0.0 }
 0x771   : > { %v4232_v28 = vpop.f32.mrf.mxu1 }
 0x772   : > { %v4233_v40 = vadd.f32 %v4232_v28, %v4064_v58 }
 0x773   : > { %v3446_v48 = vpop.f32.mrf.mxu2 }
 0x774   : > { %v4343_v49 = vmax.f32 %v4233_v40, 0.0  ;;  %v3447_v9 = vadd.f32 %v3446_v48, %v3278_v34  ;;  %v3615_v53 = vpop.f32.mrf.mxu3  ;;  %v4069_v40 = vadd.f32 %v7922_v10, %v8153_v42  ;;  %v4072_v42 = vadd.f32 %v7922_v10, %v8164_v36 }
 0x775   : > { %v4074_v36 = vadd.f32 %v7922_v10, %v8176_v29  ;;  %v4077_v29 = vadd.f32 %v7922_v10, %v8185_v45  ;;  %v4079_v45 = vadd.f32 %v7922_v10, %v8195_v3 }
 0x776   : > { %v3616_v25 = vadd.f32 %v3615_v53, %v3447_v9  ;;  %v8208_v27 = vsub.f32 %v4311_v50, %v4343_v49  ;;  %v8222_v50 = vpop.f32.mrf.mxu0  ;;  %v9093_v49 = vld [vmem:[#allocation124_spill] sm:$0xff] }
 0x777   : > { %v3283_v9 = vadd.f32 %v9093_v49, %v3114_v16 }
 0x778   : > { %v3751_v46 = vmax.f32 %v3616_v25, 0.0  ;;  %v4313_v25 = vmax.f32 %v7956_v7, 0.0  ;;  %v4314_v7 = vmax.f32 %v7964_v8, 0.0  ;;  %v4315_v8 = vmax.f32 %v7971_v51, 0.0 }
 0x779   : > { %v4235_v60 = vpop.f32.mrf.mxu1  ;;  %v4316_v51 = vmax.f32 %v7981_v32, 0.0 }
 0x77a   : > { %v3827_v57 = vpack.c.bf16 %v3751_v46, %v3749_v52  ;;  %v4236_v58 = vadd.f32 %v4235_v60, %v4067_v43 }
 0x77b   : > { %v3449_v28 = vpop.f32.mrf.mxu2 }
 0x77c   : > { %v4344_v2 = vmax.f32 %v4236_v58, 0.0  ;;  %v3618_v18 = vpop.f32.mrf.mxu3  ;;  %4274 = vmatmul.bf16.gmra.mxu1 %v3827_v57  ;;  %v3450_v48 = vadd.f32 %v3449_v28, %v9092_v11 }
 0x77e   : > { %v8217_v34 = vsub.f32 %v4312_v22, %v4344_v2  ;;  %v3619_v43 = vadd.f32 %v3618_v18, %v3450_v48  ;;  %v8230_v16 = vpop.f32.mrf.mxu0 }
 0x780   : > { %v3753_v58 = vmax.f32 %v3619_v43, 0.0 }
 0x781   : > { %v4237_v55 = vpop.f32.mrf.mxu1 }
 0x782   : > { %v4238_v53 = vadd.f32 %v4237_v55, %v4069_v40  ;;  %v3119_v55 = vadd.f32 %v7779_v63, %v7262_v35 }
 0x783   : > { %v3451_v4 = vpop.f32.mrf.mxu2 }
 0x784   : > { %v4345_v52 = vmax.f32 %v4238_v53, 0.0  ;;  %v3452_v46 = vadd.f32 %v3451_v4, %v3283_v9  ;;  %v3620_v62 = vpop.f32.mrf.mxu3  ;;  %v3288_v4 = vadd.f32 %v7781_v31, %v3119_v55 }
 0x786   : > { %v3621_v60 = vadd.f32 %v3620_v62, %v3452_v46  ;;  %v8226_v57 = vsub.f32 %v4313_v25, %v4345_v52 }
 0x788   : > { %v3755_v28 = vmax.f32 %v3621_v60, 0.0 }
 0x789   : > { %v4240_v22 = vpop.f32.mrf.mxu1 }
 0x78a   : > { %v3829_v2 = vpack.c.bf16 %v3755_v28, %v3753_v58  ;;  %v4241_v11 = vadd.f32 %v4240_v22, %v4072_v42  ;;  %v8242_v42 = vpop.f32.mrf.mxu0 }
 0x78b   : > { %v3454_v40 = vpop.f32.mrf.mxu2 }
 0x78c   : > { %v4346_v18 = vmax.f32 %v4241_v11, 0.0  ;;  %v3623_v48 = vpop.f32.mrf.mxu3  ;;  %4279 = vmatmul.bf16.gmra.mxu1 %v3829_v2  ;;  %v3455_v9 = vadd.f32 %v3454_v40, %v7771_v59 }
 0x78e   : > { %v8235_v49 = vsub.f32 %v4314_v7, %v4346_v18  ;;  %v3624_v52 = vadd.f32 %v3623_v48, %v3455_v9  ;;  %v9094_v18 = vld [vmem:[#allocation31_spill] sm:$0xff]  ;;  %v9095_v9 = vld [vmem:[#allocation30_spill] sm:$0xff] }
 0x78f   : > { %v3124_v48 = vadd.f32 %v9094_v18, %v7262_v35 }
 0x790   : > { %v3757_v59 = vmax.f32 %v3624_v52, 0.0  ;;  %v4317_v52 = vmax.f32 %v7988_v47, 0.0  ;;  %v4318_v47 = vmax.f32 %v7998_v13, 0.0  ;;  %v4319_v13 = vmax.f32 %v8003_v33, 0.0  ;;  %v9101_v33 = vld [vmem:[#allocation128_spill] sm:$0xff] }
 0x791   : > { %v4242_v53 = vpop.f32.mrf.mxu1 }
 0x792   : > { %v4243_v25 = vadd.f32 %v4242_v53, %v4074_v36  ;;  %v8253_v36 = vpop.f32.mrf.mxu0 }
 0x793   : > { %v3456_v43 = vpop.f32.mrf.mxu2 }
 0x794   : > { %v4347_v46 = vmax.f32 %v4243_v25, 0.0  ;;  %v3457_v62 = vadd.f32 %v3456_v43, %v3288_v4  ;;  %v3625_v60 = vpop.f32.mrf.mxu3  ;;  %v9096_v25 = vld [vmem:[#allocation125_spill] sm:$0xff] }
 0x795   : > { %v3293_v43 = vadd.f32 %v9096_v25, %v3124_v48  ;;  %v9097_v48 = vld [vmem:[#allocation34_spill] sm:$0xff] }
 0x796   : > { %v3626_v63 = vadd.f32 %v3625_v60, %v3457_v62  ;;  %v8244_v58 = vsub.f32 %v4315_v8, %v4347_v46 }
 0x798   : > { %v3759_v28 = vmax.f32 %v3626_v63, 0.0 }
 0x799   : > { %v4245_v22 = vpop.f32.mrf.mxu1 }
 0x79a   : > { %v3831_v31 = vpack.c.bf16 %v3759_v28, %v3757_v59  ;;  %v4246_v2 = vadd.f32 %v4245_v22, %v4077_v29  ;;  %v4082_v28 = vadd.f32 %v7922_v10, %v8210_v19  ;;  %v4084_v19 = vadd.f32 %v7922_v10, %v8222_v50 }
 0x79b   : > { %v3459_v11 = vpop.f32.mrf.mxu2 }
 0x79c   : > { %v4348_v40 = vmax.f32 %v4246_v2, 0.0  ;;  %v3628_v7 = vpop.f32.mrf.mxu3  ;;  %4284 = vmatmul.bf16.gmra.mxu1 %v3831_v31  ;;  %v3460_v53 = vadd.f32 %v3459_v11, %v9095_v9  ;;  %v8264_v31 = vpop.f32.mrf.mxu0 }
 0x79e   : > { %v8251_v55 = vsub.f32 %v4316_v51, %v4348_v40  ;;  %v3629_v46 = vadd.f32 %v3628_v7, %v3460_v53  ;;  %v9098_v53 = vld [vmem:[#allocation127_spill] sm:$0xff] }
 0x7a0   : > { %v3761_v3 = vmax.f32 %v3629_v46, 0.0 }
 0x7a1   : > { %v4247_v4 = vpop.f32.mrf.mxu1 }
 0x7a2   : > { %v4248_v8 = vadd.f32 %v4247_v4, %v4079_v45  ;;  %v3129_v45 = vadd.f32 %v9097_v48, %v7262_v35 }
 0x7a3   : > { %v3461_v32 = vpop.f32.mrf.mxu2 }
 0x7a4   : > { %v4349_v62 = vmax.f32 %v4248_v8, 0.0  ;;  %v3462_v60 = vadd.f32 %v3461_v32, %v3293_v43  ;;  %v3630_v63 = vpop.f32.mrf.mxu3  ;;  %v9099_v43 = vld [vmem:[#allocation35_spill] sm:$0xff] }
 0x7a5   : > { %v3298_v8 = vadd.f32 %v9099_v43, %v3129_v45  ;;  %v9102_v45 = vld [vmem:[#allocation38_spill] sm:$0xff] }
 0x7a6   : > { %v3631_v29 = vadd.f32 %v3630_v63, %v3462_v60  ;;  %v8260_v59 = vsub.f32 %v4317_v52, %v4349_v62  ;;  %v4096_v52 = vpop.f32.mrf.mxu0 }
 0x7a8   : > { %v3763_v22 = vmax.f32 %v3631_v29, 0.0 }
 0x7a9   : > { %v4250_v2 = vpop.f32.mrf.mxu1 }
 0x7aa   : > { %v3833_v11 = vpack.c.bf16 %v3763_v22, %v3761_v3  ;;  %v4251_v51 = vadd.f32 %v4250_v2, %v4082_v28 }
 0x7ab   : > { %v3464_v40 = vpop.f32.mrf.mxu2 }
 0x7ac   : > { %v4350_v7 = vmax.f32 %v4251_v51, 0.0  ;;  %v3633_v18 = vpop.f32.mrf.mxu3  ;;  %4289 = vmatmul.bf16.gmra.mxu1 %v3833_v11  ;;  %v3465_v4 = vadd.f32 %v3464_v40, %v9098_v53 }
 0x7ae   : > { %v8269_v9 = vsub.f32 %v4318_v47, %v4350_v7  ;;  %v3634_v62 = vadd.f32 %v3633_v18, %v3465_v4  ;;  %v4098_v40 = vpop.f32.mrf.mxu0  ;;  %v9100_v47 = vld [vmem:[#allocation130_spill] sm:$0xff] }
 0x7af   : > { %v3134_v7 = vadd.f32 %v9100_v47, %v7262_v35 }
 0x7b0   : > { %v3765_v22 = vmax.f32 %v3634_v62, 0.0 }
 0x7b1   : > { %v4252_v25 = vpop.f32.mrf.mxu1 }
 0x7b2   : > { %v4253_v32 = vadd.f32 %v4252_v25, %v4084_v19  ;;  %v3303_v19 = vadd.f32 %v9102_v45, %v3134_v7  ;;  %v9105_v7 = vld [vmem:[#allocation133_spill] sm:$0xff] }
 0x7b3   : > { %v3466_v46 = vpop.f32.mrf.mxu2 }
 0x7b4   : > { %v4351_v60 = vmax.f32 %v4253_v32, 0.0  ;;  %v3467_v63 = vadd.f32 %v3466_v46, %v3298_v8  ;;  %v3635_v29 = vpop.f32.mrf.mxu3 }
 0x7b6   : > { %v8276_v28 = vsub.f32 %v4319_v13, %v4351_v60  ;;  %v3636_v3 = vadd.f32 %v3635_v29, %v3467_v63  ;;  %v4101_v32 = vpop.f32.mrf.mxu0 }
 0x7b8   : > { %v3767_v2 = vmax.f32 %v3636_v3, 0.0  ;;  %v9103_v3 = vld [vmem:[#allocation131_spill] sm:$0xff] }
 0x7b9   : > { %v8278_v10 = vpop.f32.mrf.mxu1 }
 0x7ba   : > { %v3835_v50 = vpack.c.bf16 %v3767_v2, %v3765_v22  ;;  %v3139_v22 = vadd.f32 %v9103_v3, %v7262_v35  ;;  %v9104_v2 = vld [vmem:[#allocation39_spill] sm:$0xff]  ;;  %v8291_v35 = vld [vmem:[%s8426_s6] ss:$0 sm:$0xff] }
 0x7bb   : > { %v3469_v11 = vpop.f32.mrf.mxu2 }
 0x7bc   : > { %v3638_v51 = vpop.f32.mrf.mxu3  ;;  %4294 = vmatmul.bf16.gmra.mxu1 %v3835_v50  ;;  %v3470_v18 = vadd.f32 %v3469_v11, %v9101_v33 }
 0x7be   : > { %v3639_v4 = vadd.f32 %v3638_v51, %v3470_v18  ;;  %v4103_v11 = vpop.f32.mrf.mxu0  ;;  %v3308_v51 = vadd.f32 %v9105_v7, %v3139_v22  ;;  %v4325_v22 = vmax.f32 %v8052_v17, 0.0 }
 0x7c0   : > { %v3769_v46 = vmax.f32 %v3639_v4, 0.0 }
 0x7c1   : > { %v4257_v48 = vpop.f32.mrf.mxu1 }
 0x7c3   : > { %v3471_v53 = vpop.f32.mrf.mxu2 }
 0x7c4   : > { %v3472_v25 = vadd.f32 %v3471_v53, %v3303_v19  ;;  %v3640_v43 = vpop.f32.mrf.mxu3 }
 0x7c6   : > { %v3641_v8 = vadd.f32 %v3640_v43, %v3472_v25 }
 0x7c8   : > { %v3771_v13 = vmax.f32 %v3641_v8, 0.0 }
 0x7c9   : > { %v4260_v62 = vpop.f32.mrf.mxu1 }
 0x7ca   : > { %v3837_v60 = vpack.c.bf16 %v3771_v13, %v3769_v46  ;;  %v4106_v46 = vpop.f32.mrf.mxu0  ;;  %v4097_v13 = vadd.f32 %v8291_v35, %v4096_v52  ;;  %v4092_v52 = vadd.f32 %v8291_v35, %v8253_v36 }
 0x7cb   : > { %v3474_v63 = vpop.f32.mrf.mxu2 }
 0x7cc   : > { %v3643_v29 = vpop.f32.mrf.mxu3  ;;  %4299 = vmatmul.bf16.gmra.mxu1 %v3837_v60  ;;  %v3475_v50 = vadd.f32 %v3474_v63, %v9104_v2  ;;  %v4099_v60 = vadd.f32 %v8291_v35, %v4098_v40  ;;  %v4094_v2 = vadd.f32 %v8291_v35, %v8264_v31  ;;  %v4102_v40 = vadd.f32 %v8291_v35, %v4101_v32 }
 0x7cd   : > { %v4323_v31 = vmax.f32 %v8037_v0, 0.0  ;;  %v4104_v0 = vadd.f32 %v8291_v35, %v4103_v11  ;;  %v4107_v11 = vadd.f32 %v8291_v35, %v4106_v46  ;;  %v4329_v46 = vmax.f32 %v8084_v1, 0.0 }
 0x7ce   : > { %v3644_v18 = vadd.f32 %v3643_v29, %v3475_v50 }
 0x7d0   : > { %v3773_v4 = vmax.f32 %v3644_v18, 0.0 }
 0x7d1   : > { %v4262_v47 = vpop.f32.mrf.mxu1 }
 0x7d2   : > { %v4108_v7 = vpop.f32.mrf.mxu0 }
 0x7d3   : > { %v3476_v33 = vpop.f32.mrf.mxu2 }
 0x7d4   : > { %v3477_v45 = vadd.f32 %v3476_v33, %v3308_v51  ;;  %v3645_v19 = vpop.f32.mrf.mxu3  ;;  %v4263_v51 = vadd.f32 %v4262_v47, %v4094_v2  ;;  %v4089_v47 = vadd.f32 %v8291_v35, %v8242_v42  ;;  %v4327_v2 = vmax.f32 %v8069_v30, 0.0 }
 0x7d6   : > { %v3646_v53 = vadd.f32 %v3645_v19, %v3477_v45  ;;  %v4324_v45 = vmax.f32 %v8045_v6, 0.0  ;;  %v4258_v6 = vadd.f32 %v4257_v48, %v4089_v47  ;;  %v4321_v48 = vmax.f32 %v8020_v54, 0.0 }
 0x7d8   : > { %v3775_v25 = vmax.f32 %v3646_v53, 0.0  ;;  %v4261_v53 = vadd.f32 %v4260_v62, %v4092_v52  ;;  %v4322_v62 = vmax.f32 %v8030_v39, 0.0  ;;  %v4353_v42 = vmax.f32 %v4258_v6, 0.0 }
 0x7d9   : > { %v4265_v43 = vpop.f32.mrf.mxu1 }
 0x7da   : > { %v3839_v8 = vpack.c.bf16 %v3775_v25, %v3773_v4  ;;  %v4266_v29 = vadd.f32 %v4265_v43, %v4097_v13  ;;  %v4355_v4 = vmax.f32 %v4263_v51, 0.0  ;;  %v4326_v43 = vmax.f32 %v8062_v41, 0.0  ;;  %v4111_v32 = vpop.f32.mrf.mxu0 }
 0x7db   : > { %v4354_v13 = vmax.f32 %v4261_v53, 0.0  ;;  %v4385_v39 = vsub.f32 %v4321_v48, %v4353_v42  ;;  %v4333_v42 = vmax.f32 %v8121_v24, 0.0  ;;  %v4335_v24 = vmax.f32 %v8138_v20, 0.0 }
 0x7dc   : > { %4304 = vmatmul.bf16.gmra.mxu1 %v3839_v8  ;;  %v4356_v33 = vmax.f32 %v4266_v29, 0.0  ;;  %v4387_v36 = vsub.f32 %v4323_v31, %v4355_v4  ;;  %v4341_v20 = vmax.f32 %v8191_v23, 0.0 }
 0x7de   : > { %v4388_v17 = vsub.f32 %v4324_v45, %v4356_v33 }
 0x7e1   : > { %v4267_v63 = vpop.f32.mrf.mxu1 }
 0x7e2   : > { %v4268_v3 = vadd.f32 %v4267_v63, %v4099_v60  ;;  %v4087_v63 = vadd.f32 %v8291_v35, %v8230_v16  ;;  %v4320_v16 = vmax.f32 %v8013_v61, 0.0 }
 0x7e4   : > { %v4357_v50 = vmax.f32 %v4268_v3, 0.0  ;;  %v4256_v29 = vadd.f32 %v8278_v10, %v4087_v63  ;;  %v4386_v3 = vsub.f32 %v4322_v62, %v4354_v13  ;;  %v4331_v13 = vmax.f32 %v8101_v44, 0.0 }
 0x7e5   : > { %v4332_v63 = vmax.f32 %v8111_v21, 0.0 }
 0x7e6   : > { %v4389_v18 = vsub.f32 %v4325_v22, %v4357_v50  ;;  %v4352_v51 = vmax.f32 %v4256_v29, 0.0 }
 0x7e8   : > { %4407 = vmatpush.xpose.msra.mxu2 %v4389_v18  ;;  %v4113_v18 = vpop.f32.mrf.mxu0  ;;  %v4384_v45 = vsub.f32 %v4320_v16, %v4352_v51 }
 0x7e9   : > { %v4270_v19 = vpop.f32.mrf.mxu1  ;;  %v4114_v1 = vadd.f32 %v8291_v35, %v4113_v18 }
 0x7ea   : > { %v4271_v25 = vadd.f32 %v4270_v19, %v4102_v40  ;;  %v4328_v40 = vmax.f32 %v8079_v14, 0.0  ;;  %v4109_v19 = vadd.f32 %v8291_v35, %v4108_v7  ;;  %v4112_v14 = vadd.f32 %v8291_v35, %v4111_v32 }
 0x7eb   : > { %v4330_v7 = vmax.f32 %v8094_v5, 0.0 }
 0x7ec   : > { %v4358_v8 = vmax.f32 %v4271_v25, 0.0  ;;  %4408 = vmatpush.xpose.msra.mxu2 %v4388_v17 }
 0x7ee   : > { %v8306_v60 = vsub.f32 %v4326_v43, %v4358_v8 }
 0x7f0   : > { %4409 = vmatpush.xpose.msra.mxu2 %v4387_v36  ;;  %v4116_v61 = vpop.f32.mrf.mxu0 }
 0x7f1   : > { %v4272_v41 = vpop.f32.mrf.mxu1  ;;  %v4117_v32 = vadd.f32 %v8291_v35, %v4116_v61 }
 0x7f2   : > { %v4273_v22 = vadd.f32 %v4272_v41, %v4104_v0 }
 0x7f4   : > { %v4359_v50 = vmax.f32 %v4273_v22, 0.0  ;;  %4410 = vmatpush.xpose.msra.mxu2 %v4386_v3 }
 0x7f6   : > { %v8315_v33 = vsub.f32 %v4327_v2, %v4359_v50  ;;  %v4334_v2 = vmax.f32 %v8128_v15, 0.0 }
 0x7f8   : > { %4411 = vmatpush.xpose.msra.mxu2 %v4385_v39 }
 0x7f9   : > { %v4275_v10 = vpop.f32.mrf.mxu1 }
 0x7fa   : > { %v4276_v52 = vadd.f32 %v4275_v10, %v4107_v11 }
 0x7fc   : > { %v4360_v54 = vmax.f32 %v4276_v52, 0.0  ;;  %4412 = vmatpush.xpose.msra.mxu2 %v4384_v45 }
 0x7fe   : > { %v8320_v30 = vsub.f32 %v4328_v40, %v4360_v54 }
 0x800   : > { %4413 = vmatpush.xpose.msra.mxu2 %v8276_v28  ;;  %v4118_v28 = vpop.f32.mrf.mxu0 }
 0x801   : > { %v4277_v53 = vpop.f32.mrf.mxu1  ;;  %v4119_v44 = vadd.f32 %v8291_v35, %v4118_v28 }
 0x802   : > { %v4278_v4 = vadd.f32 %v4277_v53, %v4109_v19 }
 0x804   : > { %v4361_v17 = vmax.f32 %v4278_v4, 0.0  ;;  %4414 = vmatpush.xpose.msra.mxu2 %v8269_v9 }
 0x806   : > { %v8326_v25 = vsub.f32 %v4329_v46, %v4361_v17 }
 0x808   : > { %4415 = vmatpush.xpose.msra.mxu2 %v8260_v59  ;;  %v4121_v5 = vpop.f32.mrf.mxu0 }
 0x809   : > { %v4280_v31 = vpop.f32.mrf.mxu1  ;;  %v4122_v21 = vadd.f32 %v8291_v35, %v4121_v5 }
 0x80a   : > { %v4281_v43 = vadd.f32 %v4280_v31, %v4112_v14 }
 0x80c   : > { %v4362_v47 = vmax.f32 %v4281_v43, 0.0  ;;  %4416 = vmatpush.xpose.msra.mxu2 %v8251_v55 }
 0x80e   : > { %v8332_v8 = vsub.f32 %v4330_v7, %v4362_v47 }
 0x810   : > { %4417 = vmatpush.xpose.msra.mxu2 %v8244_v58 }
 0x811   : > { %v4282_v9 = vpop.f32.mrf.mxu1 }
 0x812   : > { %v4283_v6 = vadd.f32 %v4282_v9, %v4114_v1  ;;  %v4340_v9 = vmax.f32 %v8181_v12, 0.0 }
 0x814   : > { %v4363_v36 = vmax.f32 %v4283_v6, 0.0  ;;  %4418 = vmatpush.xpose.msra.mxu2 %v8235_v49  ;;  %v4123_v49 = vpop.f32.mrf.mxu0 }
 0x816   : > { %v8338_v59 = vsub.f32 %v4331_v13, %v4363_v36 }
 0x818   : > { %4419 = vmatpush.xpose.msra.mxu2 %v8226_v57 }
 0x819   : > { %v4285_v55 = vpop.f32.mrf.mxu1 }
 0x81a   : > { %v4286_v62 = vadd.f32 %v4285_v55, %v4117_v32  ;;  %v4339_v32 = vmax.f32 %v8174_v38, 0.0  ;;  %v9106_v38 = vld [vmem:[#allocation42_spill] sm:$0xff] }
 0x81c   : > { %v4364_v0 = vmax.f32 %v4286_v62, 0.0  ;;  %4420 = vmatpush.xpose.msra.mxu2 %v8217_v34  ;;  %v4126_v48 = vpop.f32.mrf.mxu0 }
 0x81e   : > { %v8344_v58 = vsub.f32 %v4332_v63, %v4364_v0  ;;  %v4338_v0 = vmax.f32 %v8166_v26, 0.0  ;;  %v4406_v26 = vld [vmem:[%s8427_s7] sm:$0x1] }
 0x820   : > { %4421 = vmatpush.xpose.msra.mxu2 %v8208_v27  ;;  %v4124_v27 = vadd.f32 %v8291_v35, %v4123_v49 }
 0x821   : > { %v4287_v41 = vpop.f32.mrf.mxu1 }
 0x822   : > { %v4288_v29 = vadd.f32 %v4287_v41, %v4119_v44  ;;  %v4127_v44 = vadd.f32 %v8291_v35, %v4126_v48 }
 0x824   : > { %v4365_v3 = vmax.f32 %v4288_v29, 0.0  ;;  %4422 = vmatpush.xpose.msra.mxu2 %v8201_v37  ;;  %v4128_v18 = vpop.f32.mrf.mxu0  ;;  %v4337_v29 = vmax.f32 %v8157_v56, 0.0 }
 0x825   : > { %v4129_v55 = vadd.f32 %v8291_v35, %v4128_v18 }
 0x826   : > { %v8350_v57 = vsub.f32 %v4333_v42, %v4365_v3 }
 0x827   : > { %4423 = vmatmul.f32.vlgmr.msra.gmra.mxu2 %v4406_v26 }
 0x829   : > { %v4290_v22 = vpop.f32.mrf.mxu1 }
 0x82a   : > { %v4291_v34 = vadd.f32 %v4290_v22, %v4122_v21  ;;  %v4336_v21 = vmax.f32 %v9106_v38, 0.0 }
 0x82c   : > { %v4366_v50 = vmax.f32 %v4291_v34, 0.0  ;;  %v4131_v45 = vpop.f32.mrf.mxu0 }
 0x82d   : > { %v4132_v6 = vadd.f32 %v8291_v35, %v4131_v45  ;;  %v4491_v45 = vlaneseq }
 0x82e   : > { %v4398_v51 = vsub.f32 %v4334_v2, %v4366_v50 }
 0x82f   : > { %vm4493_vm10 = vcmp.lt.s32.totalorder %v4491_v45, 256 }
 0x831   : > { %v4292_v39 = vpop.f32.mrf.mxu1 }
 0x832   : > { %v4293_v16 = vadd.f32 %v4292_v39, %v4124_v27 }
 0x834   : > { %v4367_v11 = vmax.f32 %v4293_v16, 0.0  ;;  %v4133_v40 = vpop.f32.mrf.mxu0 }
 0x835   : > { %v4134_v43 = vadd.f32 %v8291_v35, %v4133_v40 }
 0x836   : > { %v4399_v37 = vsub.f32 %v4335_v24, %v4367_v11 }
 0x839   : > { %v4295_v10 = vpop.f32.mrf.mxu1 }
 0x83a   : > { %v4296_v12 = vadd.f32 %v4295_v10, %v4127_v44 }
 0x83c   : > { %v4136_v53 = vpop.f32.mrf.mxu0  ;;  %v4368_v42 = vmax.f32 %v4296_v12, 0.0 }
 0x83d   : > { %v4137_v61 = vadd.f32 %v8291_v35, %v4136_v53 }
 0x83e   : > { %v4400_v22 = vsub.f32 %v4336_v21, %v4368_v42 }
 0x841   : > { %v4297_v52 = vpop.f32.mrf.mxu1 }
 0x842   : > { %v4298_v23 = vadd.f32 %v4297_v52, %v4129_v55 }
 0x844   : > { %v4138_v15 = vpop.f32.mrf.mxu0  ;;  %v4369_v49 = vmax.f32 %v4298_v23, 0.0 }
 0x845   : > { %v4139_v46 = vadd.f32 %v8291_v35, %v4138_v15 }
 0x846   : > { %v4401_v3 = vsub.f32 %v4337_v29, %v4369_v49 }
 0x849   : > { %v4300_v54 = vpop.f32.mrf.mxu1 }
 0x84a   : > { %v4301_v13 = vadd.f32 %v4300_v54, %v4132_v6 }
 0x84c   : > { %v4370_v62 = vmax.f32 %v4301_v13, 0.0 }
 0x84e   : > { %v4402_v41 = vsub.f32 %v4338_v0, %v4370_v62 }
 0x851   : > { %v4302_v19 = vpop.f32.mrf.mxu1 }
 0x852   : > { %v4303_v47 = vadd.f32 %v4302_v19, %v4134_v43 }
 0x854   : > { %v4371_v36 = vmax.f32 %v4303_v47, 0.0 }
 0x856   : > { %v4403_v63 = vsub.f32 %v4339_v32, %v4371_v36 }
 0x859   : > { %v4305_v4 = vpop.f32.mrf.mxu1 }
 0x85a   : > { %v4306_v14 = vadd.f32 %v4305_v4, %v4137_v61 }
 0x85c   : > { %v4372_v28 = vmax.f32 %v4306_v14, 0.0 }
 0x85e   : > { %v4404_v5 = vsub.f32 %v4340_v9, %v4372_v28 }
 0x861   : > { %v4307_v17 = vpop.f32.mrf.mxu1 }
 0x862   : > { %v4308_v31 = vadd.f32 %v4307_v17, %v4139_v46 }
 0x864   : > { %v4373_v7 = vmax.f32 %v4308_v31, 0.0 }
 0x866   : > { %v4405_v1 = vsub.f32 %v4341_v20, %v4373_v7 }
 0x868   : > { %4427 = vmatpush.xpose.msra.mxu3 %v4405_v1 }
 0x86c   : > { %4428 = vmatpush.xpose.msra.mxu3 %v4404_v5 }
 0x870   : > { %4429 = vmatpush.xpose.msra.mxu3 %v4403_v63 }
 0x874   : > { %4430 = vmatpush.xpose.msra.mxu3 %v4402_v41 }
 0x878   : > { %4431 = vmatpush.xpose.msra.mxu3 %v4401_v3 }
 0x87c   : > { %4432 = vmatpush.xpose.msra.mxu3 %v4400_v22 }
 0x880   : > { %4433 = vmatpush.xpose.msra.mxu3 %v4399_v37 }
 0x884   : > { %4434 = vmatpush.xpose.msra.mxu3 %v4398_v51 }
 0x888   : > { %4435 = vmatpush.xpose.msra.mxu3 %v8350_v57 }
 0x88c   : > { %4436 = vmatpush.xpose.msra.mxu3 %v8344_v58 }
 0x890   : > { %4437 = vmatpush.xpose.msra.mxu3 %v8338_v59 }
 0x894   : > { %4438 = vmatpush.xpose.msra.mxu3 %v8332_v8 }
 0x898   : > { %4439 = vmatpush.xpose.msra.mxu3 %v8326_v25 }
 0x89c   : > { %4440 = vmatpush.xpose.msra.mxu3 %v8320_v30 }
 0x8a0   : > { %4441 = vmatpush.xpose.msra.mxu3 %v8315_v33 }
 0x8a4   : > { %4442 = vmatpush.xpose.msra.mxu3 %v8306_v60 }
 0x8a7   : > { %4443 = vmatmul.f32.vlgmr.msra.gmra.mxu3 %v4406_v26 }
 0x8aa   : > { %v4424_v56 = vpop.f32.mrf.mxu2 }
 0x8ab   : > { %v5066_v35 = vmul.f32 -1.442695, %v4424_v56 }
 0x8ad   : > { %5205 = vpow2.f32 %v5066_v35 }
 0x8b3   : > { %v5206_v34 = vpop.eup %5205 }
 0x8b4   : > { %v4453_v57 = vadd.f32 1.0, %v5206_v34 }
 0x8b6   : > { %5207 = vrcp.f32 %v4453_v57  ;;  %vm4460_vm1 = vweird.f32 %v4453_v57  ;;  %v4466_v16 = vand.u32 2147483648, %v4453_v57  ;;  %v4464_v11 = vand.u32 2147483647, %v4453_v57 }
 0x8b8   : > { %v4467_v52 = vor.u32 1.1754944e-38, %v4466_v16  ;;  %vm4465_vm7 = vcmp.eq.f32.partialorder %v4464_v11, 8.507059e+37 }
 0x8bc   : > { %v5208_v8 = vpop.eup %5207 }
 0x8bd   : > { %v4456_v30 = vmul.f32 %v5208_v8, %v4453_v57  ;;  %vm4461_vm2 = vweird.f32 %v5208_v8 }
 0x8be   : > { %vm8382_vm4 = vmor %vm4460_vm1, %vm4461_vm2 }
 0x8bf   : > { %v4457_v33 = vsub.f32 1.0, %v4456_v30 }
 0x8c1   : > { %v4458_v60 = vmul.f32 %v5208_v8, %v4457_v33 }
 0x8c3   : > { %v4459_v39 = vadd.f32 %v5208_v8, %v4458_v60 }
 0x8c5   : > { %v4463_v54 = vsel %vm8382_vm4, %v5208_v8, %v4459_v39 }
 0x8c6   : > { %v4468_v15 = vsel %vm4465_vm7, %v4467_v52, %v4463_v54 }
 0x92a   : > { %v4444_v58 = vpop.f32.mrf.mxu3 }
 0x92b   : > { %v5067_v48 = vmul.f32 -1.442695, %v4444_v58 }
 0x92d   : > { %5209 = vpow2.f32 %v5067_v48 }
 0x933   : > { %v5210_v25 = vpop.eup %5209 }
 0x934   : > { %v4454_v59 = vadd.f32 1.0, %v5210_v25 }
 0x936   : > { %5211 = vrcp.f32 %v4454_v59  ;;  %v4481_v27 = vand.u32 2147483648, %v4454_v59  ;;  %v4479_v18 = vand.u32 2147483647, %v4454_v59  ;;  %vm4475_vm5 = vweird.f32 %v4454_v59 }
 0x938   : > { %v4482_v40 = vor.u32 1.1754944e-38, %v4481_v27  ;;  %vm4480_vm8 = vcmp.eq.f32.partialorder %v4479_v18, 8.507059e+37 }
 0x93c   : > { %v5212_v2 = vpop.eup %5211 }
 0x93d   : > { %v4471_v50 = vmul.f32 %v5212_v2, %v4454_v59  ;;  %vm4476_vm3 = vweird.f32 %v5212_v2 }
 0x93e   : > { %vm4477_vm6 = vmor %vm4475_vm5, %vm4476_vm3 }
 0x93f   : > { %v4472_v51 = vsub.f32 1.0, %v4471_v50 }
 0x941   : > { %v4473_v24 = vmul.f32 %v5212_v2, %v4472_v51 }
 0x943   : > { %v4474_v10 = vadd.f32 %v5212_v2, %v4473_v24 }
 0x945   : > { %v4478_v19 = vsel %vm4477_vm6, %v5212_v2, %v4474_v10 }
 0x946   : > { %v4483_v53 = vsel %vm4480_vm8, %v4482_v40, %v4478_v19 }
 0x947   : > { %v4487_v4 = vrot.slane %v4483_v53, 7 }
 0x949   : > { %v4489_v61 = vsel %vm4488_vm9, %v4468_v15, %v4487_v4 }
 0x94a   : > { %4495 = vst.msk [vmem:[%s591_s9] sm:$0x3] %vm4493_vm10, %v4489_v61 }
 0x94b   : > { %5243 = shalt.err (!%p5240_p5)
}
 0x94c   : > { %5165 = dma.vmem_to_hbm [thread:$0]  (%p5363_p6), %s4510_s22, 32, %s4512_s23, %s4497_s24  }
 0x94d PF: > { %s4523_s10 = sand.u32 1, %s5266_s27   ;;  %p5168_p7 = pnand %p4579_p9, %p5367_p8 }
 0x94e   : > { %s4524_s21 = scalar_lea.sflag [#allocation4], %s4523_s10 }
 0x94f   : > { %p5169_p10 = pneg %p5168_p7 }
 0x951   : > { %5261 = dma.done.wait (%p5169_p10), %s4524_s21, 32  }
 0x952   : > { %5263 = vsyncadd (%p5169_p10), %s4524_s21, 4294967264  ;;  %p18_p11 = scmp.ge.s32.totalorder %s5348_s11, 4   ;;  %s9109_s27 = smov %s5270_s28 }
 0x953   : > { %s9110_s28 = smov %s5274_s29  ;;  %s9111_s29 = smov %s5361_s14 }
 0x954   : > { %s9112_s30 = smov %s5348_s11  ;;  %20 = sbr.rel (!%p18_p11) target bundleno = 3 (0x3), region = 130 }
 0x959   :  { %4530 = vsyncpa [#allocation4], 1 }
 0x95a   :  { %4532 = vsyncpa [#allocation4 + $0x1], 1 }

</bundles_post_ra>
